<compile_context>
chip_gen: v7x
topology: tpu7x:2x2x1
jax: 0.10.0
libtpu: 0.0.40
codegen_flags: <defaults>
</compile_context>

<pallas_src>
from functools import partial
from math import sqrt

import jax
import jax.numpy as jnp
from jax.experimental import pallas as pl
from jax.experimental.pallas import tpu as pltpu


def _round_up(x, m):
    return ((x + m - 1) // m) * m


def _vmem_capacity_bytes():
    """Physical VMEM per TensorCore, with a conservative (v7x) fallback if the query fails."""
    try:
        cap = int(getattr(pltpu.get_tpu_info(), "vmem_capacity_bytes", 0) or 0)
        if cap >= 16 * 1024 * 1024:
            return cap
    except Exception:
        pass
    return 64 * 1024 * 1024


def _tpu_cores_per_chip():
    """Best-effort TensorCore-per-chip count (v7x megacore -> 2, v5e/v6e -> 1)."""
    try:
        dev = jax.devices()[0]
        nc = getattr(dev, "num_cores", None)
        if nc:
            return int(nc)
        if "v7" in str(getattr(dev, "device_kind", "")).lower():
            return 2
    except Exception:
        pass
    return 1


def _fused_upsample_kernel(x_ref, w_ref, b_ref, o_ref, *scratch, tm, mw, nt,
                           row_base, col_base, cache_patches):
    """One (batch, output-row-tile, Cout-tile) step of the polyphase upsample.

    x_ref : (1, Hp, Wp, Cin_pad)   full zero-padded NHWC slab of this batch (auto-pipelined;
                                   only re-DMA'd when the batch index changes)
    w_ref : (2, 2, K, TC)          per-phase tap-folded weights, K = nt*nt*Cin_pad
    b_ref : (1, TC)                f32 bias tile
    o_ref : (1, 2, 2, TM, Mw, TC)  lane-dense output block (channels minor, TC % 128 == 0)
    scratch (only when Cout is tiled): (4, TM*Mw, K) VMEM patch cache so the im2col patch is
             built once per (n, i) and reused across Cout tiles.
    """
    i = pl.program_id(1)
    c = pl.program_id(2)
    kdim = w_ref.shape[2]
    r0 = pl.multiple_of(i * tm, tm)           # first output row of this tile (phase space)
    bias = b_ref[...].astype(jnp.float32)     # (1, TC); hoisted out of the phase loop

    def build_patch(r, s):
        # im2col over this phase's taps: fold (t, u, Cin) into the MXU K dimension so the whole
        # phase is a single matmul with in-MXU accumulation.
        parts = []
        for t in range(nt):
            for u in range(nt):
                parts.append(x_ref[0,
                                   pl.ds(r0 + row_base[r] + t, tm),
                                   pl.ds(col_base[s] + u, mw),
                                   :])
        return jnp.concatenate(parts, axis=-1).reshape(tm * mw, kdim)

    if cache_patches:
        # Cout is tiled: build the four phase patches once (first Cout step) and reuse them for
        # the remaining Cout tiles.  Relies on the Cout grid axis staying "arbitrary"
        # (sequential on one core) -- do NOT flip it to "parallel".
        patch_ref, = scratch
        @pl.when(c == 0)
        def _build():
            for r in range(2):
                for s in range(2):
                    patch_ref[2 * r + s] = build_patch(r, s).astype(patch_ref.dtype)

    for r in range(2):              # output row phase
        for s in range(2):          # output col phase
            patch = patch_ref[2 * r + s] if cache_patches else build_patch(r, s)
            # Operands stay in the activation dtype (bf16 -> full MXU rate; f32 -> extra MXU
            # passes), f32 accumulation.  Default MXU precision; validated at 1e-3 vs HIGHEST.
            acc = jnp.dot(patch, w_ref[r, s],
                          preferred_element_type=jnp.float32) + bias     # (tm*mw, TC) f32
            o_ref[0, r, s] = acc.reshape(tm, mw, -1).astype(o_ref.dtype)


@partial(jax.jit, static_argnums=(3, 4, 5))
def fused_upsample_pallas(x_nchw, weight, bias, multiplier, pad, force_cout_tile=None):
    """x_nchw: (N, Cin, H, W);  weight: (Cin, Cout, k, k);  bias: (Cout,).

    `force_cout_tile` is a testing knob that forces the Cout tile width, exercising the
    Cout-tiled / patch-cached fallback path on shapes where full Cout would otherwise fit.
    """
    N, Cin, H, W = x_nchw.shape
    w_cin, Cout, k, k2 = weight.shape
    assert w_cin == Cin and k == k2
    dtype = x_nchw.dtype
    itemsize = dtype.itemsize

    kH = k + 1                                   # effective (averaged) kernel size
    p = kH - 1 - pad                             # equivalent direct-conv padding
    assert p >= 0, "padding too large for this kernel size"

    # ---- weight prep: identical math to the PyTorch forward ----
    w = weight.astype(jnp.float32) * multiplier
    w = jnp.pad(w, ((0, 0), (0, 0), (1, 1), (1, 1)))
    w_eff = (w[:, :, 1:, 1:] + w[:, :, :-1, 1:] +
             w[:, :, 1:, :-1] + w[:, :, :-1, :-1]) / 4.0           # (Cin, Cout, kH, kH)
    # transposed conv -> direct conv: flip spatially, lay out as HWIO
    w_hwio = jnp.transpose(w_eff[:, :, ::-1, ::-1], (2, 3, 0, 1))  # (kH, kH, Cin, Cout)

    # ---- polyphase geometry ----
    Ho = 2 * H + kH - 2 - 2 * pad
    Wo = 2 * W + kH - 2 - 2 * pad
    Mo = -(-Ho // 2)                             # rows per output phase
    Mw = _round_up(-(-Wo // 2), 8)               # cols per output phase (8-aligned)
    nt = (kH + 1) // 2                           # taps per phase per spatial dim
    a0 = [(p + r) % 2 for r in (0, 1)]           # first contributing tap of phase r
    off = [(r + a0[r] - p) // 2 for r in (0, 1)] # input offset of phase r
    L = max(0, -min(off))                        # top/left zero padding of x
    hi = max(off) + L

    # ---- channel padding: Cin -> multiple of 8 (K alignment); Cout -> multiple of 128 so the
    #      output minor dim is always lane-dense (fixes the small-Cout masked-store path) ----
    Cin_pad = _round_up(Cin, 8)
    Cout_pad = max(128, _round_up(Cout, 128))
    K = nt * nt * Cin_pad
    Wp = max(Mw + hi + nt - 1, W + L)            # padded input width

    # ---- per-generation VMEM budget (and explicit vmem_limit_bytes) ----
    vmem_cap = _vmem_capacity_bytes()
    vmem_limit = min(int(vmem_cap * 0.80), 100 * 1024 * 1024)
    budget = int(vmem_limit * 0.85)

    # ---- tile selection: prefer full Cout as the matmul N dimension (no Cout grid axis, patch
    #      built once, 256-wide MXU on v6e/v7x filled), then the largest row tile that fits ----
    if force_cout_tile is not None:
        assert Cout_pad % force_cout_tile == 0 and force_cout_tile % 128 == 0
        tc_candidates = [force_cout_tile]
    else:
        tc_candidates = [Cout_pad] + [t for t in (256, 128)
                                      if t < Cout_pad and Cout_pad % t == 0]
    tm_cap = _round_up(Mo, 8)
    tm_candidates = [tm_cap] + [t for t in (256, 128, 64, 32, 16, 8) if t < tm_cap]

    def working_set(tm, tc, cache):
        mo_p = _round_up(Mo, tm)
        hp = max(mo_p + hi + nt - 1, H + L)
        return (2 * hp * Wp * Cin_pad * itemsize            # input slab (double-buffered)
                + 2 * 4 * K * tc * itemsize                 # weights (double-buffered)
                + 2 * 4 * tm * Mw * tc * itemsize           # output block (double-buffered)
                + (4 if cache else 1) * tm * Mw * K * itemsize   # im2col patch(es)
                + tm * Mw * tc * 4                          # f32 phase accumulator
                + 2 * tc * 4)                               # bias

    TM, TC = None, None
    for tc in tc_candidates:
        for tm in tm_candidates:
            if working_set(tm, tc, Cout_pad // tc > 1) <= budget:
                TM, TC = tm, tc
                break
        if TM is not None:
            break
    if TM is None:
        # TODO(synk): add a manual-DMA row-window path (pl.ANY + make_async_copy) for inputs
        # whose per-batch slab does not fit VMEM; not needed for StyleGAN-scale shapes.
        TM, TC = 8, tc_candidates[-1]
        vmem_limit = min(int(vmem_cap * 0.90), 120 * 1024 * 1024)

    # Megacore (v7x) only: with batch 1 keep >= 2 row tiles so both TensorCores get work.
    # On single-core v5e/v6e this halving is skipped (it only doubles grid-step overhead).
    if _tpu_cores_per_chip() >= 2 and N == 1 and _round_up(Mo, TM) // TM < 2 and TM > 8:
        TM = max(8, _round_up(-(-Mo // 2), 8))

    C = Cout_pad // TC
    cache_patches = C > 1
    Mo_pad = _round_up(Mo, TM)
    Rt = Mo_pad // TM
    Hp = max(Mo_pad + hi + nt - 1, H + L)

    # ---- pad the input once; NCHW->NHWC transpose + pad fuse into one XLA copy ----
    x_nhwc = jnp.transpose(x_nchw, (0, 2, 3, 1))
    x_pad = jnp.pad(x_nhwc, ((0, 0), (L, Hp - H - L), (L, Wp - W - L),
                             (0, Cin_pad - Cin)))

    # ---- pack per-phase, tap-folded weights: (2, 2, K, Cout_pad) ----
    w_sp = jnp.pad(w_hwio, ((0, 2 * nt - kH), (0, 2 * nt - kH),
                            (0, Cin_pad - Cin), (0, 0)))
    w_packed = jnp.stack([
        jnp.stack([w_sp[a0[r]::2, a0[s]::2].reshape(K, Cout) for s in (0, 1)])
        for r in (0, 1)])                                          # (2, 2, K, Cout)
    if Cout_pad > Cout:
        w_packed = jnp.pad(w_packed, ((0, 0), (0, 0), (0, 0), (0, Cout_pad - Cout)))
    w_packed = w_packed.astype(dtype)
    b2d = jnp.pad(bias.astype(jnp.float32), (0, Cout_pad - Cout)).reshape(1, Cout_pad)

    row_base = tuple(off[r] + L for r in (0, 1))
    col_base = tuple(off[s] + L for s in (0, 1))

    kernel = partial(_fused_upsample_kernel, tm=TM, mw=Mw, nt=nt,
                     row_base=row_base, col_base=col_base,
                     cache_patches=cache_patches)

    out_struct = jax.ShapeDtypeStruct((N, 2, 2, Mo_pad, Mw, Cout_pad), dtype)
    scratch_shapes = ([pltpu.VMEM((4, TM * Mw, K), dtype)] if cache_patches else [])

    flops = 2 * N * 4 * Mo_pad * Mw * K * Cout_pad
    bytes_accessed = (x_pad.size * itemsize
                      + C * w_packed.size * itemsize + b2d.size * 4
                      + N * 4 * Mo_pad * Mw * Cout_pad * itemsize)

    out = pl.pallas_call(
        kernel,
        out_shape=out_struct,
        grid=(N, Rt, C),
        in_specs=[
            # Full per-batch padded slab: re-DMA'd only when the batch index changes and
            # overlapped with compute by the Pallas pipeline (no manual DMA, no halo re-reads).
            pl.BlockSpec((1, Hp, Wp, Cin_pad), lambda n, i, c: (n, 0, 0, 0)),
            pl.BlockSpec((2, 2, K, TC), lambda n, i, c: (0, 0, 0, c)),
            pl.BlockSpec((1, TC), lambda n, i, c: (0, c)),
        ],
        out_specs=pl.BlockSpec((1, 2, 2, TM, Mw, TC),
                               lambda n, i, c: (n, 0, 0, i, 0, c)),
        scratch_shapes=scratch_shapes,
        compiler_params=pltpu.CompilerParams(
            # The Cout axis MUST stay "arbitrary": the patch cache built at c == 0 is reused by
            # the later Cout tiles of the same (n, i).
            dimension_semantics=("parallel", "parallel", "arbitrary"),
            vmem_limit_bytes=vmem_limit),
        cost_estimate=pl.CostEstimate(flops=flops, transcendentals=0,
                                      bytes_accessed=bytes_accessed),
    )(x_pad, w_packed, b2d)

    # ---- interleave the 4 phases and return NCHW, trimmed to (Ho, Wo) ----
    out_nchw = jnp.transpose(out, (0, 5, 3, 1, 4, 2)).reshape(
        N, Cout_pad, 2 * Mo_pad, 2 * Mw)
    return out_nchw[:, :Cout, :Ho, :Wo]


class FusedUpsample:
    """JAX/Pallas port of conditional_stylegan.model.FusedUpsample (forward only)."""

    def __init__(self, in_channel, out_channel, kernel_size, padding=0, key=None):
        key = jax.random.PRNGKey(0) if key is None else key
        self.weight = jax.random.normal(
            key, (in_channel, out_channel, kernel_size, kernel_size), dtype=jnp.float32)
        self.bias = jnp.zeros((out_channel,), dtype=jnp.float32)
        fan_in = in_channel * kernel_size * kernel_size
        self.multiplier = sqrt(2.0 / fan_in)
        self.pad = padding

    def __call__(self, x_nchw):
        return fused_upsample_pallas(x_nchw, self.weight, self.bias,
                                     self.multiplier, self.pad)


def _reference(x_nchw, weight, bias, multiplier, pad):
    """Independent XLA reference for conv_transpose2d(stride=2) with the fused weights."""
    w = weight * multiplier
    w = jnp.pad(w, ((0, 0), (0, 0), (1, 1), (1, 1)))
    w_eff = (w[:, :, 1:, 1:] + w[:, :, :-1, 1:] +
             w[:, :, 1:, :-1] + w[:, :, :-1, :-1]) / 4.0
    kH = w_eff.shape[2]
    out = jax.lax.conv_general_dilated(
        x_nchw, w_eff[:, :, ::-1, ::-1],
        window_strides=(1, 1),
        padding=[(kH - 1 - pad, kH - 1 - pad)] * 2,
        lhs_dilation=(2, 2),
        dimension_numbers=('NCHW', 'IOHW', 'NCHW'),
        precision=jax.lax.Precision.HIGHEST)
    return out + bias[None, :, None, None]


if __name__ == "__main__":
    key = jax.random.PRNGKey(0)
    configs = [
        # (N, Cin, Cout, H, W, k, pad, force_cout_tile)
        (2, 4, 4, 16, 16, 3, 1, None),    # spec shapes: tiny Cout -> padded lane-dense channels
        (1, 8, 256, 6, 6, 3, 0, None),    # full-Cout single-dot-per-phase path (C == 1)
        (1, 8, 256, 6, 6, 3, 0, 128),     # forced Cout tiling -> patch-cache fallback path
        (1, 4, 4, 9, 9, 4, 1, None),      # even k -> odd effective kernel, odd output size
    ]
    for idx, (N, Cin, Cout, H, W, K, PAD, FTC) in enumerate(configs):
        key, k_w, k_b, k_x = jax.random.split(key, 4)
        mod = FusedUpsample(Cin, Cout, K, padding=PAD, key=k_w)
        mod.bias = 0.1 * jax.random.normal(k_b, (Cout,), dtype=jnp.float32)
        x = jax.random.normal(k_x, (N, Cin, H, W), dtype=jnp.float32)

        out = jax.block_until_ready(
            fused_upsample_pallas(x, mod.weight, mod.bias, mod.multiplier, mod.pad, FTC))
        ref = _reference(x, mod.weight, mod.bias, mod.multiplier, mod.pad)

        kH = K + 1
        Ho = 2 * H + kH - 2 - 2 * PAD
        Wo = 2 * W + kH - 2 - 2 * PAD
        assert out.shape == (N, Cout, Ho, Wo), (idx, out.shape)
        assert out.dtype == x.dtype, (idx, out.dtype)
        assert jnp.allclose(out, ref, atol=1e-3, rtol=1e-3), f"mismatch in config {idx}"

    print("KERNEL_OK")
</pallas_src>

<mosaic_0001>
module attributes {stable_mosaic.version = 11 : i64} {
  func.func @_fused_upsample_kernel(%arg0: i32, %arg1: i32, %arg2: i32, %arg3: memref<1x18x18x8xf32, #tpu.memory_space<vmem>>, %arg4: memref<2x2x32x128xf32, #tpu.memory_space<vmem>>, %arg5: memref<1x128xf32, #tpu.memory_space<vmem>>, %arg6: memref<1x2x2x16x16x128xf32, #tpu.memory_space<vmem>>) attributes {dimension_semantics = [#tpu.dimension_semantics<parallel>, #tpu.dimension_semantics<parallel>, #tpu.dimension_semantics<arbitrary>], iteration_bounds = array<i64: 2, 1, 1>, scalar_prefetch = 0 : i64, scratch_operands = 0 : i64, tpu.core_type = #tpu.core_type<tc>, window_params = [{transform_indices = @transform_0, window_bounds = array<i64: 1, 18, 18, 8>}, {transform_indices = @transform_1, window_bounds = array<i64: 2, 2, 32, 128>}, {transform_indices = @transform_2, window_bounds = array<i64: 1, 128>}, {transform_indices = @transform_3, window_bounds = array<i64: 1, 2, 2, 16, 16, 128>}]} {
    %c16_i32 = arith.constant 16 : i32
    %0 = arith.muli %arg1, %c16_i32 : i32
    %1 = tpu.assume_multiple %0, 16 : i32
    %c0 = arith.constant 0 : index
    %c0_0 = arith.constant 0 : index
    %2 = vector.load %arg5[%c0, %c0_0] : memref<1x128xf32, #tpu.memory_space<vmem>>, vector<1x128xf32>
    %c0_i32 = arith.constant 0 : i32
    %3 = arith.addi %1, %c0_i32 : i32
    %c0_i32_1 = arith.constant 0 : i32
    %4 = arith.addi %3, %c0_i32_1 : i32
    %c0_2 = arith.constant 0 : index
    %5 = arith.index_cast %4 : i32 to index
    %c0_3 = arith.constant 0 : index
    %c0_4 = arith.constant 0 : index
    %6 = vector.load %arg3[%c0_2, %5, %c0_3, %c0_4] : memref<1x18x18x8xf32, #tpu.memory_space<vmem>>, vector<1x16x16x8xf32>
    %7 = vector.shape_cast %6 : vector<1x16x16x8xf32> to vector<16x16x8xf32>
    %c0_i32_5 = arith.constant 0 : i32
    %8 = arith.addi %1, %c0_i32_5 : i32
    %c0_i32_6 = arith.constant 0 : i32
    %9 = arith.addi %8, %c0_i32_6 : i32
    %c0_7 = arith.constant 0 : index
    %10 = arith.index_cast %9 : i32 to index
    %c1 = arith.constant 1 : index
    %c0_8 = arith.constant 0 : index
    %11 = vector.load %arg3[%c0_7, %10, %c1, %c0_8] : memref<1x18x18x8xf32, #tpu.memory_space<vmem>>, vector<1x16x16x8xf32>
    %12 = vector.shape_cast %11 : vector<1x16x16x8xf32> to vector<16x16x8xf32>
    %c0_i32_9 = arith.constant 0 : i32
    %13 = arith.addi %1, %c0_i32_9 : i32
    %c1_i32 = arith.constant 1 : i32
    %14 = arith.addi %13, %c1_i32 : i32
    %c0_10 = arith.constant 0 : index
    %15 = arith.index_cast %14 : i32 to index
    %c0_11 = arith.constant 0 : index
    %c0_12 = arith.constant 0 : index
    %16 = vector.load %arg3[%c0_10, %15, %c0_11, %c0_12] : memref<1x18x18x8xf32, #tpu.memory_space<vmem>>, vector<1x16x16x8xf32>
    %17 = vector.shape_cast %16 : vector<1x16x16x8xf32> to vector<16x16x8xf32>
    %c0_i32_13 = arith.constant 0 : i32
    %18 = arith.addi %1, %c0_i32_13 : i32
    %c1_i32_14 = arith.constant 1 : i32
    %19 = arith.addi %18, %c1_i32_14 : i32
    %c0_15 = arith.constant 0 : index
    %20 = arith.index_cast %19 : i32 to index
    %c1_16 = arith.constant 1 : index
    %c0_17 = arith.constant 0 : index
    %21 = vector.load %arg3[%c0_15, %20, %c1_16, %c0_17] : memref<1x18x18x8xf32, #tpu.memory_space<vmem>>, vector<1x16x16x8xf32>
    %22 = vector.shape_cast %21 : vector<1x16x16x8xf32> to vector<16x16x8xf32>
    %23 = tpu.concatenate %7, %12, %17, %22 in 2 : vector<16x16x8xf32>, vector<16x16x8xf32>, vector<16x16x8xf32>, vector<16x16x8xf32> -> vector<16x16x32xf32>
    %24 = vector.shape_cast %23 : vector<16x16x32xf32> to vector<256x32xf32>
    %c0_18 = arith.constant 0 : index
    %c0_19 = arith.constant 0 : index
    %c0_20 = arith.constant 0 : index
    %c0_21 = arith.constant 0 : index
    %25 = vector.load %arg4[%c0_18, %c0_19, %c0_20, %c0_21] : memref<2x2x32x128xf32, #tpu.memory_space<vmem>>, vector<1x1x32x128xf32>
    %26 = vector.shape_cast %25 : vector<1x1x32x128xf32> to vector<32x128xf32>
    %cst = arith.constant dense<0.000000e+00> : vector<256x128xf32>
    %27 = tpu.matmul %24, %26, %cst {dimension_numbers = #tpu.dot_dimension_numbers<[1], [0], [0], [1], [0, 0, 1, 1], [], []>} : vector<256x32xf32>, vector<32x128xf32>, vector<256x128xf32> -> vector<256x128xf32>
    %28 = vector.broadcast %2 : vector<1x128xf32> to vector<256x128xf32>
    %29 = arith.addf %27, %28 : vector<256x128xf32>
    %30 = vector.shape_cast %29 : vector<256x128xf32> to vector<16x16x128xf32>
    %c0_22 = arith.constant 0 : index
    %c0_23 = arith.constant 0 : index
    %c0_24 = arith.constant 0 : index
    %c0_25 = arith.constant 0 : index
    %c0_26 = arith.constant 0 : index
    %c0_27 = arith.constant 0 : index
    %31 = vector.load %arg6[%c0_22, %c0_23, %c0_24, %c0_25, %c0_26, %c0_27] : memref<1x2x2x16x16x128xf32, #tpu.memory_space<vmem>>, vector<1x1x1x16x16x128xf32>
    %32 = vector.shape_cast %31 : vector<1x1x1x16x16x128xf32> to vector<16x16x128xf32>
    %33 = vector.shape_cast %30 : vector<16x16x128xf32> to vector<1x1x1x16x16x128xf32>
    tpu.vector_store %arg6[%c0_22, %c0_23, %c0_24, %c0_25, %c0_26, %c0_27], %33 {strides = array<i32>} : memref<1x2x2x16x16x128xf32, #tpu.memory_space<vmem>>, vector<1x1x1x16x16x128xf32>,
    %c0_i32_28 = arith.constant 0 : i32
    %34 = arith.addi %1, %c0_i32_28 : i32
    %c0_i32_29 = arith.constant 0 : i32
    %35 = arith.addi %34, %c0_i32_29 : i32
    %c0_30 = arith.constant 0 : index
    %36 = arith.index_cast %35 : i32 to index
    %c1_31 = arith.constant 1 : index
    %c0_32 = arith.constant 0 : index
    %37 = vector.load %arg3[%c0_30, %36, %c1_31, %c0_32] : memref<1x18x18x8xf32, #tpu.memory_space<vmem>>, vector<1x16x16x8xf32>
    %38 = vector.shape_cast %37 : vector<1x16x16x8xf32> to vector<16x16x8xf32>
    %c0_i32_33 = arith.constant 0 : i32
    %39 = arith.addi %1, %c0_i32_33 : i32
    %c0_i32_34 = arith.constant 0 : i32
    %40 = arith.addi %39, %c0_i32_34 : i32
    %c0_35 = arith.constant 0 : index
    %41 = arith.index_cast %40 : i32 to index
    %c2 = arith.constant 2 : index
    %c0_36 = arith.constant 0 : index
    %42 = vector.load %arg3[%c0_35, %41, %c2, %c0_36] : memref<1x18x18x8xf32, #tpu.memory_space<vmem>>, vector<1x16x16x8xf32>
    %43 = vector.shape_cast %42 : vector<1x16x16x8xf32> to vector<16x16x8xf32>
    %c0_i32_37 = arith.constant 0 : i32
    %44 = arith.addi %1, %c0_i32_37 : i32
    %c1_i32_38 = arith.constant 1 : i32
    %45 = arith.addi %44, %c1_i32_38 : i32
    %c0_39 = arith.constant 0 : index
    %46 = arith.index_cast %45 : i32 to index
    %c1_40 = arith.constant 1 : index
    %c0_41 = arith.constant 0 : index
    %47 = vector.load %arg3[%c0_39, %46, %c1_40, %c0_41] : memref<1x18x18x8xf32, #tpu.memory_space<vmem>>, vector<1x16x16x8xf32>
    %48 = vector.shape_cast %47 : vector<1x16x16x8xf32> to vector<16x16x8xf32>
    %c0_i32_42 = arith.constant 0 : i32
    %49 = arith.addi %1, %c0_i32_42 : i32
    %c1_i32_43 = arith.constant 1 : i32
    %50 = arith.addi %49, %c1_i32_43 : i32
    %c0_44 = arith.constant 0 : index
    %51 = arith.index_cast %50 : i32 to index
    %c2_45 = arith.constant 2 : index
    %c0_46 = arith.constant 0 : index
    %52 = vector.load %arg3[%c0_44, %51, %c2_45, %c0_46] : memref<1x18x18x8xf32, #tpu.memory_space<vmem>>, vector<1x16x16x8xf32>
    %53 = vector.shape_cast %52 : vector<1x16x16x8xf32> to vector<16x16x8xf32>
    %54 = tpu.concatenate %38, %43, %48, %53 in 2 : vector<16x16x8xf32>, vector<16x16x8xf32>, vector<16x16x8xf32>, vector<16x16x8xf32> -> vector<16x16x32xf32>
    %55 = vector.shape_cast %54 : vector<16x16x32xf32> to vector<256x32xf32>
    %c0_47 = arith.constant 0 : index
    %c1_48 = arith.constant 1 : index
    %c0_49 = arith.constant 0 : index
    %c0_50 = arith.constant 0 : index
    %56 = vector.load %arg4[%c0_47, %c1_48, %c0_49, %c0_50] : memref<2x2x32x128xf32, #tpu.memory_space<vmem>>, vector<1x1x32x128xf32>
    %57 = vector.shape_cast %56 : vector<1x1x32x128xf32> to vector<32x128xf32>
    %cst_51 = arith.constant dense<0.000000e+00> : vector<256x128xf32>
    %58 = tpu.matmul %55, %57, %cst_51 {dimension_numbers = #tpu.dot_dimension_numbers<[1], [0], [0], [1], [0, 0, 1, 1], [], []>} : vector<256x32xf32>, vector<32x128xf32>, vector<256x128xf32> -> vector<256x128xf32>
    %59 = vector.broadcast %2 : vector<1x128xf32> to vector<256x128xf32>
    %60 = arith.addf %58, %59 : vector<256x128xf32>
    %61 = vector.shape_cast %60 : vector<256x128xf32> to vector<16x16x128xf32>
    %c0_52 = arith.constant 0 : index
    %c0_53 = arith.constant 0 : index
    %c1_54 = arith.constant 1 : index
    %c0_55 = arith.constant 0 : index
    %c0_56 = arith.constant 0 : index
    %c0_57 = arith.constant 0 : index
    %62 = vector.load %arg6[%c0_52, %c0_53, %c1_54, %c0_55, %c0_56, %c0_57] : memref<1x2x2x16x16x128xf32, #tpu.memory_space<vmem>>, vector<1x1x1x16x16x128xf32>
    %63 = vector.shape_cast %62 : vector<1x1x1x16x16x128xf32> to vector<16x16x128xf32>
    %64 = vector.shape_cast %61 : vector<16x16x128xf32> to vector<1x1x1x16x16x128xf32>
    tpu.vector_store %arg6[%c0_52, %c0_53, %c1_54, %c0_55, %c0_56, %c0_57], %64 {strides = array<i32>} : memref<1x2x2x16x16x128xf32, #tpu.memory_space<vmem>>, vector<1x1x1x16x16x128xf32>,
    %c1_i32_58 = arith.constant 1 : i32
    %65 = arith.addi %1, %c1_i32_58 : i32
    %c0_i32_59 = arith.constant 0 : i32
    %66 = arith.addi %65, %c0_i32_59 : i32
    %c0_60 = arith.constant 0 : index
    %67 = arith.index_cast %66 : i32 to index
    %c0_61 = arith.constant 0 : index
    %c0_62 = arith.constant 0 : index
    %68 = vector.load %arg3[%c0_60, %67, %c0_61, %c0_62] : memref<1x18x18x8xf32, #tpu.memory_space<vmem>>, vector<1x16x16x8xf32>
    %69 = vector.shape_cast %68 : vector<1x16x16x8xf32> to vector<16x16x8xf32>
    %c1_i32_63 = arith.constant 1 : i32
    %70 = arith.addi %1, %c1_i32_63 : i32
    %c0_i32_64 = arith.constant 0 : i32
    %71 = arith.addi %70, %c0_i32_64 : i32
    %c0_65 = arith.constant 0 : index
    %72 = arith.index_cast %71 : i32 to index
    %c1_66 = arith.constant 1 : index
    %c0_67 = arith.constant 0 : index
    %73 = vector.load %arg3[%c0_65, %72, %c1_66, %c0_67] : memref<1x18x18x8xf32, #tpu.memory_space<vmem>>, vector<1x16x16x8xf32>
    %74 = vector.shape_cast %73 : vector<1x16x16x8xf32> to vector<16x16x8xf32>
    %c1_i32_68 = arith.constant 1 : i32
    %75 = arith.addi %1, %c1_i32_68 : i32
    %c1_i32_69 = arith.constant 1 : i32
    %76 = arith.addi %75, %c1_i32_69 : i32
    %c0_70 = arith.constant 0 : index
    %77 = arith.index_cast %76 : i32 to index
    %c0_71 = arith.constant 0 : index
    %c0_72 = arith.constant 0 : index
    %78 = vector.load %arg3[%c0_70, %77, %c0_71, %c0_72] : memref<1x18x18x8xf32, #tpu.memory_space<vmem>>, vector<1x16x16x8xf32>
    %79 = vector.shape_cast %78 : vector<1x16x16x8xf32> to vector<16x16x8xf32>
    %c1_i32_73 = arith.constant 1 : i32
    %80 = arith.addi %1, %c1_i32_73 : i32
    %c1_i32_74 = arith.constant 1 : i32
    %81 = arith.addi %80, %c1_i32_74 : i32
    %c0_75 = arith.constant 0 : index
    %82 = arith.index_cast %81 : i32 to index
    %c1_76 = arith.constant 1 : index
    %c0_77 = arith.constant 0 : index
    %83 = vector.load %arg3[%c0_75, %82, %c1_76, %c0_77] : memref<1x18x18x8xf32, #tpu.memory_space<vmem>>, vector<1x16x16x8xf32>
    %84 = vector.shape_cast %83 : vector<1x16x16x8xf32> to vector<16x16x8xf32>
    %85 = tpu.concatenate %69, %74, %79, %84 in 2 : vector<16x16x8xf32>, vector<16x16x8xf32>, vector<16x16x8xf32>, vector<16x16x8xf32> -> vector<16x16x32xf32>
    %86 = vector.shape_cast %85 : vector<16x16x32xf32> to vector<256x32xf32>
    %c1_78 = arith.constant 1 : index
    %c0_79 = arith.constant 0 : index
    %c0_80 = arith.constant 0 : index
    %c0_81 = arith.constant 0 : index
    %87 = vector.load %arg4[%c1_78, %c0_79, %c0_80, %c0_81] : memref<2x2x32x128xf32, #tpu.memory_space<vmem>>, vector<1x1x32x128xf32>
    %88 = vector.shape_cast %87 : vector<1x1x32x128xf32> to vector<32x128xf32>
    %cst_82 = arith.constant dense<0.000000e+00> : vector<256x128xf32>
    %89 = tpu.matmul %86, %88, %cst_82 {dimension_numbers = #tpu.dot_dimension_numbers<[1], [0], [0], [1], [0, 0, 1, 1], [], []>} : vector<256x32xf32>, vector<32x128xf32>, vector<256x128xf32> -> vector<256x128xf32>
    %90 = vector.broadcast %2 : vector<1x128xf32> to vector<256x128xf32>
    %91 = arith.addf %89, %90 : vector<256x128xf32>
    %92 = vector.shape_cast %91 : vector<256x128xf32> to vector<16x16x128xf32>
    %c0_83 = arith.constant 0 : index
    %c1_84 = arith.constant 1 : index
    %c0_85 = arith.constant 0 : index
    %c0_86 = arith.constant 0 : index
    %c0_87 = arith.constant 0 : index
    %c0_88 = arith.constant 0 : index
    %93 = vector.load %arg6[%c0_83, %c1_84, %c0_85, %c0_86, %c0_87, %c0_88] : memref<1x2x2x16x16x128xf32, #tpu.memory_space<vmem>>, vector<1x1x1x16x16x128xf32>
    %94 = vector.shape_cast %93 : vector<1x1x1x16x16x128xf32> to vector<16x16x128xf32>
    %95 = vector.shape_cast %92 : vector<16x16x128xf32> to vector<1x1x1x16x16x128xf32>
    tpu.vector_store %arg6[%c0_83, %c1_84, %c0_85, %c0_86, %c0_87, %c0_88], %95 {strides = array<i32>} : memref<1x2x2x16x16x128xf32, #tpu.memory_space<vmem>>, vector<1x1x1x16x16x128xf32>,
    %c1_i32_89 = arith.constant 1 : i32
    %96 = arith.addi %1, %c1_i32_89 : i32
    %c0_i32_90 = arith.constant 0 : i32
    %97 = arith.addi %96, %c0_i32_90 : i32
    %c0_91 = arith.constant 0 : index
    %98 = arith.index_cast %97 : i32 to index
    %c1_92 = arith.constant 1 : index
    %c0_93 = arith.constant 0 : index
    %99 = vector.load %arg3[%c0_91, %98, %c1_92, %c0_93] : memref<1x18x18x8xf32, #tpu.memory_space<vmem>>, vector<1x16x16x8xf32>
    %100 = vector.shape_cast %99 : vector<1x16x16x8xf32> to vector<16x16x8xf32>
    %c1_i32_94 = arith.constant 1 : i32
    %101 = arith.addi %1, %c1_i32_94 : i32
    %c0_i32_95 = arith.constant 0 : i32
    %102 = arith.addi %101, %c0_i32_95 : i32
    %c0_96 = arith.constant 0 : index
    %103 = arith.index_cast %102 : i32 to index
    %c2_97 = arith.constant 2 : index
    %c0_98 = arith.constant 0 : index
    %104 = vector.load %arg3[%c0_96, %103, %c2_97, %c0_98] : memref<1x18x18x8xf32, #tpu.memory_space<vmem>>, vector<1x16x16x8xf32>
    %105 = vector.shape_cast %104 : vector<1x16x16x8xf32> to vector<16x16x8xf32>
    %c1_i32_99 = arith.constant 1 : i32
    %106 = arith.addi %1, %c1_i32_99 : i32
    %c1_i32_100 = arith.constant 1 : i32
    %107 = arith.addi %106, %c1_i32_100 : i32
    %c0_101 = arith.constant 0 : index
    %108 = arith.index_cast %107 : i32 to index
    %c1_102 = arith.constant 1 : index
    %c0_103 = arith.constant 0 : index
    %109 = vector.load %arg3[%c0_101, %108, %c1_102, %c0_103] : memref<1x18x18x8xf32, #tpu.memory_space<vmem>>, vector<1x16x16x8xf32>
    %110 = vector.shape_cast %109 : vector<1x16x16x8xf32> to vector<16x16x8xf32>
    %c1_i32_104 = arith.constant 1 : i32
    %111 = arith.addi %1, %c1_i32_104 : i32
    %c1_i32_105 = arith.constant 1 : i32
    %112 = arith.addi %111, %c1_i32_105 : i32
    %c0_106 = arith.constant 0 : index
    %113 = arith.index_cast %112 : i32 to index
    %c2_107 = arith.constant 2 : index
    %c0_108 = arith.constant 0 : index
    %114 = vector.load %arg3[%c0_106, %113, %c2_107, %c0_108] : memref<1x18x18x8xf32, #tpu.memory_space<vmem>>, vector<1x16x16x8xf32>
    %115 = vector.shape_cast %114 : vector<1x16x16x8xf32> to vector<16x16x8xf32>
    %116 = tpu.concatenate %100, %105, %110, %115 in 2 : vector<16x16x8xf32>, vector<16x16x8xf32>, vector<16x16x8xf32>, vector<16x16x8xf32> -> vector<16x16x32xf32>
    %117 = vector.shape_cast %116 : vector<16x16x32xf32> to vector<256x32xf32>
    %c1_109 = arith.constant 1 : index
    %c1_110 = arith.constant 1 : index
    %c0_111 = arith.constant 0 : index
    %c0_112 = arith.constant 0 : index
    %118 = vector.load %arg4[%c1_109, %c1_110, %c0_111, %c0_112] : memref<2x2x32x128xf32, #tpu.memory_space<vmem>>, vector<1x1x32x128xf32>
    %119 = vector.shape_cast %118 : vector<1x1x32x128xf32> to vector<32x128xf32>
    %cst_113 = arith.constant dense<0.000000e+00> : vector<256x128xf32>
    %120 = tpu.matmul %117, %119, %cst_113 {dimension_numbers = #tpu.dot_dimension_numbers<[1], [0], [0], [1], [0, 0, 1, 1], [], []>} : vector<256x32xf32>, vector<32x128xf32>, vector<256x128xf32> -> vector<256x128xf32>
    %121 = vector.broadcast %2 : vector<1x128xf32> to vector<256x128xf32>
    %122 = arith.addf %120, %121 : vector<256x128xf32>
    %123 = vector.shape_cast %122 : vector<256x128xf32> to vector<16x16x128xf32>
    %c0_114 = arith.constant 0 : index
    %c1_115 = arith.constant 1 : index
    %c1_116 = arith.constant 1 : index
    %c0_117 = arith.constant 0 : index
    %c0_118 = arith.constant 0 : index
    %c0_119 = arith.constant 0 : index
    %124 = vector.load %arg6[%c0_114, %c1_115, %c1_116, %c0_117, %c0_118, %c0_119] : memref<1x2x2x16x16x128xf32, #tpu.memory_space<vmem>>, vector<1x1x1x16x16x128xf32>
    %125 = vector.shape_cast %124 : vector<1x1x1x16x16x128xf32> to vector<16x16x128xf32>
    %126 = vector.shape_cast %123 : vector<16x16x128xf32> to vector<1x1x1x16x16x128xf32>
    tpu.vector_store %arg6[%c0_114, %c1_115, %c1_116, %c0_117, %c0_118, %c0_119], %126 {strides = array<i32>} : memref<1x2x2x16x16x128xf32, #tpu.memory_space<vmem>>, vector<1x1x1x16x16x128xf32>,
    return
  }
  func.func @transform_0(%arg0: i32, %arg1: i32, %arg2: i32) -> (i32, i32, i32, i32) {
    %c0_i32 = arith.constant 0 : i32
    %c0_i32_0 = arith.constant 0 : i32
    %c0_i32_1 = arith.constant 0 : i32
    %c0_i32_2 = arith.constant 0 : i32
    return %arg0, %c0_i32, %c0_i32_0, %c0_i32_1 : i32, i32, i32, i32
  }
  func.func @transform_1(%arg0: i32, %arg1: i32, %arg2: i32) -> (i32, i32, i32, i32) {
    %c0_i32 = arith.constant 0 : i32
    %c0_i32_0 = arith.constant 0 : i32
    %c0_i32_1 = arith.constant 0 : i32
    %c0_i32_2 = arith.constant 0 : i32
    return %c0_i32, %c0_i32_0, %c0_i32_1, %arg2 : i32, i32, i32, i32
  }
  func.func @transform_2(%arg0: i32, %arg1: i32, %arg2: i32) -> (i32, i32) {
    %c0_i32 = arith.constant 0 : i32
    %c0_i32_0 = arith.constant 0 : i32
    return %c0_i32, %arg2 : i32, i32
  }
  func.func @transform_3(%arg0: i32, %arg1: i32, %arg2: i32) -> (i32, i32, i32, i32, i32, i32) {
    %c0_i32 = arith.constant 0 : i32
    %c0_i32_0 = arith.constant 0 : i32
    %c0_i32_1 = arith.constant 0 : i32
    %c0_i32_2 = arith.constant 0 : i32
    return %arg0, %c0_i32, %c0_i32_0, %arg1, %c0_i32_1, %arg2 : i32, i32, i32, i32, i32, i32
  }
}

</mosaic_0001>

<bundles_post_ra>
// kernel: fused_upsample_pallas.1
= control target key start
LH: loop header
LB: loop body
LE: loop exit
PB: predicated region body
PF: predicated region fallthrough
CT: control target
= control target key end

     0   :  { %s5376_s12 = smov 0   ;;  %s5378_s13 = smov 0   ;;  %s8093_s0 = inlined_call_operand.vmem [shape: f32[2,18,18,8], index: 0, kind: input, shape index: {}]   ;;  %s8094_s1 = inlined_call_operand.vmem [shape: f32[2,2,32,128], index: 1, kind: input, shape index: {}]   ;;  %s8095_s2 = inlined_call_operand.vmem [shape: f32[1,128], index: 2, kind: input, shape index: {}]   ;;  %s8096_s3 = inlined_call_operand.vmem [shape: f32[2,2,2,16,16,128], index: 3, kind: output, shape index: {}]  }
   0x1   :  { %s5380_s14 = smov 0  }
   0x2 LB: > { %s32_s15 = sadd.s32 1, %s5347_s13  ;;  %p4271_p0 = scmp.ge.s32.totalorder %s5351_s14, 1  ;;  %s5351_s14 = sphi %s5380_s14, %s13_s14   ;;  %s5347_s13 = sphi %s5378_s13, %s8435_s13   ;;  %s5343_s12 = sphi %s5376_s12, %s8434_s12  }
   0x3   : > { %p34_p1 = scmp.ge.s32.totalorder %s32_s15, 2  ;;  %p177_p2 = scmp.lt.s32.totalorder %s5351_s14, 3 }
   0x5   : > { %s8437_s15 = smov (%p34_p1, %s32_s15), 0  ;;  %p178_p3 = pnand %p4271_p0, %p177_p2 }
   0x7   : > { %181 = sbr.rel (%p178_p3) target bundleno = 1118 (0x45e), region = 32 }
   0xe   : > { %p216_p4 = scmp.lt.s32.totalorder %s5343_s12, 1  ;;  %s5353_s20 = smov 8   ;;  %v860_v56 = vld [vmem:[%s8094_s1] sm:$0xff]  ;;  %v861_v57 = vld [vmem:[%s8094_s1 + $0x8] sm:$0xff]  ;;  %v862_v61 = vld [vmem:[%s8094_s1 + $0x10] sm:$0xff]  ;;  %vm761_vm0 = vcmask 64512  }
   0xf   : > { %s5354_s21 = smov 16   ;;  %v5267_v58 = vpack.c.bf16 %v861_v57, %v860_v56  ;;  %v863_v62 = vld [vmem:[%s8094_s1 + $0x18] sm:$0xff]  ;;  %s5355_s30 = smov 24   ;;  %vm794_vm1 = vcmask 130048   ;;  %vm827_vm2 = vcmask 195584   ;;  %vm870_vm3 = vcmask 261120  }
  0x10   : > { %s8439_s12 = smov (!%p216_p4, %s5343_s12), 1  ;;  %v5271_v63 = vpack.c.bf16 %v863_v62, %v862_v61 }
  0x11   : > { %s5299_s16 = smul.u32 432, %s8439_s12  ;;  %5268 = vmatprep.subr.bf16.mxu0 %v5267_v58  ;;  %s4898_s9 = sshll.u32 %s8439_s12, 10 }
  0x12   : > { %5270 = vmatpush3.bf16.msra.mxu0 %v5267_v58  ;;  %s6857_s17 = scalar_lea.vmem %s8096_s3, %s4898_s9 }
  0x13   : > { %s5400_s19 = scalar_lea.vmem %s8093_s0, %s5299_s16  ;;  %5272 = vmatprep.subr.bf16.mxu0 %v5271_v63 }
  0x14   : > { %v5403_v0 = vld [vmem:[%s5400_s19 + $0x19] sm:$0xff]  ;;  %v278_v1 = vld [vmem:[%s5400_s19 + $0x1] sm:$0xff]  ;;  %v279_v3 = vld [vmem:[%s5400_s19 + $0x9] sm:$0xff] }
  0x15   : > { %413 = vrot.lane.b32.xlu1 %v5403_v0, %s5353_s20  ;;  %409 = vrot.lane.b32.xlu0 %v278_v1, %s5353_s20  ;;  %v5410_v2 = vld [vmem:[%s5400_s19 + $0x21] sm:$0xff]  ;;  %v5417_v4 = vld [vmem:[%s5400_s19 + $0x39] sm:$0xff] }
  0x16   : > { %v5420_v5 = vld [vmem:[%s5400_s19 + $0x31] sm:$0xff]  ;;  %v5430_v7 = vld [vmem:[%s5400_s19 + $0x49] sm:$0xff]  ;;  %v5440_v9 = vld [vmem:[%s5400_s19 + $0x61] sm:$0xff]  ;;  %5274 = vmatpush3.bf16.msra.mxu0 %v5271_v63 }
  0x17   : > { %v5427_v6 = vld [vmem:[%s5400_s19 + $0x51] sm:$0xff]  ;;  %v5437_v8 = vld [vmem:[%s5400_s19 + $0x69] sm:$0xff]  ;;  %v5447_v10 = vld [vmem:[%s5400_s19 + $0x81] sm:$0xff] }
  0x18   : > { %8168 = vst [vmem:[#allocation2_spill] sm:$0xff] %v5447_v10  ;;  %v5450_v11 = vld [vmem:[%s5400_s19 + $0x79] sm:$0xff]  ;;  %v5460_v13 = vld [vmem:[%s5400_s19 + $0x91] sm:$0xff]  ;;  %v5470_v15 = vld [vmem:[%s5400_s19 + $0xa9] sm:$0xff] }
  0x19   : > { %415 = vrot.lane.b32.xlu1 %v5410_v2, %s5353_s20  ;;  %411 = vrot.lane.b32.xlu0 %v279_v3, %s5353_s20  ;;  %8169 = vst [vmem:[#allocation3_spill] sm:$0xff] %v5450_v11  ;;  %v5457_v12 = vld [vmem:[%s5400_s19 + $0x99] sm:$0xff]  ;;  %8171 = vst [vmem:[#allocation5_spill] sm:$0xff] %v5460_v13  ;;  %v5467_v14 = vld [vmem:[%s5400_s19 + $0xb1] sm:$0xff] }
  0x1a   : > { %8170 = vst [vmem:[#allocation4_spill] sm:$0xff] %v5457_v12  ;;  %8172 = vst [vmem:[#allocation6_spill] sm:$0xff] %v5467_v14  ;;  %v5477_v16 = vld [vmem:[%s5400_s19 + $0xc9] sm:$0xff]  ;;  %v5480_v17 = vld [vmem:[%s5400_s19 + $0xc1] sm:$0xff] }
  0x1b   : > { %8173 = vst [vmem:[#allocation7_spill] sm:$0xff] %v5470_v15  ;;  %8174 = vst [vmem:[#allocation8_spill] sm:$0xff] %v5477_v16  ;;  %v5487_v18 = vld [vmem:[%s5400_s19 + $0xe1] sm:$0xff]  ;;  %v5490_v19 = vld [vmem:[%s5400_s19 + $0xd9] sm:$0xff] }
  0x1c   : > { %8175 = vst [vmem:[#allocation9_spill] sm:$0xff] %v5480_v17  ;;  %8176 = vst [vmem:[#allocation10_spill] sm:$0xff] %v5487_v18  ;;  %v5497_v20 = vld [vmem:[%s5400_s19 + $0xf9] sm:$0xff]  ;;  %v5500_v21 = vld [vmem:[%s5400_s19 + $0xf1] sm:$0xff] }
  0x1d   : > { %419 = vrot.lane.b32.xlu1 %v5417_v4, %s5353_s20  ;;  %417 = vrot.lane.b32.xlu0 %v5420_v5, %s5353_s20  ;;  %8177 = vst [vmem:[#allocation11_spill] sm:$0xff] %v5490_v19  ;;  %8178 = vst [vmem:[#allocation12_spill] sm:$0xff] %v5497_v20  ;;  %v5507_v22 = vld [vmem:[%s5400_s19 + $0x111] sm:$0xff]  ;;  %v5510_v23 = vld [vmem:[%s5400_s19 + $0x109] sm:$0xff] }
  0x1e   : > { %8179 = vst [vmem:[#allocation13_spill] sm:$0xff] %v5500_v21  ;;  %8180 = vst [vmem:[#allocation14_spill] sm:$0xff] %v5507_v22  ;;  %v5517_v24 = vld [vmem:[%s5400_s19 + $0x129] sm:$0xff]  ;;  %v5520_v25 = vld [vmem:[%s5400_s19 + $0x121] sm:$0xff] }
  0x1f   : > { %8181 = vst [vmem:[#allocation15_spill] sm:$0xff] %v5510_v23  ;;  %v5527_v26 = vld [vmem:[%s5400_s19 + $0x141] sm:$0xff]  ;;  %v5530_v27 = vld [vmem:[%s5400_s19 + $0x139] sm:$0xff]  ;;  %v5540_v29 = vld [vmem:[%s5400_s19 + $0x151] sm:$0xff] }
  0x20   : > { %v5537_v28 = vld [vmem:[%s5400_s19 + $0x159] sm:$0xff]  ;;  %v5547_v30 = vld [vmem:[%s5400_s19 + $0x171] sm:$0xff]  ;;  %v5550_v31 = vld [vmem:[%s5400_s19 + $0x169] sm:$0xff] }
  0x21   : > { %423 = vrot.lane.b32.xlu1 %v5427_v6, %s5353_s20  ;;  %421 = vrot.lane.b32.xlu0 %v5430_v7, %s5353_s20  ;;  %v5557_v32 = vld [vmem:[%s5400_s19 + $0x20] sm:$0xff]  ;;  %v5560_v33 = vld [vmem:[%s5400_s19 + $0x18] sm:$0xff] }
  0x22   : > { %v5567_v34 = vld [vmem:[%s5400_s19 + $0x38] sm:$0xff]  ;;  %v5570_v35 = vld [vmem:[%s5400_s19 + $0x30] sm:$0xff]  ;;  %v5580_v37 = vld [vmem:[%s5400_s19 + $0x48] sm:$0xff] }
  0x23   : > { %v5577_v36 = vld [vmem:[%s5400_s19 + $0x50] sm:$0xff]  ;;  %v5587_v38 = vld [vmem:[%s5400_s19 + $0x68] sm:$0xff]  ;;  %v5590_v39 = vld [vmem:[%s5400_s19 + $0x60] sm:$0xff] }
  0x24   : > { %v5597_v40 = vld [vmem:[%s5400_s19 + $0x80] sm:$0xff]  ;;  %v5600_v41 = vld [vmem:[%s5400_s19 + $0x78] sm:$0xff]  ;;  %v5610_v43 = vld [vmem:[%s5400_s19 + $0x90] sm:$0xff] }
  0x25   : > { %427 = vrot.lane.b32.xlu1 %v5437_v8, %s5353_s20  ;;  %425 = vrot.lane.b32.xlu0 %v5440_v9, %s5353_s20  ;;  %v5607_v42 = vld [vmem:[%s5400_s19 + $0x98] sm:$0xff]  ;;  %v5617_v44 = vld [vmem:[%s5400_s19 + $0xb0] sm:$0xff] }
  0x26   : > { %v5620_v45 = vld [vmem:[%s5400_s19 + $0xa8] sm:$0xff]  ;;  %v5630_v47 = vld [vmem:[%s5400_s19 + $0xc0] sm:$0xff]  ;;  %v5640_v49 = vld [vmem:[%s5400_s19 + $0xd8] sm:$0xff] }
  0x27   : > { %v5627_v46 = vld [vmem:[%s5400_s19 + $0xc8] sm:$0xff]  ;;  %8183 = vst [vmem:[#allocation17_spill] sm:$0xff] %v5630_v47  ;;  %v5637_v48 = vld [vmem:[%s5400_s19 + $0xe0] sm:$0xff]  ;;  %8185 = vst [vmem:[#allocation19_spill] sm:$0xff] %v5640_v49 }
  0x28   : > { %8182 = vst [vmem:[#allocation16_spill] sm:$0xff] %v5627_v46  ;;  %8184 = vst [vmem:[#allocation18_spill] sm:$0xff] %v5637_v48  ;;  %v5647_v50 = vld [vmem:[%s5400_s19 + $0xf8] sm:$0xff]  ;;  %v5650_v51 = vld [vmem:[%s5400_s19 + $0xf0] sm:$0xff] }
  0x29   : > { %431 = vrot.lane.b32.xlu1 %v5447_v10, %s5353_s20  ;;  %429 = vrot.lane.b32.xlu0 %v5450_v11, %s5353_s20  ;;  %8186 = vst [vmem:[#allocation20_spill] sm:$0xff] %v5647_v50  ;;  %8187 = vst [vmem:[#allocation21_spill] sm:$0xff] %v5650_v51  ;;  %v5657_v52 = vld [vmem:[%s5400_s19 + $0x110] sm:$0xff]  ;;  %v5660_v53 = vld [vmem:[%s5400_s19 + $0x108] sm:$0xff] }
  0x2a   : > { %8188 = vst [vmem:[#allocation22_spill] sm:$0xff] %v5657_v52  ;;  %8189 = vst [vmem:[#allocation23_spill] sm:$0xff] %v5660_v53  ;;  %v5667_v54 = vld [vmem:[%s5400_s19 + $0x128] sm:$0xff]  ;;  %v5670_v55 = vld [vmem:[%s5400_s19 + $0x120] sm:$0xff] }
  0x2b   : > { %8190 = vst [vmem:[#allocation24_spill] sm:$0xff] %v5667_v54  ;;  %8191 = vst [vmem:[#allocation25_spill] sm:$0xff] %v5670_v55  ;;  %v5683_v59 = vld [vmem:[%s5400_s19 + $0x140] sm:$0xff]  ;;  %v5686_v60 = vld [vmem:[%s5400_s19 + $0x138] sm:$0xff] }
  0x2c   : > { %8192 = vst [vmem:[#allocation26_spill] sm:$0xff] %v5683_v59  ;;  %8193 = vst [vmem:[#allocation27_spill] sm:$0xff] %v5686_v60  ;;  %v5699_v1 = vld [vmem:[%s5400_s19 + $0x158] sm:$0xff]  ;;  %v5702_v3 = vld [vmem:[%s5400_s19 + $0x150] sm:$0xff] }
  0x2d   : > { %435 = vrot.lane.b32.xlu1 %v5457_v12, %s5353_s20  ;;  %433 = vrot.lane.b32.xlu0 %v5460_v13, %s5353_s20  ;;  %8194 = vst [vmem:[#allocation28_spill] sm:$0xff] %v5699_v1  ;;  %8195 = vst [vmem:[#allocation29_spill] sm:$0xff] %v5702_v3  ;;  %v5713_v58 = vld [vmem:[%s5400_s19 + $0x170] sm:$0xff]  ;;  %v5716_v61 = vld [vmem:[%s5400_s19 + $0x168] sm:$0xff] }
  0x2e   : > { %8196 = vst [vmem:[#allocation30_spill] sm:$0xff] %v5713_v58  ;;  %8197 = vst [vmem:[#allocation31_spill] sm:$0xff] %v5716_v61  ;;  %v4306_v63 = vld [vmem:[%s5400_s19 + $0x188] sm:$0xff] }
  0x31   : > { %439 = vrot.lane.b32.xlu1 %v5467_v14, %s5353_s20  ;;  %437 = vrot.lane.b32.xlu0 %v5470_v15, %s5353_s20 }
  0x35   : > { %443 = vrot.lane.b32.xlu1 %v5477_v16, %s5353_s20  ;;  %441 = vrot.lane.b32.xlu0 %v5480_v17, %s5353_s20 }
  0x39   : > { %447 = vrot.lane.b32.xlu1 %v5487_v18, %s5353_s20  ;;  %445 = vrot.lane.b32.xlu0 %v5490_v19, %s5353_s20 }
  0x3d   : > { %451 = vrot.lane.b32.xlu1 %v5497_v20, %s5353_s20  ;;  %449 = vrot.lane.b32.xlu0 %v5500_v21, %s5353_s20 }
  0x41   : > { %455 = vrot.lane.b32.xlu1 %v5507_v22, %s5353_s20  ;;  %453 = vrot.lane.b32.xlu0 %v5510_v23, %s5353_s20 }
  0x45   : > { %459 = vrot.lane.b32.xlu1 %v5517_v24, %s5353_s20  ;;  %457 = vrot.lane.b32.xlu0 %v5520_v25, %s5353_s20 }
  0x49   : > { %463 = vrot.lane.b32.xlu1 %v5527_v26, %s5353_s20  ;;  %461 = vrot.lane.b32.xlu0 %v5530_v27, %s5353_s20 }
  0x4d   : > { %467 = vrot.lane.b32.xlu1 %v5537_v28, %s5353_s20  ;;  %465 = vrot.lane.b32.xlu0 %v5540_v29, %s5353_s20 }
  0x51   : > { %471 = vrot.lane.b32.xlu1 %v5547_v30, %s5353_s20  ;;  %469 = vrot.lane.b32.xlu0 %v5550_v31, %s5353_s20 }
  0x55   : > { %539 = vrot.lane.b32.xlu1 %v5557_v32, %s5354_s21  ;;  %537 = vrot.lane.b32.xlu0 %v5560_v33, %s5354_s21 }
  0x59   : > { %543 = vrot.lane.b32.xlu1 %v5567_v34, %s5354_s21  ;;  %541 = vrot.lane.b32.xlu0 %v5570_v35, %s5354_s21 }
  0x5d   : > { %547 = vrot.lane.b32.xlu1 %v5577_v36, %s5354_s21  ;;  %545 = vrot.lane.b32.xlu0 %v5580_v37, %s5354_s21 }
  0x61   : > { %551 = vrot.lane.b32.xlu1 %v5587_v38, %s5354_s21  ;;  %549 = vrot.lane.b32.xlu0 %v5590_v39, %s5354_s21 }
  0x65   : > { %555 = vrot.lane.b32.xlu1 %v5597_v40, %s5354_s21  ;;  %553 = vrot.lane.b32.xlu0 %v5600_v41, %s5354_s21 }
  0x69   : > { %559 = vrot.lane.b32.xlu1 %v5607_v42, %s5354_s21  ;;  %557 = vrot.lane.b32.xlu0 %v5610_v43, %s5354_s21 }
  0x6d   : > { %563 = vrot.lane.b32.xlu1 %v5617_v44, %s5354_s21  ;;  %561 = vrot.lane.b32.xlu0 %v5620_v45, %s5354_s21 }
  0x71   : > { %567 = vrot.lane.b32.xlu1 %v5627_v46, %s5354_s21  ;;  %565 = vrot.lane.b32.xlu0 %v5630_v47, %s5354_s21 }
  0x75   : > { %571 = vrot.lane.b32.xlu1 %v5637_v48, %s5354_s21  ;;  %569 = vrot.lane.b32.xlu0 %v5640_v49, %s5354_s21 }
  0x79   : > { %575 = vrot.lane.b32.xlu1 %v5647_v50, %s5354_s21  ;;  %573 = vrot.lane.b32.xlu0 %v5650_v51, %s5354_s21 }
  0x7d   : > { %579 = vrot.lane.b32.xlu1 %v5657_v52, %s5354_s21  ;;  %577 = vrot.lane.b32.xlu0 %v5660_v53, %s5354_s21 }
  0x81   : > { %583 = vrot.lane.b32.xlu1 %v5667_v54, %s5354_s21  ;;  %581 = vrot.lane.b32.xlu0 %v5670_v55, %s5354_s21 }
  0x85   : > { %587 = vrot.lane.b32.xlu1 %v5683_v59, %s5354_s21  ;;  %585 = vrot.lane.b32.xlu0 %v5686_v60, %s5354_s21  ;;  %v4305_v59 = vld [vmem:[%s5400_s19 + $0x180] sm:$0xff] }
  0x87   : > { %v5704_v56 = vpop.permute.xlu1 %413  ;;  %v5706_v57 = vpop.permute.xlu0 %409 }
  0x89   : > { %591 = vrot.lane.b32.xlu1 %v5699_v1, %s5354_s21  ;;  %589 = vrot.lane.b32.xlu0 %v5702_v3, %s5354_s21 }
  0x8b   : > { %v5718_v62 = vpop.permute.xlu1 %415  ;;  %v5720_v60 = vpop.permute.xlu0 %411 }
  0x8d   : > { %595 = vrot.lane.b32.xlu1 %v5713_v58, %s5354_s21  ;;  %593 = vrot.lane.b32.xlu0 %v5716_v61, %s5354_s21 }
  0x8f   : > { %v5728_v1 = vpop.permute.xlu1 %419  ;;  %v5730_v55 = vpop.permute.xlu0 %417 }
  0x91   : > { %599 = vrot.lane.b32.xlu1 %v4306_v63, %s5354_s21  ;;  %597 = vrot.lane.b32.xlu0 %v4305_v59, %s5354_s21 }
  0x93   : > { %v5734_v3 = vpop.permute.xlu1 %423  ;;  %v5736_v54 = vpop.permute.xlu0 %421 }
  0x95   : > { %667 = vrot.lane.b32.xlu1 %v5410_v2, %s5355_s30  ;;  %665 = vrot.lane.b32.xlu0 %v5403_v0, %s5355_s30 }
  0x97   : > { %v5742_v61 = vpop.permute.xlu1 %427  ;;  %v5744_v58 = vpop.permute.xlu0 %425 }
  0x99   : > { %671 = vrot.lane.b32.xlu1 %v5417_v4, %s5355_s30  ;;  %669 = vrot.lane.b32.xlu0 %v5420_v5, %s5355_s30 }
  0x9b   : > { %v5750_v59 = vpop.permute.xlu1 %431  ;;  %v5752_v63 = vpop.permute.xlu0 %429 }
  0x9d   : > { %675 = vrot.lane.b32.xlu1 %v5427_v6, %s5355_s30  ;;  %673 = vrot.lane.b32.xlu0 %v5430_v7, %s5355_s30 }
  0x9f   : > { %v5758_v53 = vpop.permute.xlu1 %435  ;;  %v5760_v52 = vpop.permute.xlu0 %433 }
  0xa1   : > { %679 = vrot.lane.b32.xlu1 %v5437_v8, %s5355_s30  ;;  %677 = vrot.lane.b32.xlu0 %v5440_v9, %s5355_s30 }
  0xa3   : > { %v5766_v51 = vpop.permute.xlu1 %439  ;;  %v5768_v50 = vpop.permute.xlu0 %437 }
  0xa5   : > { %683 = vrot.lane.b32.xlu1 %v5447_v10, %s5355_s30  ;;  %681 = vrot.lane.b32.xlu0 %v5450_v11, %s5355_s30 }
  0xa7   : > { %v5774_v49 = vpop.permute.xlu1 %443  ;;  %v5776_v48 = vpop.permute.xlu0 %441 }
  0xa8   : > { %8198 = vst [vmem:[#allocation32_spill] sm:$0xff] %v5774_v49  ;;  %8199 = vst [vmem:[#allocation33_spill] sm:$0xff] %v5776_v48 }
  0xa9   : > { %687 = vrot.lane.b32.xlu1 %v5457_v12, %s5355_s30  ;;  %685 = vrot.lane.b32.xlu0 %v5460_v13, %s5355_s30 }
  0xab   : > { %v5782_v47 = vpop.permute.xlu1 %447  ;;  %v5784_v46 = vpop.permute.xlu0 %445 }
  0xac   : > { %8200 = vst [vmem:[#allocation34_spill] sm:$0xff] %v5782_v47  ;;  %8201 = vst [vmem:[#allocation35_spill] sm:$0xff] %v5784_v46  ;;  %v5950_v46 = vld [vmem:[%s5400_s19 + $0x92] sm:$0xff] }
  0xad   : > { %691 = vrot.lane.b32.xlu1 %v5467_v14, %s5355_s30  ;;  %689 = vrot.lane.b32.xlu0 %v5470_v15, %s5355_s30  ;;  %8229 = vst [vmem:[#allocation63_spill] sm:$0xff] %v5950_v46 }
  0xaf   : > { %v5790_v11 = vpop.permute.xlu1 %451  ;;  %v5792_v49 = vpop.permute.xlu0 %449 }
  0xb0   : > { %8202 = vst [vmem:[#allocation36_spill] sm:$0xff] %v5790_v11  ;;  %8203 = vst [vmem:[#allocation37_spill] sm:$0xff] %v5792_v49  ;;  %v5936_v49 = vld [vmem:[%s5400_s19 + $0x7a] sm:$0xff] }
  0xb1   : > { %695 = vrot.lane.b32.xlu1 %v5477_v16, %s5355_s30  ;;  %693 = vrot.lane.b32.xlu0 %v5480_v17, %s5355_s30  ;;  %8225 = vst [vmem:[#allocation59_spill] sm:$0xff] %v5936_v49 }
  0xb3   : > { %v5798_v13 = vpop.permute.xlu1 %455  ;;  %v5800_v47 = vpop.permute.xlu0 %453 }
  0xb4   : > { %8204 = vst [vmem:[#allocation38_spill] sm:$0xff] %v5798_v13  ;;  %8205 = vst [vmem:[#allocation39_spill] sm:$0xff] %v5800_v47  ;;  %v5922_v47 = vld [vmem:[%s5400_s19 + $0x62] sm:$0xff] }
  0xb5   : > { %699 = vrot.lane.b32.xlu1 %v5487_v18, %s5355_s30  ;;  %697 = vrot.lane.b32.xlu0 %v5490_v19, %s5355_s30  ;;  %8223 = vst [vmem:[#allocation57_spill] sm:$0xff] %v5922_v47 }
  0xb7   : > { %v5806_v15 = vpop.permute.xlu1 %459  ;;  %v5808_v11 = vpop.permute.xlu0 %457 }
  0xb8   : > { %8206 = vst [vmem:[#allocation40_spill] sm:$0xff] %v5806_v15  ;;  %8207 = vst [vmem:[#allocation41_spill] sm:$0xff] %v5808_v11  ;;  %v5908_v15 = vld [vmem:[%s5400_s19 + $0x4a] sm:$0xff] }
  0xb9   : > { %703 = vrot.lane.b32.xlu1 %v5497_v20, %s5355_s30  ;;  %701 = vrot.lane.b32.xlu0 %v5500_v21, %s5355_s30  ;;  %v5891_v21 = vld [vmem:[%s5400_s19 + $0x3a] sm:$0xff]  ;;  %8221 = vst [vmem:[#allocation55_spill] sm:$0xff] %v5908_v15 }
  0xba   : > { %8218 = vst [vmem:[#allocation52_spill] sm:$0xff] %v5891_v21 }
  0xbb   : > { %v5814_v17 = vpop.permute.xlu1 %463  ;;  %v5816_v13 = vpop.permute.xlu0 %461 }
  0xbc   : > { %8208 = vst [vmem:[#allocation42_spill] sm:$0xff] %v5814_v17  ;;  %8209 = vst [vmem:[#allocation43_spill] sm:$0xff] %v5816_v13 }
  0xbd   : > { %707 = vrot.lane.b32.xlu1 %v5507_v22, %s5355_s30  ;;  %705 = vrot.lane.b32.xlu0 %v5510_v23, %s5355_s30  ;;  %v5877_v23 = vld [vmem:[%s5400_s19 + $0x22] sm:$0xff]  ;;  %v5880_v22 = vld [vmem:[%s5400_s19 + $0x1a] sm:$0xff] }
  0xbe   : > { %8216 = vst [vmem:[#allocation50_spill] sm:$0xff] %v5877_v23  ;;  %8217 = vst [vmem:[#allocation51_spill] sm:$0xff] %v5880_v22 }
  0xbf   : > { %v5822_v19 = vpop.permute.xlu1 %467  ;;  %v5824_v11 = vpop.permute.xlu0 %465 }
  0xc0   : > { %8210 = vst [vmem:[#allocation44_spill] sm:$0xff] %v5822_v19  ;;  %8211 = vst [vmem:[#allocation45_spill] sm:$0xff] %v5824_v11 }
  0xc1   : > { %711 = vrot.lane.b32.xlu1 %v5517_v24, %s5355_s30  ;;  %709 = vrot.lane.b32.xlu0 %v5520_v25, %s5355_s30 }
  0xc3   : > { %v5830_v17 = vpop.permute.xlu1 %471  ;;  %v5832_v13 = vpop.permute.xlu0 %469 }
  0xc4   : > { %8212 = vst [vmem:[#allocation46_spill] sm:$0xff] %v5830_v17  ;;  %8213 = vst [vmem:[#allocation47_spill] sm:$0xff] %v5832_v13  ;;  %v1256_v13 = vld [vmem:[%s5400_s19 + $0x2] sm:$0xff] }
  0xc5   : > { %715 = vrot.lane.b32.xlu1 %v5527_v26, %s5355_s30  ;;  %713 = vrot.lane.b32.xlu0 %v5530_v27, %s5355_s30  ;;  %v5855_v26 = vld [vmem:[%s5400_s19 + $0x189] sm:$0xff]  ;;  %v5858_v27 = vld [vmem:[%s5400_s19 + $0x181] sm:$0xff] }
  0xc6   : > { %8214 = vst [vmem:[#allocation48_spill] sm:$0xff] %v5855_v26  ;;  %8215 = vst [vmem:[#allocation49_spill] sm:$0xff] %v5858_v27 }
  0xc7   : > { %v5838_v11 = vpop.permute.xlu1 %539  ;;  %v5840_v19 = vpop.permute.xlu0 %537 }
  0xc9   : > { %719 = vrot.lane.b32.xlu1 %v5537_v28, %s5355_s30  ;;  %717 = vrot.lane.b32.xlu0 %v5540_v29, %s5355_s30 }
  0xcb   : > { %v5846_v24 = vpop.permute.xlu1 %543  ;;  %v5848_v25 = vpop.permute.xlu0 %541 }
  0xcd   : > { %723 = vrot.lane.b32.xlu1 %v5547_v30, %s5355_s30  ;;  %721 = vrot.lane.b32.xlu0 %v5550_v31, %s5355_s30  ;;  %v1257_v30 = vld [vmem:[%s5400_s19 + $0xa] sm:$0xff] }
  0xcf   : > { %v5860_v28 = vpop.permute.xlu1 %547  ;;  %v5862_v29 = vpop.permute.xlu0 %545 }
  0xd1   : > { %727 = vrot.lane.b32.xlu1 %v5855_v26, %s5355_s30  ;;  %725 = vrot.lane.b32.xlu0 %v5858_v27, %s5355_s30 }
  0xd3   : > { %v5870_v17 = vpop.permute.xlu1 %551  ;;  %v5872_v31 = vpop.permute.xlu0 %549 }
  0xd5   : > { %1386 = vrot.lane.b32.xlu1 %v1257_v30, %s5353_s20  ;;  %1384 = vrot.lane.b32.xlu0 %v1256_v13, %s5353_s20  ;;  %v5894_v30 = vld [vmem:[%s5400_s19 + $0x32] sm:$0xff] }
  0xd6   : > { %8219 = vst [vmem:[#allocation53_spill] sm:$0xff] %v5894_v30 }
  0xd7   : > { %v5882_v26 = vpop.permute.xlu1 %555  ;;  %v5884_v27 = vpop.permute.xlu0 %553 }
  0xd9   : > { %1390 = vrot.lane.b32.xlu1 %v5877_v23, %s5353_s20  ;;  %1388 = vrot.lane.b32.xlu0 %v5880_v22, %s5353_s20  ;;  %v5905_v23 = vld [vmem:[%s5400_s19 + $0x52] sm:$0xff] }
  0xda   : > { %8220 = vst [vmem:[#allocation54_spill] sm:$0xff] %v5905_v23 }
  0xdb   : > { %v5896_v13 = vpop.permute.xlu1 %559  ;;  %v5898_v20 = vpop.permute.xlu0 %557 }
  0xdd   : > { %1394 = vrot.lane.b32.xlu1 %v5891_v21, %s5353_s20  ;;  %1392 = vrot.lane.b32.xlu0 %v5894_v30, %s5353_s20  ;;  %v5919_v21 = vld [vmem:[%s5400_s19 + $0x6a] sm:$0xff] }
  0xde   : > { %8222 = vst [vmem:[#allocation56_spill] sm:$0xff] %v5919_v21 }
  0xdf   : > { %v5910_v22 = vpop.permute.xlu1 %563  ;;  %v5912_v18 = vpop.permute.xlu0 %561 }
  0xe1   : > { %1398 = vrot.lane.b32.xlu1 %v5905_v23, %s5353_s20  ;;  %1396 = vrot.lane.b32.xlu0 %v5908_v15, %s5353_s20  ;;  %v5933_v23 = vld [vmem:[%s5400_s19 + $0x82] sm:$0xff] }
  0xe2   : > { %8224 = vst [vmem:[#allocation58_spill] sm:$0xff] %v5933_v23 }
  0xe3   : > { %v5924_v30 = vpop.permute.xlu1 %567  ;;  %v5926_v16 = vpop.permute.xlu0 %565 }
  0xe5   : > { %1402 = vrot.lane.b32.xlu1 %v5919_v21, %s5353_s20  ;;  %1400 = vrot.lane.b32.xlu0 %v5922_v47, %s5353_s20  ;;  %v5947_v21 = vld [vmem:[%s5400_s19 + $0x9a] sm:$0xff] }
  0xe6   : > { %8228 = vst [vmem:[#allocation62_spill] sm:$0xff] %v5947_v21 }
  0xe7   : > { %v5938_v15 = vpop.permute.xlu1 %571  ;;  %v5940_v14 = vpop.permute.xlu0 %569 }
  0xe8   : > { %8226 = vst [vmem:[#allocation60_spill] sm:$0xff] %v5938_v15  ;;  %8227 = vst [vmem:[#allocation61_spill] sm:$0xff] %v5940_v14  ;;  %v5964_v14 = vld [vmem:[%s5400_s19 + $0xaa] sm:$0xff] }
  0xe9   : > { %1406 = vrot.lane.b32.xlu1 %v5933_v23, %s5353_s20  ;;  %1404 = vrot.lane.b32.xlu0 %v5936_v49, %s5353_s20  ;;  %v5961_v23 = vld [vmem:[%s5400_s19 + $0xb2] sm:$0xff]  ;;  %8233 = vst [vmem:[#allocation67_spill] sm:$0xff] %v5964_v14 }
  0xea   : > { %8232 = vst [vmem:[#allocation66_spill] sm:$0xff] %v5961_v23 }
  0xeb   : > { %v5952_v47 = vpop.permute.xlu1 %575  ;;  %v5954_v12 = vpop.permute.xlu0 %573 }
  0xec   : > { %8230 = vst [vmem:[#allocation64_spill] sm:$0xff] %v5952_v47  ;;  %8231 = vst [vmem:[#allocation65_spill] sm:$0xff] %v5954_v12  ;;  %v5978_v12 = vld [vmem:[%s5400_s19 + $0xc2] sm:$0xff] }
  0xed   : > { %1410 = vrot.lane.b32.xlu1 %v5947_v21, %s5353_s20  ;;  %1408 = vrot.lane.b32.xlu0 %v5950_v46, %s5353_s20  ;;  %v5975_v21 = vld [vmem:[%s5400_s19 + $0xca] sm:$0xff]  ;;  %8237 = vst [vmem:[#allocation71_spill] sm:$0xff] %v5978_v12 }
  0xee   : > { %8236 = vst [vmem:[#allocation70_spill] sm:$0xff] %v5975_v21 }
  0xef   : > { %v5966_v49 = vpop.permute.xlu1 %579  ;;  %v5968_v15 = vpop.permute.xlu0 %577 }
  0xf0   : > { %8234 = vst [vmem:[#allocation68_spill] sm:$0xff] %v5966_v49  ;;  %8235 = vst [vmem:[#allocation69_spill] sm:$0xff] %v5968_v15  ;;  %v5992_v15 = vld [vmem:[%s5400_s19 + $0xda] sm:$0xff] }
  0xf1   : > { %1414 = vrot.lane.b32.xlu1 %v5961_v23, %s5353_s20  ;;  %1412 = vrot.lane.b32.xlu0 %v5964_v14, %s5353_s20  ;;  %v5989_v23 = vld [vmem:[%s5400_s19 + $0xe2] sm:$0xff]  ;;  %8241 = vst [vmem:[#allocation75_spill] sm:$0xff] %v5992_v15 }
  0xf2   : > { %8240 = vst [vmem:[#allocation74_spill] sm:$0xff] %v5989_v23 }
  0xf3   : > { %v5980_v46 = vpop.permute.xlu1 %583  ;;  %v5982_v47 = vpop.permute.xlu0 %581 }
  0xf4   : > { %8238 = vst [vmem:[#allocation72_spill] sm:$0xff] %v5980_v46  ;;  %8239 = vst [vmem:[#allocation73_spill] sm:$0xff] %v5982_v47 }
  0xf5   : > { %1418 = vrot.lane.b32.xlu1 %v5975_v21, %s5353_s20  ;;  %1416 = vrot.lane.b32.xlu0 %v5978_v12, %s5353_s20  ;;  %v6003_v21 = vld [vmem:[%s5400_s19 + $0xfa] sm:$0xff]  ;;  %v6006_v12 = vld [vmem:[%s5400_s19 + $0xf2] sm:$0xff] }
  0xf6   : > { %8244 = vst [vmem:[#allocation78_spill] sm:$0xff] %v6003_v21  ;;  %8245 = vst [vmem:[#allocation79_spill] sm:$0xff] %v6006_v12 }
  0xf7   : > { %v5994_v14 = vpop.permute.xlu1 %587  ;;  %v5996_v49 = vpop.permute.xlu0 %585 }
  0xf8   : > { %8242 = vst [vmem:[#allocation76_spill] sm:$0xff] %v5994_v14  ;;  %8243 = vst [vmem:[#allocation77_spill] sm:$0xff] %v5996_v49  ;;  %v6020_v49 = vld [vmem:[%s5400_s19 + $0x10a] sm:$0xff] }
  0xf9   : > { %1422 = vrot.lane.b32.xlu1 %v5989_v23, %s5353_s20  ;;  %1420 = vrot.lane.b32.xlu0 %v5992_v15, %s5353_s20  ;;  %v6017_v23 = vld [vmem:[%s5400_s19 + $0x112] sm:$0xff]  ;;  %8249 = vst [vmem:[#allocation83_spill] sm:$0xff] %v6020_v49 }
  0xfa   : > { %8248 = vst [vmem:[#allocation82_spill] sm:$0xff] %v6017_v23 }
  0xfb   : > { %v6008_v47 = vpop.permute.xlu1 %591  ;;  %v6010_v46 = vpop.permute.xlu0 %589 }
  0xfc   : > { %8246 = vst [vmem:[#allocation80_spill] sm:$0xff] %v6008_v47  ;;  %8247 = vst [vmem:[#allocation81_spill] sm:$0xff] %v6010_v46  ;;  %v6034_v46 = vld [vmem:[%s5400_s19 + $0x122] sm:$0xff] }
  0xfd   : > { %1426 = vrot.lane.b32.xlu1 %v6003_v21, %s5353_s20  ;;  %1424 = vrot.lane.b32.xlu0 %v6006_v12, %s5353_s20  ;;  %v6031_v21 = vld [vmem:[%s5400_s19 + $0x12a] sm:$0xff]  ;;  %8253 = vst [vmem:[#allocation87_spill] sm:$0xff] %v6034_v46  ;;  %v246_v12 = vld [vmem:[%s5400_s19] sm:$0xff] }
  0xfe   : > { %8252 = vst [vmem:[#allocation86_spill] sm:$0xff] %v6031_v21  ;;  %v247_v47 = vld [vmem:[%s5400_s19 + $0x8] sm:$0xff] }
  0xff   : > { %v6022_v15 = vpop.permute.xlu1 %595  ;;  %v6024_v14 = vpop.permute.xlu0 %593 }
 0x100   : > { %8250 = vst [vmem:[#allocation84_spill] sm:$0xff] %v6022_v15  ;;  %8251 = vst [vmem:[#allocation85_spill] sm:$0xff] %v6024_v14  ;;  %v6051_v14 = vld [vmem:[%s5400_s19 + $0x142] sm:$0xff] }
 0x101   : > { %1430 = vrot.lane.b32.xlu1 %v6017_v23, %s5353_s20  ;;  %1428 = vrot.lane.b32.xlu0 %v6020_v49, %s5353_s20  ;;  %v762_v49 = vsel %vm761_vm0, %v246_v12, %v5706_v57  ;;  %v763_v23 = vsel %vm761_vm0, %v247_v47, %v5720_v60  ;;  %v766_v60 = vsel %vm761_vm0, %v5570_v35, %v5730_v55 }
 0x102   : > { %v769_v55 = vsel %vm761_vm0, %v5577_v36, %v5734_v3 }
 0x103   : > { %v6038_v48 = vpop.permute.xlu1 %599  ;;  %v6040_v15 = vpop.permute.xlu0 %597 }
 0x104   : > { %8254 = vst [vmem:[#allocation88_spill] sm:$0xff] %v6038_v48  ;;  %8255 = vst [vmem:[#allocation89_spill] sm:$0xff] %v6040_v15  ;;  %v6054_v48 = vld [vmem:[%s5400_s19 + $0x13a] sm:$0xff]  ;;  %v796_v15 = vsel %vm794_vm1, %v763_v23, %v5838_v11  ;;  %v764_v11 = vsel %vm761_vm0, %v5560_v33, %v5704_v56  ;;  %v6098_v56 = vld [vmem:[%s5400_s19 + $0x172] sm:$0xff] }
 0x105   : > { %1434 = vrot.lane.b32.xlu1 %v6031_v21, %s5353_s20  ;;  %1432 = vrot.lane.b32.xlu0 %v6034_v46, %s5353_s20  ;;  %v795_v21 = vsel %vm794_vm1, %v762_v49, %v5840_v19  ;;  %v765_v19 = vsel %vm761_vm0, %v5557_v32, %v5718_v62  ;;  %v797_v23 = vsel %vm794_vm1, %v764_v11, %v5848_v25  ;;  %v6101_v62 = vld [vmem:[%s5400_s19 + $0x16a] sm:$0xff] }
 0x106   : > { %v767_v49 = vsel %vm761_vm0, %v5567_v34, %v5728_v1  ;;  %v799_v25 = vsel %vm794_vm1, %v766_v60, %v5862_v29  ;;  %v802_v29 = vsel %vm794_vm1, %v769_v55, %v5870_v17  ;;  %v771_v17 = vsel %vm761_vm0, %v5587_v38, %v5742_v61  ;;  %v8266_v55 = vld [vmem:[#allocation34_spill] sm:$0xff] }
 0x107   : > { %v668_v46 = vpop.permute.xlu1 %667  ;;  %v666_v10 = vpop.permute.xlu0 %665 }
 0x108   : > { %v829_v12 = vsel %vm827_vm2, %v796_v15, %v668_v46  ;;  %v828_v57 = vsel %vm827_vm2, %v795_v21, %v666_v10  ;;  %v6074_v15 = vld [vmem:[%s5400_s19 + $0x15a] sm:$0xff]  ;;  %v6077_v10 = vld [vmem:[%s5400_s19 + $0x152] sm:$0xff]  ;;  %v798_v21 = vsel %vm794_vm1, %v765_v19, %v5846_v24  ;;  %v800_v24 = vsel %vm794_vm1, %v767_v49, %v5860_v28 }
 0x109   : > { %1438 = vrot.lane.b32.xlu1 %v6051_v14, %s5353_s20  ;;  %1436 = vrot.lane.b32.xlu0 %v6054_v48, %s5353_s20  ;;  %v768_v28 = vsel %vm761_vm0, %v5580_v37, %v5736_v54  ;;  %v770_v37 = vsel %vm761_vm0, %v5590_v39, %v5744_v58  ;;  %v804_v54 = vsel %vm794_vm1, %v771_v17, %v5882_v26  ;;  %v8263_v49 = vld [vmem:[#allocation61_spill] sm:$0xff] }
 0x10a   : > { %5051 = vmatprep.mubr.msk.f32.mxu0 %vm870_vm3, %v828_v57  ;;  %v801_v57 = vsel %vm794_vm1, %v768_v28, %v5872_v31  ;;  %v803_v3 = vsel %vm794_vm1, %v770_v37, %v5884_v27  ;;  %v773_v39 = vsel %vm761_vm0, %v5597_v40, %v5750_v59  ;;  %v772_v58 = vsel %vm761_vm0, %v5600_v41, %v5752_v63  ;;  %v8267_v28 = vld [vmem:[#allocation18_spill] sm:$0xff]  ;;  %v8271_v17 = vld [vmem:[#allocation65_spill] sm:$0xff] }
 0x10b   : > { %5052 = vmatmul.mubr.msk.f32.vlgmr.msra.gmra.mrb[0].mxu0 %vm870_vm3, %v829_v12  ;;  %v672_v33 = vpop.permute.xlu1 %671  ;;  %v670_v46 = vpop.permute.xlu0 %669  ;;  %v806_v61 = vsel %vm794_vm1, %v773_v39, %v5896_v13  ;;  %v805_v26 = vsel %vm794_vm1, %v772_v58, %v5898_v20  ;;  %v775_v41 = vsel %vm761_vm0, %v5607_v42, %v5758_v53  ;;  %v774_v20 = vsel %vm761_vm0, %v5610_v43, %v5760_v52  ;;  %v8274_v39 = vld [vmem:[#allocation36_spill] sm:$0xff] }
 0x10c   : > { %v831_v32 = vsel %vm827_vm2, %v798_v21, %v672_v33  ;;  %v830_v47 = vsel %vm827_vm2, %v797_v23, %v670_v46  ;;  %v808_v59 = vsel %vm794_vm1, %v775_v41, %v5910_v22  ;;  %v807_v63 = vsel %vm794_vm1, %v774_v20, %v5912_v18  ;;  %v8259_v23 = vld [vmem:[#allocation16_spill] sm:$0xff]  ;;  %v8260_v33 = vld [vmem:[#allocation33_spill] sm:$0xff] }
 0x10d   : > { %1442 = vrot.lane.b32.xlu1 %v6074_v15, %s5353_s20  ;;  %1440 = vrot.lane.b32.xlu0 %v6077_v10, %s5353_s20  ;;  %v777_v22 = vsel %vm761_vm0, %v5617_v44, %v5766_v51  ;;  %v776_v18 = vsel %vm761_vm0, %v5620_v45, %v5768_v50  ;;  %v8256_v51 = vld [vmem:[#allocation2_spill] sm:$0xff]  ;;  %v8257_v45 = vld [vmem:[#allocation3_spill] sm:$0xff]  ;;  %v8258_v50 = vld [vmem:[#allocation32_spill] sm:$0xff] }
 0x10e   : > { %5054 = vmatprep.mubr.msk.f32.mxu0 %vm870_vm3, %v830_v47  ;;  %v810_v43 = vsel %vm794_vm1, %v777_v22, %v5924_v30  ;;  %v809_v52 = vsel %vm794_vm1, %v776_v18, %v5926_v16  ;;  %v779_v30 = vsel %vm761_vm0, %v8259_v23, %v8258_v50  ;;  %v8261_v16 = vld [vmem:[#allocation17_spill] sm:$0xff]  ;;  %v8275_v58 = vld [vmem:[#allocation20_spill] sm:$0xff]  ;;  %v8282_v22 = vld [vmem:[#allocation38_spill] sm:$0xff] }
 0x10f   : > { %5055 = vmatmul.mubr.msk.f32.gmra.mrb[2].mxu0 %vm870_vm3, %v831_v32  ;;  %v676_v12 = vpop.permute.xlu1 %675  ;;  %v674_v34 = vpop.permute.xlu0 %673  ;;  %v778_v46 = vsel %vm761_vm0, %v8261_v16, %v8260_v33  ;;  %v8262_v32 = vld [vmem:[#allocation60_spill] sm:$0xff]  ;;  %v8279_v41 = vld [vmem:[#allocation69_spill] sm:$0xff]  ;;  %v8283_v18 = vld [vmem:[#allocation22_spill] sm:$0xff] }
 0x110   : > { %v833_v1 = vsel %vm827_vm2, %v800_v24, %v676_v12  ;;  %v832_v35 = vsel %vm827_vm2, %v799_v25, %v674_v34  ;;  %v812_v47 = vsel %vm794_vm1, %v779_v30, %v8262_v32  ;;  %v811_v60 = vsel %vm794_vm1, %v778_v46, %v8263_v49  ;;  %v8288_v16 = vld [vmem:[#allocation10_spill] sm:$0xff]  ;;  %v8289_v46 = vld [vmem:[#allocation11_spill] sm:$0xff]  ;;  %v8290_v32 = vld [vmem:[#allocation40_spill] sm:$0xff] }
 0x111   : > { %1446 = vrot.lane.b32.xlu1 %v6098_v56, %s5353_s20  ;;  %1444 = vrot.lane.b32.xlu0 %v6101_v62, %s5353_s20 }
 0x112   : > { %5057 = vmatprep.mubr.msk.f32.mxu0 %vm870_vm3, %v832_v35  ;;  %v8265_v35 = vld [vmem:[#allocation5_spill] sm:$0xff] }
 0x113   : > { %5058 = vmatmul.mubr.msk.f32.gmra.mrb[4].mxu0 %vm870_vm3, %v833_v1  ;;  %v680_v11 = vpop.permute.xlu1 %679  ;;  %v678_v19 = vpop.permute.xlu0 %677  ;;  %v8264_v1 = vld [vmem:[#allocation4_spill] sm:$0xff] }
 0x114   : > { %v835_v21 = vsel %vm827_vm2, %v802_v29, %v680_v11  ;;  %v834_v36 = vsel %vm827_vm2, %v801_v57, %v678_v19  ;;  %v781_v29 = vsel %vm761_vm0, %v8267_v28, %v8266_v55  ;;  %v8268_v57 = vld [vmem:[#allocation35_spill] sm:$0xff] }
 0x115   : > { %1514 = vrot.lane.b32.xlu1 %v5410_v2, %s5354_s21  ;;  %1512 = vrot.lane.b32.xlu0 %v5403_v0, %s5354_s21  ;;  %v8269_v11 = vld [vmem:[#allocation19_spill] sm:$0xff] }
 0x116   : > { %5060 = vmatprep.mubr.msk.f32.mxu0 %vm870_vm3, %v834_v36  ;;  %v780_v19 = vsel %vm761_vm0, %v8269_v11, %v8268_v57  ;;  %v8296_v11 = vld [vmem:[#allocation12_spill] sm:$0xff] }
 0x117   : > { %5061 = vmatmul.mubr.msk.f32.gmra.mrb[6].mxu0 %vm870_vm3, %v835_v21  ;;  %v684_v2 = vpop.permute.xlu1 %683  ;;  %v682_v0 = vpop.permute.xlu0 %681  ;;  %v8270_v21 = vld [vmem:[#allocation64_spill] sm:$0xff]  ;;  %v813_v37 = vsel %vm794_vm1, %v780_v19, %v8271_v17  ;;  %v8297_v19 = vld [vmem:[#allocation13_spill] sm:$0xff] }
 0x118   : > { %v837_v31 = vsel %vm827_vm2, %v804_v54, %v684_v2  ;;  %v836_v38 = vsel %vm827_vm2, %v803_v3, %v682_v0  ;;  %v814_v36 = vsel %vm794_vm1, %v781_v29, %v8270_v21  ;;  %v8298_v21 = vld [vmem:[#allocation42_spill] sm:$0xff] }
 0x119   : > { %1518 = vrot.lane.b32.xlu1 %v5417_v4, %s5354_s21  ;;  %1516 = vrot.lane.b32.xlu0 %v5420_v5, %s5354_s21 }
 0x11a   : > { %5063 = vmatprep.mubr.msk.f32.mxu0 %vm870_vm3, %v836_v38  ;;  %v8273_v38 = vld [vmem:[#allocation7_spill] sm:$0xff] }
 0x11b   : > { %5064 = vmatmul.mubr.msk.f32.gmra.mrb[8].mxu0 %vm870_vm3, %v837_v31  ;;  %v688_v4 = vpop.permute.xlu1 %687  ;;  %v686_v5 = vpop.permute.xlu0 %685  ;;  %v8272_v31 = vld [vmem:[#allocation6_spill] sm:$0xff] }
 0x11c   : > { %v839_v27 = vsel %vm827_vm2, %v806_v61, %v688_v4  ;;  %v838_v40 = vsel %vm827_vm2, %v805_v26, %v686_v5  ;;  %v783_v61 = vsel %vm761_vm0, %v8275_v58, %v8274_v39  ;;  %v8276_v26 = vld [vmem:[#allocation37_spill] sm:$0xff] }
 0x11d   : > { %1522 = vrot.lane.b32.xlu1 %v5427_v6, %s5354_s21  ;;  %1520 = vrot.lane.b32.xlu0 %v5430_v7, %s5354_s21  ;;  %v8277_v4 = vld [vmem:[#allocation21_spill] sm:$0xff] }
 0x11e   : > { %5066 = vmatprep.mubr.msk.f32.mxu0 %vm870_vm3, %v838_v40  ;;  %v782_v5 = vsel %vm761_vm0, %v8277_v4, %v8276_v26  ;;  %v8304_v4 = vld [vmem:[#allocation14_spill] sm:$0xff] }
 0x11f   : > { %5067 = vmatmul.mubr.msk.f32.gmra.mrb[10].mxu0 %vm870_vm3, %v839_v27  ;;  %v692_v6 = vpop.permute.xlu1 %691  ;;  %v690_v7 = vpop.permute.xlu0 %689  ;;  %v8278_v27 = vld [vmem:[#allocation68_spill] sm:$0xff]  ;;  %v815_v20 = vsel %vm794_vm1, %v782_v5, %v8279_v41  ;;  %v8305_v5 = vld [vmem:[#allocation15_spill] sm:$0xff] }
 0x120   : > { %v841_v13 = vsel %vm827_vm2, %v808_v59, %v692_v6  ;;  %v840_v42 = vsel %vm827_vm2, %v807_v63, %v690_v7  ;;  %v816_v40 = vsel %vm794_vm1, %v783_v61, %v8278_v27  ;;  %v8306_v27 = vld [vmem:[#allocation44_spill] sm:$0xff] }
 0x121   : > { %1526 = vrot.lane.b32.xlu1 %v5437_v8, %s5354_s21  ;;  %1524 = vrot.lane.b32.xlu0 %v5440_v9, %s5354_s21 }
 0x122   : > { %5069 = vmatprep.mubr.msk.f32.mxu0 %vm870_vm3, %v840_v42  ;;  %v8281_v42 = vld [vmem:[#allocation9_spill] sm:$0xff] }
 0x123   : > { %5070 = vmatmul.mubr.msk.f32.gmra.mrb[12].mxu0 %vm870_vm3, %v841_v13  ;;  %v696_v8 = vpop.permute.xlu1 %695  ;;  %v694_v9 = vpop.permute.xlu0 %693  ;;  %v8280_v13 = vld [vmem:[#allocation8_spill] sm:$0xff] }
 0x124   : > { %v843_v53 = vsel %vm827_vm2, %v810_v43, %v696_v8  ;;  %v842_v44 = vsel %vm827_vm2, %v809_v52, %v694_v9  ;;  %v785_v43 = vsel %vm761_vm0, %v8283_v18, %v8282_v22  ;;  %v8284_v52 = vld [vmem:[#allocation39_spill] sm:$0xff]  ;;  %v8313_v22 = vld [vmem:[#allocation85_spill] sm:$0xff] }
 0x125   : > { %1530 = vrot.lane.b32.xlu1 %v8256_v51, %s5354_s21  ;;  %1528 = vrot.lane.b32.xlu0 %v8257_v45, %s5354_s21  ;;  %v8285_v8 = vld [vmem:[#allocation23_spill] sm:$0xff]  ;;  %v8287_v51 = vld [vmem:[#allocation73_spill] sm:$0xff] }
 0x126   : > { %5072 = vmatprep.mubr.msk.f32.mxu0 %vm870_vm3, %v842_v44  ;;  %v784_v9 = vsel %vm761_vm0, %v8285_v8, %v8284_v52 }
 0x127   : > { %5073 = vmatmul.mubr.msk.f32.gmra.mrb[14].mxu0 %vm870_vm3, %v843_v53  ;;  %v700_v24 = vpop.permute.xlu1 %699  ;;  %v698_v25 = vpop.permute.xlu0 %697  ;;  %v8286_v53 = vld [vmem:[#allocation72_spill] sm:$0xff]  ;;  %v817_v45 = vsel %vm794_vm1, %v784_v9, %v8287_v51 }
 0x128   : > { %v845_v12 = vsel %vm827_vm2, %v812_v47, %v700_v24  ;;  %v844_v34 = vsel %vm827_vm2, %v811_v60, %v698_v25  ;;  %v818_v44 = vsel %vm794_vm1, %v785_v43, %v8286_v53  ;;  %v8291_v47 = vld [vmem:[#allocation24_spill] sm:$0xff]  ;;  %v8292_v60 = vld [vmem:[#allocation41_spill] sm:$0xff]  ;;  %v4436_v53 = vld [vmem:[%s8094_s1 + $0x20] sm:$0xff] }
 0x129   : > { %1534 = vrot.lane.b32.xlu1 %v8264_v1, %s5354_s21  ;;  %1532 = vrot.lane.b32.xlu0 %v8265_v35, %s5354_s21  ;;  %v787_v49 = vsel %vm761_vm0, %v8291_v47, %v8290_v32  ;;  %v8293_v24 = vld [vmem:[#allocation25_spill] sm:$0xff]  ;;  %v8320_v47 = vld [vmem:[#allocation88_spill] sm:$0xff] }
 0x12a   : > { %5075 = vmatprep.mubr.msk.f32.mxu0 %vm870_vm3, %v844_v34  ;;  %v786_v25 = vsel %vm761_vm0, %v8293_v24, %v8292_v60  ;;  %v8295_v1 = vld [vmem:[#allocation77_spill] sm:$0xff] }
 0x12b   : > { %5076 = vmatmul.mubr.msk.f32.gmra.mrb[16].mxu0 %vm870_vm3, %v845_v12  ;;  %v704_v54 = vpop.permute.xlu1 %703  ;;  %v702_v3 = vpop.permute.xlu0 %701  ;;  %v8294_v12 = vld [vmem:[#allocation76_spill] sm:$0xff]  ;;  %v819_v35 = vsel %vm794_vm1, %v786_v25, %v8295_v1  ;;  %v6353_v32 = vld [vmem:[%s5400_s19 + $0x139] sm:$0xff] }
 0x12c   : > { %v847_v2 = vsel %vm827_vm2, %v814_v36, %v704_v54  ;;  %v846_v0 = vsel %vm827_vm2, %v813_v37, %v702_v3  ;;  %v820_v34 = vsel %vm794_vm1, %v787_v49, %v8294_v12  ;;  %v8299_v36 = vld [vmem:[#allocation26_spill] sm:$0xff]  ;;  %v8300_v37 = vld [vmem:[#allocation43_spill] sm:$0xff]  ;;  %8319 = vst [vmem:[#allocation16_spill] sm:$0xff] %v6353_v32  ;;  %v8321_v60 = vld [vmem:[#allocation89_spill] sm:$0xff] }
 0x12d   : > { %1538 = vrot.lane.b32.xlu1 %v8272_v31, %s5354_s21  ;;  %1536 = vrot.lane.b32.xlu0 %v8273_v38, %s5354_s21  ;;  %v789_v17 = vsel %vm761_vm0, %v8299_v36, %v8298_v21  ;;  %v8301_v54 = vld [vmem:[#allocation27_spill] sm:$0xff]  ;;  %v8303_v31 = vld [vmem:[#allocation81_spill] sm:$0xff] }
 0x12e   : > { %5078 = vmatprep.mubr.msk.f32.mxu0 %vm870_vm3, %v846_v0  ;;  %v788_v3 = vsel %vm761_vm0, %v8301_v54, %v8300_v37  ;;  %v6389_v21 = vld [vmem:[%s5400_s19 + $0x171] sm:$0xff]  ;;  %v6392_v36 = vld [vmem:[%s5400_s19 + $0x169] sm:$0xff] }
 0x12f   : > { %5079 = vmatmul.mubr.msk.f32.gmra.mrb[18].mxu0 %vm870_vm3, %v847_v2  ;;  %v708_v59 = vpop.permute.xlu1 %707  ;;  %v706_v63 = vpop.permute.xlu0 %705  ;;  %v8302_v2 = vld [vmem:[#allocation80_spill] sm:$0xff]  ;;  %v821_v38 = vsel %vm794_vm1, %v788_v3, %v8303_v31  ;;  %8324 = vst [vmem:[#allocation60_spill] sm:$0xff] %v6389_v21  ;;  %8325 = vst [vmem:[#allocation61_spill] sm:$0xff] %v6392_v36 }
 0x130   : > { %v849_v6 = vsel %vm827_vm2, %v816_v40, %v708_v59  ;;  %v848_v7 = vsel %vm827_vm2, %v815_v20, %v706_v63  ;;  %v822_v0 = vsel %vm794_vm1, %v789_v17, %v8302_v2  ;;  %v8307_v40 = vld [vmem:[#allocation28_spill] sm:$0xff]  ;;  %v8308_v20 = vld [vmem:[#allocation45_spill] sm:$0xff] }
 0x131   : > { %1542 = vrot.lane.b32.xlu1 %v8280_v13, %s5354_s21  ;;  %1540 = vrot.lane.b32.xlu0 %v8281_v42, %s5354_s21  ;;  %v791_v41 = vsel %vm761_vm0, %v8307_v40, %v8306_v27  ;;  %v8309_v59 = vld [vmem:[#allocation29_spill] sm:$0xff]  ;;  %v8312_v13 = vld [vmem:[#allocation84_spill] sm:$0xff] }
 0x132   : > { %5081 = vmatprep.mubr.msk.f32.mxu0 %vm870_vm3, %v848_v7  ;;  %v790_v63 = vsel %vm761_vm0, %v8309_v59, %v8308_v20  ;;  %v6323_v7 = vld [vmem:[%s5400_s19 + $0x121] sm:$0xff]  ;;  %v824_v42 = vsel %vm794_vm1, %v791_v41, %v8312_v13  ;;  %v8326_v2 = vld [vmem:[#allocation48_spill] sm:$0xff] }
 0x133   : > { %5082 = vmatmul.mubr.msk.f32.gmra.mrb[20].mxu0 %vm870_vm3, %v849_v6  ;;  %v712_v50 = vpop.permute.xlu1 %711  ;;  %v710_v23 = vpop.permute.xlu0 %709  ;;  %v6320_v6 = vld [vmem:[%s5400_s19 + $0x129] sm:$0xff]  ;;  %8311 = vst [vmem:[#allocation3_spill] sm:$0xff] %v6323_v7  ;;  %v823_v18 = vsel %vm794_vm1, %v790_v63, %v8313_v22  ;;  %v8332_v41 = vld [vmem:[#allocation54_spill] sm:$0xff] }
 0x134   : > { %v851_v30 = vsel %vm827_vm2, %v818_v44, %v712_v50  ;;  %v850_v33 = vsel %vm827_vm2, %v817_v45, %v710_v23  ;;  %8310 = vst [vmem:[#allocation2_spill] sm:$0xff] %v6320_v6  ;;  %v4437_v44 = vld [vmem:[%s8094_s1 + $0x28] sm:$0xff]  ;;  %v8314_v45 = vld [vmem:[#allocation46_spill] sm:$0xff]  ;;  %v8334_v13 = vld [vmem:[#allocation56_spill] sm:$0xff] }
 0x135   : > { %1546 = vrot.lane.b32.xlu1 %v8288_v16, %s5354_s21  ;;  %1544 = vrot.lane.b32.xlu0 %v8289_v46, %s5354_s21  ;;  %v5275_v51 = vpack.c.bf16 %v4437_v44, %v4436_v53  ;;  %v8315_v50 = vld [vmem:[#allocation30_spill] sm:$0xff]  ;;  %v8333_v20 = vld [vmem:[#allocation55_spill] sm:$0xff] }
 0x136   : > { %5084 = vmatprep.mubr.msk.f32.mxu0 %vm870_vm3, %v850_v33  ;;  %v793_v23 = vsel %vm761_vm0, %v8315_v50, %v8314_v45  ;;  %v8317_v33 = vld [vmem:[#allocation31_spill] sm:$0xff]  ;;  %v8338_v53 = vld [vmem:[#allocation62_spill] sm:$0xff] }
 0x137   : > { %5085 = vmatmul.mubr.msk.f32.gmra.mrb[22].mxu0 %vm870_vm3, %v851_v30  ;;  %v716_v55 = vpop.permute.xlu1 %715  ;;  %v714_v28 = vpop.permute.xlu0 %713  ;;  %v8316_v30 = vld [vmem:[#allocation47_spill] sm:$0xff]  ;;  %v826_v49 = vsel %vm794_vm1, %v793_v23, %v8320_v47  ;;  %5276 = vmatprep.subr.bf16.mxu1 %v5275_v51  ;;  %v8342_v50 = vld [vmem:[#allocation66_spill] sm:$0xff] }
 0x138   : > { %v853_v29 = vsel %vm827_vm2, %v820_v34, %v716_v55  ;;  %v852_v57 = vsel %vm827_vm2, %v819_v35, %v714_v28  ;;  %v792_v16 = vsel %vm761_vm0, %v8317_v33, %v8316_v30  ;;  %v6350_v46 = vld [vmem:[%s5400_s19 + $0x141] sm:$0xff]  ;;  %5278 = vmatpush3.bf16.msra.mxu1 %v5275_v51  ;;  %v4438_v35 = vld [vmem:[%s8094_s1 + $0x30] sm:$0xff]  ;;  %v4439_v55 = vld [vmem:[%s8094_s1 + $0x38] sm:$0xff] }
 0x139   : > { %1550 = vrot.lane.b32.xlu1 %v8296_v11, %s5354_s21  ;;  %1548 = vrot.lane.b32.xlu0 %v8297_v19, %s5354_s21  ;;  %8318 = vst [vmem:[#allocation32_spill] sm:$0xff] %v6350_v46  ;;  %v825_v24 = vsel %vm794_vm1, %v792_v16, %v8321_v60  ;;  %v5279_v28 = vpack.c.bf16 %v4439_v55, %v4438_v35  ;;  %v8339_v44 = vld [vmem:[#allocation63_spill] sm:$0xff]  ;;  %v8346_v16 = vld [vmem:[#allocation70_spill] sm:$0xff] }
 0x13a   : > { %5087 = vmatprep.mubr.msk.f32.mxu0 %vm870_vm3, %v852_v57  ;;  %v6377_v57 = vld [vmem:[%s5400_s19 + $0x151] sm:$0xff]  ;;  %v8343_v23 = vld [vmem:[#allocation67_spill] sm:$0xff] }
 0x13b   : > { %5088 = vmatmul.mubr.msk.f32.gmra.mrb[24].mxu0 %vm870_vm3, %v853_v29  ;;  %v720_v39 = vpop.permute.xlu1 %719  ;;  %v718_v58 = vpop.permute.xlu0 %717  ;;  %v6374_v29 = vld [vmem:[%s5400_s19 + $0x159] sm:$0xff]  ;;  %8323 = vst [vmem:[#allocation17_spill] sm:$0xff] %v6377_v57  ;;  %5280 = vmatprep.subr.bf16.mxu1 %v5279_v28  ;;  %v8347_v47 = vld [vmem:[#allocation71_spill] sm:$0xff] }
 0x13c   : > { %v855_v61 = vsel %vm827_vm2, %v822_v0, %v720_v39  ;;  %v854_v26 = vsel %vm827_vm2, %v821_v38, %v718_v58  ;;  %8322 = vst [vmem:[#allocation33_spill] sm:$0xff] %v6374_v29  ;;  %5282 = vmatpush3.bf16.msra.mxu1 %v5279_v28  ;;  %v8327_v0 = vld [vmem:[#allocation49_spill] sm:$0xff]  ;;  %v8328_v39 = vld [vmem:[#allocation50_spill] sm:$0xff]  ;;  %v8329_v58 = vld [vmem:[#allocation51_spill] sm:$0xff] }
 0x13d   : > { %1554 = vrot.lane.b32.xlu1 %v8304_v4, %s5354_s21  ;;  %1552 = vrot.lane.b32.xlu0 %v8305_v5, %s5354_s21  ;;  %v8330_v4 = vld [vmem:[#allocation52_spill] sm:$0xff]  ;;  %v8331_v5 = vld [vmem:[#allocation53_spill] sm:$0xff]  ;;  %v8355_v35 = vld [vmem:[#allocation79_spill] sm:$0xff] }
 0x13e   : > { %5090 = vmatprep.mubr.msk.f32.mxu0 %vm870_vm3, %v854_v26 }
 0x13f   : > { %5091 = vmatmul.mubr.msk.f32.gmra.mrb[26].mxu0 %vm870_vm3, %v855_v61  ;;  %v724_v43 = vpop.permute.xlu1 %723  ;;  %v722_v52 = vpop.permute.xlu0 %721 }
 0x140   : > { %v857_v8 = vsel %vm827_vm2, %v824_v42, %v724_v43  ;;  %v856_v9 = vsel %vm827_vm2, %v823_v18, %v722_v52  ;;  %v8335_v42 = vld [vmem:[#allocation57_spill] sm:$0xff]  ;;  %v8336_v43 = vld [vmem:[#allocation58_spill] sm:$0xff]  ;;  %v8337_v52 = vld [vmem:[#allocation59_spill] sm:$0xff] }
 0x141   : > { %1558 = vrot.lane.b32.xlu1 %v6320_v6, %s5354_s21  ;;  %1556 = vrot.lane.b32.xlu0 %v6323_v7, %s5354_s21 }
 0x142   : > { %5093 = vmatprep.mubr.msk.f32.mxu0 %vm870_vm3, %v856_v9 }
 0x143   : > { %5094 = vmatmul.mubr.msk.f32.gmra.mrb[28].mxu0 %vm870_vm3, %v857_v8  ;;  %v728_v25 = vpop.permute.xlu1 %727  ;;  %v726_v12 = vpop.permute.xlu0 %725 }
 0x144   : > { %v859_v34 = vsel %vm827_vm2, %v826_v49, %v728_v25  ;;  %v858_v1 = vsel %vm827_vm2, %v825_v24, %v726_v12  ;;  %v8350_v24 = vld [vmem:[#allocation74_spill] sm:$0xff]  ;;  %v8351_v25 = vld [vmem:[#allocation75_spill] sm:$0xff] }
 0x145   : > { %1562 = vrot.lane.b32.xlu1 %v6350_v46, %s5354_s21  ;;  %1560 = vrot.lane.b32.xlu0 %v6353_v32, %s5354_s21  ;;  %v6627_v32 = vld [vmem:[%s5400_s19 + $0xb1] sm:$0xff] }
 0x146   : > { %5096 = vmatprep.mubr.msk.f32.mxu0 %vm870_vm3, %v858_v1  ;;  %v8354_v1 = vld [vmem:[#allocation78_spill] sm:$0xff] }
 0x147   : > { %5097 = vmatmul.mubr.msk.f32.gmra.mrb[30].mxu0 %vm870_vm3, %v859_v34  ;;  %v6380_v11 = vpop.permute.xlu1 %1386  ;;  %v6382_v19 = vpop.permute.xlu0 %1384 }
 0x149   : > { %1566 = vrot.lane.b32.xlu1 %v6374_v29, %s5354_s21  ;;  %1564 = vrot.lane.b32.xlu0 %v6377_v57, %s5354_s21  ;;  %v6613_v57 = vld [vmem:[%s5400_s19 + $0x99] sm:$0xff] }
 0x14b   : > { %v6394_v17 = vpop.permute.xlu1 %1390  ;;  %v6396_v37 = vpop.permute.xlu0 %1388 }
 0x14d   : > { %1570 = vrot.lane.b32.xlu1 %v6389_v21, %s5354_s21  ;;  %1568 = vrot.lane.b32.xlu0 %v6392_v36, %s5354_s21  ;;  %v6599_v36 = vld [vmem:[%s5400_s19 + $0x81] sm:$0xff] }
 0x14f   : > { %v6402_v54 = vpop.permute.xlu1 %1394  ;;  %v6404_v3 = vpop.permute.xlu0 %1392 }
 0x151   : > { %1574 = vrot.lane.b32.xlu1 %v8326_v2, %s5354_s21  ;;  %1572 = vrot.lane.b32.xlu0 %v8327_v0, %s5354_s21  ;;  %v8358_v2 = vld [vmem:[#allocation82_spill] sm:$0xff]  ;;  %v8359_v0 = vld [vmem:[#allocation83_spill] sm:$0xff] }
 0x153   : > { %v6410_v31 = vpop.permute.xlu1 %1398  ;;  %v6412_v38 = vpop.permute.xlu0 %1396 }
 0x155   : > { %1642 = vrot.lane.b32.xlu1 %v8328_v39, %s5355_s30  ;;  %1640 = vrot.lane.b32.xlu0 %v8329_v58, %s5355_s30 }
 0x157   : > { %v6418_v61 = vpop.permute.xlu1 %1402  ;;  %v6420_v26 = vpop.permute.xlu0 %1400 }
 0x159   : > { %1646 = vrot.lane.b32.xlu1 %v8330_v4, %s5355_s30  ;;  %1644 = vrot.lane.b32.xlu0 %v8331_v5, %s5355_s30  ;;  %v8362_v4 = vld [vmem:[#allocation86_spill] sm:$0xff]  ;;  %v8363_v5 = vld [vmem:[#allocation87_spill] sm:$0xff] }
 0x15b   : > { %v6426_v27 = vpop.permute.xlu1 %1406  ;;  %v6428_v40 = vpop.permute.xlu0 %1404 }
 0x15d   : > { %1650 = vrot.lane.b32.xlu1 %v8332_v41, %s5355_s30  ;;  %1648 = vrot.lane.b32.xlu0 %v8333_v20, %s5355_s30 }
 0x15f   : > { %v6434_v59 = vpop.permute.xlu1 %1410  ;;  %v6436_v63 = vpop.permute.xlu0 %1408 }
 0x161   : > { %1654 = vrot.lane.b32.xlu1 %v8334_v13, %s5355_s30  ;;  %1652 = vrot.lane.b32.xlu0 %v8335_v42, %s5355_s30 }
 0x163   : > { %v6442_v22 = vpop.permute.xlu1 %1414  ;;  %v6444_v18 = vpop.permute.xlu0 %1412 }
 0x165   : > { %1658 = vrot.lane.b32.xlu1 %v8336_v43, %s5355_s30  ;;  %1656 = vrot.lane.b32.xlu0 %v8337_v52, %s5355_s30 }
 0x167   : > { %v6450_v8 = vpop.permute.xlu1 %1418  ;;  %v6452_v9 = vpop.permute.xlu0 %1416 }
 0x169   : > { %1662 = vrot.lane.b32.xlu1 %v8338_v53, %s5355_s30  ;;  %1660 = vrot.lane.b32.xlu0 %v8339_v44, %s5355_s30  ;;  %v6543_v44 = vld [vmem:[%s5400_s19 + $0x21] sm:$0xff] }
 0x16b   : > { %v6458_v51 = vpop.permute.xlu1 %1422  ;;  %v6460_v45 = vpop.permute.xlu0 %1420 }
 0x16c   : > { %8340 = vst [vmem:[#allocation4_spill] sm:$0xff] %v6458_v51  ;;  %8341 = vst [vmem:[#allocation5_spill] sm:$0xff] %v6460_v45  ;;  %v4732_v45 = vld [vmem:[%s5400_s19 + $0x1a] sm:$0xff] }
 0x16d   : > { %1666 = vrot.lane.b32.xlu1 %v8342_v50, %s5355_s30  ;;  %1664 = vrot.lane.b32.xlu0 %v8343_v23, %s5355_s30  ;;  %v1224_v51 = vld [vmem:[%s5400_s19 + $0x1] sm:$0xff] }
 0x16f   : > { %v6466_v30 = vpop.permute.xlu1 %1426  ;;  %v6468_v33 = vpop.permute.xlu0 %1424 }
 0x170   : > { %8344 = vst [vmem:[#allocation34_spill] sm:$0xff] %v6466_v30  ;;  %8345 = vst [vmem:[#allocation18_spill] sm:$0xff] %v6468_v33  ;;  %v6655_v33 = vld [vmem:[%s5400_s19 + $0xe1] sm:$0xff] }
 0x171   : > { %1670 = vrot.lane.b32.xlu1 %v8346_v16, %s5355_s30  ;;  %1668 = vrot.lane.b32.xlu0 %v8347_v47, %s5355_s30  ;;  %v6557_v16 = vld [vmem:[%s5400_s19 + $0x39] sm:$0xff]  ;;  %v6560_v47 = vld [vmem:[%s5400_s19 + $0x31] sm:$0xff]  ;;  %8375 = vst [vmem:[#allocation73_spill] sm:$0xff] %v6655_v33 }
 0x173   : > { %v6474_v49 = vpop.permute.xlu1 %1430  ;;  %v6476_v60 = vpop.permute.xlu0 %1428 }
 0x174   : > { %8348 = vst [vmem:[#allocation35_spill] sm:$0xff] %v6474_v49  ;;  %8349 = vst [vmem:[#allocation19_spill] sm:$0xff] %v6476_v60 }
 0x175   : > { %1674 = vrot.lane.b32.xlu1 %v8350_v24, %s5355_s30  ;;  %1672 = vrot.lane.b32.xlu0 %v8351_v25, %s5355_s30 }
 0x177   : > { %v6482_v12 = vpop.permute.xlu1 %1434  ;;  %v6484_v34 = vpop.permute.xlu0 %1432 }
 0x178   : > { %8352 = vst [vmem:[#allocation64_spill] sm:$0xff] %v6482_v12  ;;  %8353 = vst [vmem:[#allocation65_spill] sm:$0xff] %v6484_v34  ;;  %v6641_v34 = vld [vmem:[%s5400_s19 + $0xc9] sm:$0xff]  ;;  %v6644_v12 = vld [vmem:[%s5400_s19 + $0xc1] sm:$0xff] }
 0x179   : > { %1678 = vrot.lane.b32.xlu1 %v8354_v1, %s5355_s30  ;;  %1676 = vrot.lane.b32.xlu0 %v8355_v35, %s5355_s30  ;;  %v6571_v1 = vld [vmem:[%s5400_s19 + $0x51] sm:$0xff]  ;;  %v6574_v35 = vld [vmem:[%s5400_s19 + $0x49] sm:$0xff]  ;;  %8372 = vst [vmem:[#allocation39_spill] sm:$0xff] %v6644_v12 }
 0x17b   : > { %v6490_v55 = vpop.permute.xlu1 %1438  ;;  %v6492_v28 = vpop.permute.xlu0 %1436 }
 0x17c   : > { %8356 = vst [vmem:[#allocation6_spill] sm:$0xff] %v6490_v55  ;;  %8357 = vst [vmem:[#allocation7_spill] sm:$0xff] %v6492_v28  ;;  %v6630_v28 = vld [vmem:[%s5400_s19 + $0xa9] sm:$0xff] }
 0x17d   : > { %1682 = vrot.lane.b32.xlu1 %v8358_v2, %s5355_s30  ;;  %1680 = vrot.lane.b32.xlu0 %v8359_v0, %s5355_s30 }
 0x17f   : > { %v6498_v39 = vpop.permute.xlu1 %1442  ;;  %v6500_v58 = vpop.permute.xlu0 %1440 }
 0x180   : > { %8360 = vst [vmem:[#allocation36_spill] sm:$0xff] %v6498_v39  ;;  %8361 = vst [vmem:[#allocation20_spill] sm:$0xff] %v6500_v58  ;;  %v6616_v58 = vld [vmem:[%s5400_s19 + $0x91] sm:$0xff] }
 0x181   : > { %1686 = vrot.lane.b32.xlu1 %v8362_v4, %s5355_s30  ;;  %1684 = vrot.lane.b32.xlu0 %v8363_v5, %s5355_s30  ;;  %v6585_v4 = vld [vmem:[%s5400_s19 + $0x69] sm:$0xff]  ;;  %v6588_v5 = vld [vmem:[%s5400_s19 + $0x61] sm:$0xff] }
 0x183   : > { %v6506_v41 = vpop.permute.xlu1 %1446  ;;  %v6508_v20 = vpop.permute.xlu0 %1444 }
 0x184   : > { %8364 = vst [vmem:[#allocation37_spill] sm:$0xff] %v6506_v41  ;;  %8365 = vst [vmem:[#allocation21_spill] sm:$0xff] %v6508_v20  ;;  %v6602_v20 = vld [vmem:[%s5400_s19 + $0x79] sm:$0xff] }
 0x185   : > { %1690 = vrot.lane.b32.xlu1 %v6051_v14, %s5355_s30  ;;  %1688 = vrot.lane.b32.xlu0 %v6054_v48, %s5355_s30  ;;  %v4435_v14 = vld [vmem:[%s5400_s19 + $0x18a] sm:$0xff]  ;;  %v4434_v48 = vld [vmem:[%s5400_s19 + $0x182] sm:$0xff] }
 0x187   : > { %v6514_v13 = vpop.permute.xlu1 %1514  ;;  %v6516_v42 = vpop.permute.xlu0 %1512 }
 0x189   : > { %1694 = vrot.lane.b32.xlu1 %v6074_v15, %s5355_s30  ;;  %1692 = vrot.lane.b32.xlu0 %v6077_v10, %s5355_s30 }
 0x18b   : > { %v6522_v43 = vpop.permute.xlu1 %1518  ;;  %v6524_v52 = vpop.permute.xlu0 %1516 }
 0x18d   : > { %1698 = vrot.lane.b32.xlu1 %v6098_v56, %s5355_s30  ;;  %1696 = vrot.lane.b32.xlu0 %v6101_v62, %s5355_s30  ;;  %v6546_v62 = vld [vmem:[%s5400_s19 + $0x19] sm:$0xff] }
 0x18f   : > { %v6532_v53 = vpop.permute.xlu1 %1522  ;;  %v6534_v15 = vpop.permute.xlu0 %1520 }
 0x191   : > { %1702 = vrot.lane.b32.xlu1 %v4435_v14, %s5355_s30  ;;  %1700 = vrot.lane.b32.xlu0 %v4434_v48, %s5355_s30 }
 0x193   : > { %v6538_v10 = vpop.permute.xlu1 %1526  ;;  %v6540_v56 = vpop.permute.xlu0 %1524 }
 0x195   : > { %2356 = vrot.lane.b32.xlu1 %v6543_v44, %s5353_s20  ;;  %2354 = vrot.lane.b32.xlu0 %v6546_v62, %s5353_s20 }
 0x197   : > { %v6552_v50 = vpop.permute.xlu1 %1530  ;;  %v6554_v23 = vpop.permute.xlu0 %1528 }
 0x199   : > { %2360 = vrot.lane.b32.xlu1 %v6557_v16, %s5353_s20  ;;  %2358 = vrot.lane.b32.xlu0 %v6560_v47, %s5353_s20 }
 0x19b   : > { %v6566_v24 = vpop.permute.xlu1 %1534  ;;  %v6568_v25 = vpop.permute.xlu0 %1532 }
 0x19d   : > { %2364 = vrot.lane.b32.xlu1 %v6571_v1, %s5353_s20  ;;  %2362 = vrot.lane.b32.xlu0 %v6574_v35, %s5353_s20 }
 0x19f   : > { %v6580_v2 = vpop.permute.xlu1 %1538  ;;  %v6582_v0 = vpop.permute.xlu0 %1536 }
 0x1a1   : > { %2368 = vrot.lane.b32.xlu1 %v6585_v4, %s5353_s20  ;;  %2366 = vrot.lane.b32.xlu0 %v6588_v5, %s5353_s20 }
 0x1a3   : > { %v6594_v14 = vpop.permute.xlu1 %1542  ;;  %v6596_v48 = vpop.permute.xlu0 %1540 }
 0x1a5   : > { %2372 = vrot.lane.b32.xlu1 %v6599_v36, %s5353_s20  ;;  %2370 = vrot.lane.b32.xlu0 %v6602_v20, %s5353_s20 }
 0x1a7   : > { %v6608_v21 = vpop.permute.xlu1 %1546  ;;  %v6610_v41 = vpop.permute.xlu0 %1544 }
 0x1a8   : > { %8366 = vst [vmem:[#allocation68_spill] sm:$0xff] %v6608_v21  ;;  %8367 = vst [vmem:[#allocation69_spill] sm:$0xff] %v6610_v41 }
 0x1a9   : > { %2376 = vrot.lane.b32.xlu1 %v6613_v57, %s5353_s20  ;;  %2374 = vrot.lane.b32.xlu0 %v6616_v58, %s5353_s20 }
 0x1ab   : > { %v6622_v29 = vpop.permute.xlu1 %1550  ;;  %v6624_v39 = vpop.permute.xlu0 %1548 }
 0x1ac   : > { %8368 = vst [vmem:[#allocation8_spill] sm:$0xff] %v6622_v29  ;;  %8369 = vst [vmem:[#allocation9_spill] sm:$0xff] %v6624_v39  ;;  %v6669_v39 = vld [vmem:[%s5400_s19 + $0xf9] sm:$0xff]  ;;  %v6672_v29 = vld [vmem:[%s5400_s19 + $0xf1] sm:$0xff] }
 0x1ad   : > { %2380 = vrot.lane.b32.xlu1 %v6627_v32, %s5353_s20  ;;  %2378 = vrot.lane.b32.xlu0 %v6630_v28, %s5353_s20  ;;  %8379 = vst [vmem:[#allocation24_spill] sm:$0xff] %v6669_v39  ;;  %8380 = vst [vmem:[#allocation41_spill] sm:$0xff] %v6672_v29 }
 0x1af   : > { %v6636_v46 = vpop.permute.xlu1 %1554  ;;  %v6638_v55 = vpop.permute.xlu0 %1552 }
 0x1b0   : > { %8370 = vst [vmem:[#allocation38_spill] sm:$0xff] %v6636_v46  ;;  %8371 = vst [vmem:[#allocation22_spill] sm:$0xff] %v6638_v55  ;;  %v6658_v46 = vld [vmem:[%s5400_s19 + $0xd9] sm:$0xff] }
 0x1b1   : > { %2384 = vrot.lane.b32.xlu1 %v6641_v34, %s5353_s20  ;;  %2382 = vrot.lane.b32.xlu0 %v6644_v12, %s5353_s20  ;;  %8376 = vst [vmem:[#allocation10_spill] sm:$0xff] %v6658_v46 }
 0x1b3   : > { %v6650_v60 = vpop.permute.xlu1 %1558  ;;  %v6652_v49 = vpop.permute.xlu0 %1556 }
 0x1b4   : > { %8373 = vst [vmem:[#allocation23_spill] sm:$0xff] %v6650_v60  ;;  %8374 = vst [vmem:[#allocation72_spill] sm:$0xff] %v6652_v49 }
 0x1b5   : > { %2388 = vrot.lane.b32.xlu1 %v6655_v33, %s5353_s20  ;;  %2386 = vrot.lane.b32.xlu0 %v6658_v46, %s5353_s20  ;;  %v6683_v46 = vld [vmem:[%s5400_s19 + $0x111] sm:$0xff]  ;;  %v1225_v33 = vld [vmem:[%s5400_s19 + $0x9] sm:$0xff] }
 0x1b6   : > { %8383 = vst [vmem:[#allocation77_spill] sm:$0xff] %v6683_v46 }
 0x1b7   : > { %v6664_v55 = vpop.permute.xlu1 %1562  ;;  %v6666_v30 = vpop.permute.xlu0 %1560 }
 0x1b8   : > { %8377 = vst [vmem:[#allocation11_spill] sm:$0xff] %v6664_v55  ;;  %8378 = vst [vmem:[#allocation40_spill] sm:$0xff] %v6666_v30  ;;  %v6686_v55 = vld [vmem:[%s5400_s19 + $0x109] sm:$0xff] }
 0x1b9   : > { %2392 = vrot.lane.b32.xlu1 %v6669_v39, %s5353_s20  ;;  %2390 = vrot.lane.b32.xlu0 %v6672_v29, %s5353_s20  ;;  %8384 = vst [vmem:[#allocation12_spill] sm:$0xff] %v6686_v55 }
 0x1bb   : > { %v6678_v49 = vpop.permute.xlu1 %1566  ;;  %v6680_v60 = vpop.permute.xlu0 %1564 }
 0x1bc   : > { %8381 = vst [vmem:[#allocation25_spill] sm:$0xff] %v6678_v49  ;;  %8382 = vst [vmem:[#allocation76_spill] sm:$0xff] %v6680_v60  ;;  %v4632_v60 = vld [vmem:[%s8094_s1 + $0x40] sm:$0xff]  ;;  %v4633_v49 = vld [vmem:[%s8094_s1 + $0x48] sm:$0xff] }
 0x1bd   : > { %2396 = vrot.lane.b32.xlu1 %v6683_v46, %s5353_s20  ;;  %2394 = vrot.lane.b32.xlu0 %v6686_v55, %s5353_s20  ;;  %v4828_v46 = vld [vmem:[%s8094_s1 + $0x60] sm:$0xff]  ;;  %v5283_v39 = vpack.c.bf16 %v4633_v49, %v4632_v60  ;;  %v4829_v55 = vld [vmem:[%s8094_s1 + $0x68] sm:$0xff] }
 0x1be   : > { %v4634_v60 = vld [vmem:[%s8094_s1 + $0x50] sm:$0xff] }
 0x1bf   : > { %v6692_v30 = vpop.permute.xlu1 %1570  ;;  %v6694_v29 = vpop.permute.xlu0 %1568  ;;  %5284 = vmatprep.subr.bf16.mxu0 %v5283_v39 }
 0x1c0   : > { %8385 = vst [vmem:[#allocation13_spill] sm:$0xff] %v6692_v30  ;;  %8386 = vst [vmem:[#allocation42_spill] sm:$0xff] %v6694_v29  ;;  %v5291_v29 = vpack.c.bf16 %v4829_v55, %v4828_v46  ;;  %v6713_v30 = vld [vmem:[%s5400_s19 + $0x30] sm:$0xff]  ;;  %5286 = vmatpush3.bf16.msra.mxu0 %v5283_v39  ;;  %v4635_v46 = vld [vmem:[%s8094_s1 + $0x58] sm:$0xff]  ;;  %v1736_v39 = vsel %vm761_vm0, %v1224_v51, %v6382_v19 }
 0x1c1   : > { %2400 = vrot.lane.b32.xlu1 %v6320_v6, %s5353_s20  ;;  %2398 = vrot.lane.b32.xlu0 %v6323_v7, %s5353_s20  ;;  %v5287_v55 = vpack.c.bf16 %v4635_v46, %v4634_v60  ;;  %v1768_v6 = vsel %vm794_vm1, %v1736_v39, %v6516_v42 }
 0x1c2   : > { %5292 = vmatprep.subr.bf16.mxu1 %v5291_v29 }
 0x1c3   : > { %v6718_v41 = vpop.permute.xlu1 %1574  ;;  %v6720_v49 = vpop.permute.xlu0 %1572  ;;  %5288 = vmatprep.subr.bf16.mxu0 %v5287_v55 }
 0x1c4   : > { %8387 = vst [vmem:[#allocation26_spill] sm:$0xff] %v6718_v41  ;;  %8388 = vst [vmem:[#allocation43_spill] sm:$0xff] %v6720_v49  ;;  %v1737_v41 = vsel %vm761_vm0, %v1225_v33, %v6380_v11  ;;  %v4733_v49 = vld [vmem:[%s5400_s19 + $0x22] sm:$0xff]  ;;  %v4831_v11 = vld [vmem:[%s8094_s1 + $0x78] sm:$0xff]  ;;  %5290 = vmatpush3.bf16.msra.mxu0 %v5287_v55  ;;  %v1739_v33 = vsel %vm761_vm0, %v6543_v44, %v6394_v17 }
 0x1c5   : > { %2482 = vrot.lane.b32.xlu1 %v6713_v30, %s5354_s21  ;;  %3321 = vrot.lane.b32.xlu0 %v4732_v45, %s5353_s20  ;;  %v1769_v7 = vsel %vm794_vm1, %v1737_v41, %v6514_v13  ;;  %v4830_v45 = vld [vmem:[%s8094_s1 + $0x70] sm:$0xff]  ;;  %v1738_v41 = vsel %vm761_vm0, %v6546_v62, %v6396_v37 }
 0x1c6   : > { %v4796_v44 = vld [vmem:[%s5400_s19 + $0x32] sm:$0xff] }
 0x1c7   : > { %v1643_v21 = vpop.permute.xlu1 %1642  ;;  %v1641_v12 = vpop.permute.xlu0 %1640 }
 0x1c8   : > { %v1801_v19 = vsel %vm827_vm2, %v1769_v7, %v1643_v21  ;;  %v1800_v51 = vsel %vm827_vm2, %v1768_v6, %v1641_v12  ;;  %v6759_v7 = vld [vmem:[%s5400_s19 + $0x38] sm:$0xff]  ;;  %v5295_v6 = vpack.c.bf16 %v4831_v11, %v4830_v45  ;;  %v1771_v21 = vsel %vm794_vm1, %v1739_v33, %v6522_v43 }
 0x1c9   : > { %3449 = vrot.lane.b32.xlu1 %v6560_v47, %s5354_s21  ;;  %3323 = vrot.lane.b32.xlu0 %v4733_v49, %s5353_s20  ;;  %v1770_v12 = vsel %vm794_vm1, %v1738_v41, %v6524_v52  ;;  %v1741_v43 = vsel %vm761_vm0, %v6557_v16, %v6402_v54  ;;  %v1740_v52 = vsel %vm761_vm0, %v6560_v47, %v6404_v3 }
 0x1ca   : > { %5107 = vmatprep.mubr.msk.f32.mxu1 %vm870_vm3, %v1800_v51  ;;  %v1772_v62 = vsel %vm794_vm1, %v1740_v52, %v6534_v15  ;;  %v1743_v3 = vsel %vm761_vm0, %v6571_v1, %v6410_v31  ;;  %v4797_v15 = vld [vmem:[%s5400_s19 + $0x3a] sm:$0xff] }
 0x1cb   : > { %5108 = vmatmul.mubr.msk.f32.vlgmr.msra.gmra.mrb[0].mxu1 %vm870_vm3, %v1801_v19  ;;  %v1647_v13 = vpop.permute.xlu1 %1646  ;;  %v1645_v17 = vpop.permute.xlu0 %1644 }
 0x1cc   : > { %v1803_v42 = vsel %vm827_vm2, %v1771_v21, %v1647_v13  ;;  %v1802_v37 = vsel %vm827_vm2, %v1770_v12, %v1645_v17  ;;  %5294 = vmatpush3.bf16.msra.mxu1 %v5291_v29  ;;  %v1773_v29 = vsel %vm794_vm1, %v1741_v43, %v6532_v53  ;;  %v1742_v53 = vsel %vm761_vm0, %v6574_v35, %v6412_v38  ;;  %v6861_v17 = vld [vmem:[%s5400_s19 + $0x50] sm:$0xff] }
 0x1cd   : > { %2610 = vrot.lane.b32.xlu1 %v6560_v47, %s5355_s30  ;;  %2484 = vrot.lane.b32.xlu0 %v6759_v7, %s5354_s21  ;;  %v1775_v47 = vsel %vm794_vm1, %v1743_v3, %v6538_v10  ;;  %v1774_v55 = vsel %vm794_vm1, %v1742_v53, %v6540_v56  ;;  %v1745_v38 = vsel %vm761_vm0, %v6585_v4, %v6418_v61  ;;  %v6816_v56 = vld [vmem:[%s5400_s19 + $0x48] sm:$0xff] }
 0x1ce   : > { %5110 = vmatprep.mubr.msk.f32.mxu1 %vm870_vm3, %v1802_v37  ;;  %5296 = vmatprep.subr.bf16.mxu1 %v5295_v6  ;;  %v1744_v10 = vsel %vm761_vm0, %v6588_v5, %v6420_v26  ;;  %v1777_v19 = vsel %vm794_vm1, %v1745_v38, %v6552_v50  ;;  %v1747_v26 = vsel %vm761_vm0, %v6599_v36, %v6426_v27 }
 0x1cf   : > { %5111 = vmatmul.mubr.msk.f32.gmra.mrb[2].mxu1 %vm870_vm3, %v1803_v42  ;;  %v1651_v49 = vpop.permute.xlu1 %1650  ;;  %v1649_v60 = vpop.permute.xlu0 %1648  ;;  %v1776_v51 = vsel %vm794_vm1, %v1744_v10, %v6554_v23  ;;  %v1746_v50 = vsel %vm761_vm0, %v6602_v20, %v6428_v40  ;;  %v1779_v23 = vsel %vm794_vm1, %v1747_v26, %v6566_v24  ;;  %v6846_v40 = vld [vmem:[%s8095_s2] ss:$0 sm:$0xff]  ;;  %v1749_v24 = vsel %vm761_vm0, %v6613_v57, %v6434_v59  ;;  %v8394_v26 = vld [vmem:[#allocation5_spill] sm:$0xff] }
 0x1d0   : > { %v1805_v54 = vsel %vm827_vm2, %v1773_v29, %v1651_v49  ;;  %v1804_v46 = vsel %vm827_vm2, %v1772_v62, %v1649_v60  ;;  %5298 = vmatpush3.bf16.msra.mxu1 %v5295_v6  ;;  %v1778_v6 = vsel %vm794_vm1, %v1746_v50, %v6568_v25  ;;  %v1748_v42 = vsel %vm761_vm0, %v6616_v58, %v6436_v63  ;;  %v8395_v50 = vld [vmem:[#allocation10_spill] sm:$0xff] }
 0x1d1   : > { %3577 = vrot.lane.b32.xlu1 %v4796_v44, %s5355_s30  ;;  %3451 = vrot.lane.b32.xlu0 %v6557_v16, %s5354_s21  ;;  %v1781_v37 = vsel %vm794_vm1, %v1749_v24, %v6580_v2  ;;  %v1780_v52 = vsel %vm794_vm1, %v1748_v42, %v6582_v0  ;;  %v1751_v58 = vsel %vm761_vm0, %v6627_v32, %v6442_v22  ;;  %v4798_v0 = vld [vmem:[%s5400_s19 + $0x4a] sm:$0xff] }
 0x1d2   : > { %5113 = vmatprep.mubr.msk.f32.mxu1 %vm870_vm3, %v1804_v46  ;;  %v1750_v49 = vsel %vm761_vm0, %v6630_v28, %v6444_v18  ;;  %v1753_v28 = vsel %vm761_vm0, %v6641_v34, %v6450_v8  ;;  %v8391_v34 = vld [vmem:[#allocation69_spill] sm:$0xff] }
 0x1d3   : > { %5114 = vmatmul.mubr.msk.f32.gmra.mrb[4].mxu1 %vm870_vm3, %v1805_v54  ;;  %v1655_v39 = vpop.permute.xlu1 %1654  ;;  %v1653_v45 = vpop.permute.xlu0 %1652  ;;  %v1782_v22 = vsel %vm794_vm1, %v1750_v49, %v6596_v48  ;;  %v4799_v48 = vld [vmem:[%s5400_s19 + $0x52] sm:$0xff] }
 0x1d4   : > { %v1807_v31 = vsel %vm827_vm2, %v1775_v47, %v1655_v39  ;;  %v1806_v11 = vsel %vm827_vm2, %v1774_v55, %v1653_v45  ;;  %v8390_v55 = vld [vmem:[#allocation68_spill] sm:$0xff] }
 0x1d5   : > { %3579 = vrot.lane.b32.xlu1 %v4797_v15, %s5355_s30  ;;  %2612 = vrot.lane.b32.xlu0 %v6557_v16, %s5355_s30  ;;  %v1785_v39 = vsel %vm794_vm1, %v1753_v28, %v8390_v55  ;;  %v8407_v55 = vld [vmem:[#allocation12_spill] sm:$0xff] }
 0x1d6   : > { %5116 = vmatprep.mubr.msk.f32.mxu1 %vm870_vm3, %v1806_v11 }
 0x1d7   : > { %5117 = vmatmul.mubr.msk.f32.gmra.mrb[6].mxu1 %vm870_vm3, %v1807_v31  ;;  %v1659_v16 = vpop.permute.xlu1 %1658  ;;  %v1657_v33 = vpop.permute.xlu0 %1656 }
 0x1d8   : > { %v1809_v61 = vsel %vm827_vm2, %v1777_v19, %v1659_v16  ;;  %v1808_v41 = vsel %vm827_vm2, %v1776_v51, %v1657_v33  ;;  %v8392_v51 = vld [vmem:[#allocation4_spill] sm:$0xff]  ;;  %v8393_v16 = vld [vmem:[#allocation73_spill] sm:$0xff] }
 0x1d9   : > { %2486 = vrot.lane.b32.xlu1 %v6816_v56, %s5354_s21  ;;  %3325 = vrot.lane.b32.xlu0 %v4796_v44, %s5353_s20  ;;  %v1755_v33 = vsel %vm761_vm0, %v8393_v16, %v8392_v51  ;;  %v8410_v16 = vld [vmem:[#allocation64_spill] sm:$0xff] }
 0x1da   : > { %5119 = vmatprep.mubr.msk.f32.mxu1 %vm870_vm3, %v1808_v41  ;;  %v6930_v41 = vld [vmem:[%s5400_s19 + $0x60] sm:$0xff] }
 0x1db   : > { %5120 = vmatmul.mubr.msk.f32.gmra.mrb[8].mxu1 %vm870_vm3, %v1809_v61  ;;  %v1663_v21 = vpop.permute.xlu1 %1662  ;;  %v1661_v12 = vpop.permute.xlu0 %1660 }
 0x1dc   : > { %v1811_v27 = vsel %vm827_vm2, %v1779_v23, %v1663_v21  ;;  %v1810_v13 = vsel %vm827_vm2, %v1778_v6, %v1661_v12  ;;  %v1754_v23 = vsel %vm761_vm0, %v8395_v50, %v8394_v26  ;;  %v8396_v6 = vld [vmem:[#allocation8_spill] sm:$0xff]  ;;  %v4800_v50 = vld [vmem:[%s5400_s19 + $0x62] sm:$0xff] }
 0x1dd   : > { %3453 = vrot.lane.b32.xlu1 %v6574_v35, %s5354_s21  ;;  %3327 = vrot.lane.b32.xlu0 %v4797_v15, %s5353_s20  ;;  %v8389_v15 = vld [vmem:[#allocation39_spill] sm:$0xff]  ;;  %v1787_v21 = vsel %vm794_vm1, %v1755_v33, %v8396_v6  ;;  %v8411_v33 = vld [vmem:[#allocation2_spill] sm:$0xff] }
 0x1de   : > { %v5053_v25 = vpop.f32.mrb[0].mxu0  ;;  %5122 = vmatprep.mubr.msk.f32.mxu1 %vm870_vm3, %v1810_v13  ;;  %v1752_v47 = vsel %vm761_vm0, %v8389_v15, %v6452_v9  ;;  %v8397_v13 = vld [vmem:[#allocation9_spill] sm:$0xff]  ;;  %v6975_v15 = vld [vmem:[%s5400_s19 + $0x68] sm:$0xff] }
 0x1df   : > { %v1039_v57 = vadd.f32 %v5053_v25, %v6846_v40  ;;  %v1033_v59 = vpop.f32.mrb[1].mxu0  ;;  %5123 = vmatmul.mubr.msk.f32.gmra.mrb[10].mxu1 %vm870_vm3, %v1811_v27  ;;  %v1667_v43 = vpop.permute.xlu1 %1666  ;;  %v1784_v11 = vsel %vm794_vm1, %v1752_v47, %v8391_v34  ;;  %v1786_v24 = vsel %vm794_vm1, %v1754_v23, %v8397_v13  ;;  %v8406_v47 = vld [vmem:[#allocation19_spill] sm:$0xff]  ;;  %v8412_v23 = vld [vmem:[#allocation65_spill] sm:$0xff] }
 0x1e0   : > { %v1034_v44 = vadd.f32 %v6846_v40, %v1033_v59  ;;  %v1813_v29 = vsel %vm827_vm2, %v1781_v37, %v1667_v43  ;;  %v1665_v62 = vpop.permute.xlu0 %1664  ;;  %v8398_v59 = vld [vmem:[#allocation34_spill] sm:$0xff]  ;;  %v8399_v43 = vld [vmem:[#allocation24_spill] sm:$0xff]  ;;  %v8413_v6 = vld [vmem:[#allocation3_spill] sm:$0xff] }
 0x1e1   : > { %1193 = vst [vmem:[%s6857_s17 + $0x8] sm:$0xff] %v1039_v57  ;;  %v1812_v63 = vsel %vm827_vm2, %v1780_v52, %v1665_v62  ;;  %2614 = vrot.lane.b32.xlu1 %v6574_v35, %s5355_s30  ;;  %2488 = vrot.lane.b32.xlu0 %v6861_v17, %s5354_s21  ;;  %v1783_v35 = vsel %vm794_vm1, %v1751_v58, %v6594_v14  ;;  %v8401_v62 = vld [vmem:[#allocation41_spill] sm:$0xff]  ;;  %v8402_v58 = vld [vmem:[#allocation38_spill] sm:$0xff] }
 0x1e2   : > { %1192 = vst [vmem:[%s6857_s17] sm:$0xff] %v1034_v44  ;;  %v5056_v2 = vpop.f32.mrb[2].mxu0  ;;  %5125 = vmatprep.mubr.msk.f32.mxu1 %vm870_vm3, %v1812_v63  ;;  %v1757_v52 = vsel %vm761_vm0, %v8399_v43, %v8398_v59  ;;  %v8416_v43 = vld [vmem:[#allocation6_spill] sm:$0xff] }
 0x1e3   : > { %v1049_v60 = vadd.f32 %v5056_v2, %v6846_v40  ;;  %v1043_v54 = vpop.f32.mrb[3].mxu0  ;;  %5126 = vmatmul.mubr.msk.f32.gmra.mrb[12].mxu1 %vm870_vm3, %v1813_v29  ;;  %v1671_v32 = vpop.permute.xlu1 %1670  ;;  %v8400_v29 = vld [vmem:[#allocation18_spill] sm:$0xff]  ;;  %v1789_v2 = vsel %vm794_vm1, %v1757_v52, %v8402_v58  ;;  %v8417_v52 = vld [vmem:[#allocation32_spill] sm:$0xff] }
 0x1e4   : > { %v1044_v46 = vadd.f32 %v6846_v40, %v1043_v54  ;;  %v1815_v3 = vsel %vm827_vm2, %v1783_v35, %v1671_v32  ;;  %v1669_v53 = vpop.permute.xlu0 %1668  ;;  %v1756_v63 = vsel %vm761_vm0, %v8401_v62, %v8400_v29  ;;  %v4801_v62 = vld [vmem:[%s5400_s19 + $0x6a] sm:$0xff] }
 0x1e5   : > { %1195 = vst [vmem:[%s6857_s17 + $0x18] sm:$0xff] %v1049_v60  ;;  %v1814_v18 = vsel %vm827_vm2, %v1782_v22, %v1669_v53  ;;  %3581 = vrot.lane.b32.xlu1 %v4798_v0, %s5355_s30  ;;  %3455 = vrot.lane.b32.xlu0 %v6571_v1, %s5354_s21  ;;  %v8403_v60 = vld [vmem:[#allocation22_spill] sm:$0xff]  ;;  %v8404_v53 = vld [vmem:[#allocation35_spill] sm:$0xff]  ;;  %v8419_v58 = vld [vmem:[#allocation16_spill] sm:$0xff] }
 0x1e6   : > { %1194 = vst [vmem:[%s6857_s17 + $0x10] sm:$0xff] %v1044_v46  ;;  %v5059_v14 = vpop.f32.mrb[4].mxu0  ;;  %5128 = vmatprep.mubr.msk.f32.mxu1 %vm870_vm3, %v1814_v18  ;;  %v1788_v54 = vsel %vm794_vm1, %v1756_v63, %v8403_v60  ;;  %v8405_v18 = vld [vmem:[#allocation77_spill] sm:$0xff]  ;;  %v8418_v63 = vld [vmem:[#allocation7_spill] sm:$0xff] }
 0x1e7   : > { %v1059_v45 = vadd.f32 %v5059_v14, %v6846_v40  ;;  %v1053_v31 = vpop.f32.mrb[5].mxu0  ;;  %5129 = vmatmul.mubr.msk.f32.gmra.mrb[14].mxu1 %vm870_vm3, %v1815_v3  ;;  %v1675_v8 = vpop.permute.xlu1 %1674  ;;  %v1759_v28 = vsel %vm761_vm0, %v8405_v18, %v8404_v53 }
 0x1e8   : > { %v1054_v38 = vadd.f32 %v6846_v40, %v1053_v31  ;;  %v1817_v10 = vsel %vm827_vm2, %v1785_v39, %v1675_v8  ;;  %v1673_v19 = vpop.permute.xlu0 %1672  ;;  %v1758_v39 = vsel %vm761_vm0, %v8407_v55, %v8406_v47 }
 0x1e9   : > { %1197 = vst [vmem:[%s6857_s17 + $0x28] sm:$0xff] %v1059_v45  ;;  %v1816_v9 = vsel %vm827_vm2, %v1784_v11, %v1673_v19  ;;  %3583 = vrot.lane.b32.xlu1 %v4799_v48, %s5355_s30  ;;  %2616 = vrot.lane.b32.xlu0 %v6571_v1, %s5355_s30  ;;  %v8408_v45 = vld [vmem:[#allocation23_spill] sm:$0xff]  ;;  %v8409_v11 = vld [vmem:[#allocation72_spill] sm:$0xff] }
 0x1ea   : > { %1196 = vst [vmem:[%s6857_s17 + $0x20] sm:$0xff] %v1054_v38  ;;  %v5062_v61 = vpop.f32.mrb[6].mxu0  ;;  %5131 = vmatprep.mubr.msk.f32.mxu1 %vm870_vm3, %v1816_v9  ;;  %v1791_v31 = vsel %vm794_vm1, %v1759_v28, %v8408_v45  ;;  %v1790_v38 = vsel %vm794_vm1, %v1758_v39, %v8409_v11  ;;  %v8422_v28 = vld [vmem:[#allocation36_spill] sm:$0xff]  ;;  %v7044_v39 = vld [vmem:[%s5400_s19 + $0x78] sm:$0xff] }
 0x1eb   : > { %v1069_v1 = vadd.f32 %v5062_v61, %v6846_v40  ;;  %v1063_v12 = vpop.f32.mrb[7].mxu0  ;;  %5132 = vmatmul.mubr.msk.f32.gmra.mrb[16].mxu1 %vm870_vm3, %v1817_v10  ;;  %v1679_v27 = vpop.permute.xlu1 %1678  ;;  %v1761_v61 = vsel %vm761_vm0, %v8411_v33, %v8410_v16  ;;  %v8424_v45 = vld [vmem:[#allocation20_spill] sm:$0xff] }
 0x1ec   : > { %v1064_v25 = vadd.f32 %v6846_v40, %v1063_v12  ;;  %v1819_v42 = vsel %vm827_vm2, %v1787_v21, %v1679_v27  ;;  %v1677_v37 = vpop.permute.xlu0 %1676  ;;  %v1760_v21 = vsel %vm761_vm0, %v8413_v6, %v8412_v23 }
 0x1ed   : > { %1199 = vst [vmem:[%s6857_s17 + $0x38] sm:$0xff] %v1069_v1  ;;  %v1818_v57 = vsel %vm827_vm2, %v1786_v24, %v1677_v37  ;;  %2490 = vrot.lane.b32.xlu1 %v6930_v41, %s5354_s21  ;;  %3329 = vrot.lane.b32.xlu0 %v4798_v0, %s5353_s20  ;;  %v8414_v1 = vld [vmem:[#allocation11_spill] sm:$0xff]  ;;  %v8415_v24 = vld [vmem:[#allocation40_spill] sm:$0xff] }
 0x1ee   : > { %1198 = vst [vmem:[%s6857_s17 + $0x30] sm:$0xff] %v1064_v25  ;;  %v5065_v44 = vpop.f32.mrb[8].mxu0  ;;  %5134 = vmatprep.mubr.msk.f32.mxu1 %vm870_vm3, %v1818_v57  ;;  %v1792_v25 = vsel %vm794_vm1, %v1760_v21, %v8415_v24  ;;  %v8430_v21 = vld [vmem:[#allocation21_spill] sm:$0xff] }
 0x1ef   : > { %v1079_v49 = vadd.f32 %v5065_v44, %v6846_v40  ;;  %v1073_v0 = vpop.f32.mrb[9].mxu0  ;;  %5135 = vmatmul.mubr.msk.f32.gmra.mrb[18].mxu1 %vm870_vm3, %v1819_v42  ;;  %v1683_v35 = vpop.permute.xlu1 %1682  ;;  %v1763_v44 = vsel %vm761_vm0, %v8417_v52, %v8416_v43 }
 0x1f0   : > { %v1074_v32 = vadd.f32 %v6846_v40, %v1073_v0  ;;  %v1821_v22 = vsel %vm827_vm2, %v1789_v2, %v1683_v35  ;;  %v1681_v46 = vpop.permute.xlu0 %1680  ;;  %v1762_v2 = vsel %vm761_vm0, %v8419_v58, %v8418_v63 }
 0x1f1   : > { %1201 = vst [vmem:[%s6857_s17 + $0x48] sm:$0xff] %v1079_v49  ;;  %v1820_v3 = vsel %vm827_vm2, %v1788_v54, %v1681_v46  ;;  %3457 = vrot.lane.b32.xlu1 %v6588_v5, %s5354_s21  ;;  %3331 = vrot.lane.b32.xlu0 %v4799_v48, %s5353_s20  ;;  %v8420_v49 = vld [vmem:[#allocation25_spill] sm:$0xff] }
 0x1f2   : > { %1200 = vst [vmem:[%s6857_s17 + $0x40] sm:$0xff] %v1074_v32  ;;  %v5068_v14 = vpop.f32.mrb[10].mxu0  ;;  %5137 = vmatprep.mubr.msk.f32.mxu1 %vm870_vm3, %v1820_v3  ;;  %v1795_v0 = vsel %vm794_vm1, %v1763_v44, %v8420_v49  ;;  %v8421_v32 = vld [vmem:[#allocation76_spill] sm:$0xff]  ;;  %v7086_v44 = vld [vmem:[%s5400_s19 + $0x80] sm:$0xff] }
 0x1f3   : > { %v1089_v48 = vadd.f32 %v5068_v14, %v6846_v40  ;;  %v1083_v8 = vpop.f32.mrb[11].mxu0  ;;  %5138 = vmatmul.mubr.msk.f32.gmra.mrb[20].mxu1 %vm870_vm3, %v1821_v22  ;;  %v1687_v34 = vpop.permute.xlu1 %1686  ;;  %v1794_v22 = vsel %vm794_vm1, %v1762_v2, %v8421_v32  ;;  %v8423_v14 = vld [vmem:[#allocation33_spill] sm:$0xff] }
 0x1f4   : > { %v1084_v10 = vadd.f32 %v6846_v40, %v1083_v8  ;;  %v1823_v19 = vsel %vm827_vm2, %v1791_v31, %v1687_v34  ;;  %v1685_v9 = vpop.permute.xlu0 %1684  ;;  %v1765_v47 = vsel %vm761_vm0, %v8423_v14, %v8422_v28  ;;  %v8425_v31 = vld [vmem:[#allocation17_spill] sm:$0xff] }
 0x1f5   : > { %1203 = vst [vmem:[%s6857_s17 + $0x58] sm:$0xff] %v1089_v48  ;;  %v1822_v51 = vsel %vm827_vm2, %v1790_v38, %v1685_v9  ;;  %2618 = vrot.lane.b32.xlu1 %v6588_v5, %s5355_s30  ;;  %2492 = vrot.lane.b32.xlu0 %v6975_v15, %s5354_s21  ;;  %v1793_v5 = vsel %vm794_vm1, %v1761_v61, %v8414_v1  ;;  %v8426_v8 = vld [vmem:[#allocation13_spill] sm:$0xff] }
 0x1f6   : > { %1202 = vst [vmem:[%s6857_s17 + $0x50] sm:$0xff] %v1084_v10  ;;  %v5071_v26 = vpop.f32.mrb[12].mxu0  ;;  %5140 = vmatprep.mubr.msk.f32.mxu1 %vm870_vm3, %v1822_v51  ;;  %v1764_v48 = vsel %vm761_vm0, %v8425_v31, %v8424_v45  ;;  %v1797_v34 = vsel %vm794_vm1, %v1765_v47, %v8426_v8  ;;  %v8427_v10 = vld [vmem:[#allocation42_spill] sm:$0xff]  ;;  %v8428_v61 = vld [vmem:[#allocation37_spill] sm:$0xff] }
 0x1f7   : > { %v1099_v12 = vadd.f32 %v5071_v26, %v6846_v40  ;;  %v1093_v27 = vpop.f32.mrb[13].mxu0  ;;  %5141 = vmatmul.mubr.msk.f32.gmra.mrb[22].mxu1 %vm870_vm3, %v1823_v19  ;;  %v1691_v13 = vpop.permute.xlu1 %1690  ;;  %v1796_v19 = vsel %vm794_vm1, %v1764_v48, %v8427_v10  ;;  %v8429_v26 = vld [vmem:[#allocation60_spill] sm:$0xff]  ;;  %v8431_v1 = vld [vmem:[#allocation61_spill] sm:$0xff] }
 0x1f8   : > { %v1094_v42 = vadd.f32 %v6846_v40, %v1093_v27  ;;  %v1825_v37 = vsel %vm827_vm2, %v1793_v5, %v1691_v13  ;;  %v1689_v57 = vpop.permute.xlu0 %1688  ;;  %v1767_v23 = vsel %vm761_vm0, %v8429_v26, %v8428_v61  ;;  %v1766_v5 = vsel %vm761_vm0, %v8431_v1, %v8430_v21  ;;  %v4804_v1 = vld [vmem:[%s5400_s19 + $0x92] sm:$0xff] }
 0x1f9   : > { %1205 = vst [vmem:[%s6857_s17 + $0x68] sm:$0xff] %v1099_v12  ;;  %v1824_v59 = vsel %vm827_vm2, %v1792_v25, %v1689_v57  ;;  %3585 = vrot.lane.b32.xlu1 %v4800_v50, %s5355_s30  ;;  %3459 = vrot.lane.b32.xlu0 %v6585_v4, %s5354_s21  ;;  %v8432_v12 = vld [vmem:[#allocation26_spill] sm:$0xff]  ;;  %v8433_v25 = vld [vmem:[#allocation43_spill] sm:$0xff] }
 0x1fa   : > { %1204 = vst [vmem:[%s6857_s17 + $0x60] sm:$0xff] %v1094_v42  ;;  %v5074_v29 = vpop.f32.mrb[14].mxu0  ;;  %5143 = vmatprep.mubr.msk.f32.mxu1 %vm870_vm3, %v1824_v59  ;;  %v1799_v27 = vsel %vm794_vm1, %v1767_v23, %v8432_v12  ;;  %v1798_v42 = vsel %vm794_vm1, %v1766_v5, %v8433_v25  ;;  %v7173_v5 = vld [vmem:[%s5400_s19 + $0x99] sm:$0xff]  ;;  %v7193_v25 = vld [vmem:[%s5400_s19 + $0xa8] sm:$0xff] }
 0x1fb   : > { %v1109_v35 = vadd.f32 %v5074_v29, %v6846_v40  ;;  %v1103_v60 = vpop.f32.mrb[15].mxu0  ;;  %5144 = vmatmul.mubr.msk.f32.gmra.mrb[24].mxu1 %vm870_vm3, %v1825_v37  ;;  %v1695_v54 = vpop.permute.xlu1 %1694 }
 0x1fc   : > { %v1104_v46 = vadd.f32 %v6846_v40, %v1103_v60  ;;  %v1827_v3 = vsel %vm827_vm2, %v1795_v0, %v1695_v54  ;;  %v1693_v53 = vpop.permute.xlu0 %1692  ;;  %v4802_v0 = vld [vmem:[%s5400_s19 + $0x7a] sm:$0xff] }
 0x1fd   : > { %1207 = vst [vmem:[%s6857_s17 + $0x78] sm:$0xff] %v1109_v35  ;;  %v1826_v18 = vsel %vm827_vm2, %v1794_v22, %v1693_v53  ;;  %3587 = vrot.lane.b32.xlu1 %v4801_v62, %s5355_s30  ;;  %2620 = vrot.lane.b32.xlu0 %v6585_v4, %s5355_s30 }
 0x1fe   : > { %1206 = vst [vmem:[%s6857_s17 + $0x70] sm:$0xff] %v1104_v46  ;;  %v5077_v55 = vpop.f32.mrb[16].mxu0  ;;  %5146 = vmatprep.mubr.msk.f32.mxu1 %vm870_vm3, %v1826_v18  ;;  %v4803_v46 = vld [vmem:[%s5400_s19 + $0x82] sm:$0xff] }
 0x1ff   : > { %v1119_v4 = vadd.f32 %v5077_v55, %v6846_v40  ;;  %v1113_v11 = vpop.f32.mrb[17].mxu0  ;;  %5147 = vmatmul.mubr.msk.f32.gmra.mrb[26].mxu1 %vm870_vm3, %v1827_v3  ;;  %v1699_v38 = vpop.permute.xlu1 %1698  ;;  %v7115_v3 = vld [vmem:[%s5400_s19 + $0x81] sm:$0xff]  ;;  %v7129_v55 = vld [vmem:[%s5400_s19 + $0x90] sm:$0xff] }
 0x200   : > { %v1114_v9 = vadd.f32 %v6846_v40, %v1113_v11  ;;  %v1829_v51 = vsel %vm827_vm2, %v1797_v34, %v1699_v38  ;;  %v1697_v16 = vpop.permute.xlu0 %1696  ;;  %v7143_v11 = vld [vmem:[%s5400_s19 + $0x91] sm:$0xff] }
 0x201   : > { %1209 = vst [vmem:[%s6857_s17 + $0x88] sm:$0xff] %v1119_v4  ;;  %v1828_v33 = vsel %vm827_vm2, %v1796_v19, %v1697_v16  ;;  %2494 = vrot.lane.b32.xlu1 %v7044_v39, %s5354_s21  ;;  %3333 = vrot.lane.b32.xlu0 %v4800_v50, %s5353_s20 }
 0x202   : > { %1208 = vst [vmem:[%s6857_s17 + $0x80] sm:$0xff] %v1114_v9  ;;  %v5080_v6 = vpop.f32.mrb[18].mxu0  ;;  %5149 = vmatprep.mubr.msk.f32.mxu1 %vm870_vm3, %v1828_v33  ;;  %v7157_v33 = vld [vmem:[%s5400_s19 + $0x98] sm:$0xff] }
 0x203   : > { %v1129_v13 = vadd.f32 %v5080_v6, %v6846_v40  ;;  %v1123_v50 = vpop.f32.mrb[19].mxu0  ;;  %5150 = vmatmul.mubr.msk.f32.gmra.mrb[28].mxu1 %vm870_vm3, %v1829_v51  ;;  %v1703_v24 = vpop.permute.xlu1 %1702 }
 0x204   : > { %v1124_v37 = vadd.f32 %v6846_v40, %v1123_v50  ;;  %v1831_v57 = vsel %vm827_vm2, %v1799_v27, %v1703_v24  ;;  %v1701_v59 = vpop.permute.xlu0 %1700 }
 0x205   : > { %1211 = vst [vmem:[%s6857_s17 + $0x98] sm:$0xff] %v1129_v13  ;;  %v1830_v43 = vsel %vm827_vm2, %v1798_v42, %v1701_v59  ;;  %3461 = vrot.lane.b32.xlu1 %v6602_v20, %s5354_s21  ;;  %3335 = vrot.lane.b32.xlu0 %v4801_v62, %s5353_s20 }
 0x206   : > { %1210 = vst [vmem:[%s6857_s17 + $0x90] sm:$0xff] %v1124_v37  ;;  %v5083_v52 = vpop.f32.mrb[20].mxu0  ;;  %5152 = vmatprep.mubr.msk.f32.mxu1 %vm870_vm3, %v1830_v43  ;;  %v7201_v37 = vld [vmem:[%s5400_s19 + $0xa9] sm:$0xff] }
 0x207   : > { %v1139_v29 = vadd.f32 %v5083_v52, %v6846_v40  ;;  %v1133_v63 = vpop.f32.mrb[21].mxu0  ;;  %5153 = vmatmul.mubr.msk.f32.gmra.mrb[30].mxu1 %vm870_vm3, %v1831_v57  ;;  %v7090_v58 = vpop.permute.xlu1 %2356  ;;  %v7213_v52 = vld [vmem:[%s5400_s19 + $0xb0] sm:$0xff] }
 0x208   : > { %v1134_v2 = vadd.f32 %v6846_v40, %v1133_v63  ;;  %v7093_v49 = vpop.permute.xlu0 %2354  ;;  %v4806_v63 = vld [vmem:[%s5400_s19 + $0xaa] sm:$0xff] }
 0x209   : > { %1213 = vst [vmem:[%s6857_s17 + $0xa8] sm:$0xff] %v1139_v29  ;;  %2622 = vrot.lane.b32.xlu1 %v6602_v20, %s5355_s30  ;;  %2496 = vrot.lane.b32.xlu0 %v7086_v44, %s5354_s21 }
 0x20a   : > { %1212 = vst [vmem:[%s6857_s17 + $0xa0] sm:$0xff] %v1134_v2  ;;  %v5086_v62 = vpop.f32.mrb[22].mxu0  ;;  %v7223_v2 = vld [vmem:[%s5400_s19 + $0xb1] sm:$0xff] }
 0x20b   : > { %v1149_v35 = vadd.f32 %v5086_v62, %v6846_v40  ;;  %v1143_v60 = vpop.f32.mrb[23].mxu0  ;;  %v7103_v54 = vpop.permute.xlu1 %2360 }
 0x20c   : > { %v1144_v32 = vadd.f32 %v6846_v40, %v1143_v60  ;;  %v7106_v22 = vpop.permute.xlu0 %2358 }
 0x20d   : > { %1215 = vst [vmem:[%s6857_s17 + $0xb8] sm:$0xff] %v1149_v35  ;;  %3589 = vrot.lane.b32.xlu1 %v4802_v0, %s5355_s30  ;;  %3463 = vrot.lane.b32.xlu0 %v6599_v36, %s5354_s21  ;;  %v4807_v35 = vld [vmem:[%s5400_s19 + $0xb2] sm:$0xff] }
 0x20e   : > { %1214 = vst [vmem:[%s6857_s17 + $0xb0] sm:$0xff] %v1144_v32  ;;  %v5089_v20 = vpop.f32.mrb[24].mxu0 }
 0x20f   : > { %v1159_v53 = vadd.f32 %v5089_v20, %v6846_v40  ;;  %v1153_v18 = vpop.f32.mrb[25].mxu0  ;;  %v7118_v28 = vpop.permute.xlu1 %2364  ;;  %v4504_v20 = vld [vmem:[%s5400_s19 + $0x18] sm:$0xff] }
 0x210   : > { %v1154_v14 = vadd.f32 %v6846_v40, %v1153_v18  ;;  %v7121_v47 = vpop.permute.xlu0 %2362 }
 0x211   : > { %1217 = vst [vmem:[%s6857_s17 + $0xc8] sm:$0xff] %v1159_v53  ;;  %3591 = vrot.lane.b32.xlu1 %v4803_v46, %s5355_s30  ;;  %2624 = vrot.lane.b32.xlu0 %v7115_v3, %s5355_s30  ;;  %v7238_v53 = vld [vmem:[%s5400_s19 + $0xc0] sm:$0xff] }
 0x212   : > { %1216 = vst [vmem:[%s6857_s17 + $0xc0] sm:$0xff] %v1154_v14  ;;  %v5092_v36 = vpop.f32.mrb[26].mxu0  ;;  %v2706_v14 = vsel %vm761_vm0, %v4504_v20, %v7093_v49 }
 0x213   : > { %v1169_v45 = vadd.f32 %v5092_v36, %v6846_v40  ;;  %v1163_v31 = vpop.f32.mrb[27].mxu0  ;;  %v7132_v48 = vpop.permute.xlu1 %2368  ;;  %v7246_v36 = vld [vmem:[%s5400_s19 + $0xc1] sm:$0xff] }
 0x214   : > { %v1164_v8 = vadd.f32 %v6846_v40, %v1163_v31  ;;  %v7135_v34 = vpop.permute.xlu0 %2366  ;;  %v4700_v31 = vld [vmem:[%s5400_s19 + $0x19] sm:$0xff] }
 0x215   : > { %1219 = vst [vmem:[%s6857_s17 + $0xd8] sm:$0xff] %v1169_v45  ;;  %2498 = vrot.lane.b32.xlu1 %v7129_v55, %s5354_s21  ;;  %3337 = vrot.lane.b32.xlu0 %v4802_v0, %s5353_s20 }
 0x216   : > { %1218 = vst [vmem:[%s6857_s17 + $0xd0] sm:$0xff] %v1164_v8  ;;  %v5095_v4 = vpop.f32.mrb[28].mxu0 }
 0x217   : > { %v1179_v38 = vadd.f32 %v5095_v4, %v6846_v40  ;;  %v1173_v10 = vpop.f32.mrb[29].mxu0  ;;  %v7146_v19 = vpop.permute.xlu1 %2372 }
 0x218   : > { %v1174_v9 = vadd.f32 %v6846_v40, %v1173_v10  ;;  %v7149_v51 = vpop.permute.xlu0 %2370 }
 0x219   : > { %1221 = vst [vmem:[%s6857_s17 + $0xe8] sm:$0xff] %v1179_v38  ;;  %3465 = vrot.lane.b32.xlu1 %v7143_v11, %s5354_s21  ;;  %3339 = vrot.lane.b32.xlu0 %v4803_v46, %s5353_s20 }
 0x21a   : > { %1220 = vst [vmem:[%s6857_s17 + $0xe0] sm:$0xff] %v1174_v9  ;;  %v5098_v16 = vpop.f32.mrb[30].mxu0  ;;  %v4701_v9 = vld [vmem:[%s5400_s19 + $0x21] sm:$0xff] }
 0x21b   : > { %v1189_v61 = vadd.f32 %v5098_v16, %v6846_v40  ;;  %v1183_v26 = vpop.f32.mrb[31].mxu0  ;;  %v7160_v23 = vpop.permute.xlu1 %2376 }
 0x21c   : > { %v1184_v6 = vadd.f32 %v6846_v40, %v1183_v26  ;;  %v7163_v21 = vpop.permute.xlu0 %2374  ;;  %v4805_v40 = vld [vmem:[%s5400_s19 + $0x9a] sm:$0xff]  ;;  %v7260_v26 = vld [vmem:[%s5400_s19 + $0xc8] sm:$0xff] }
 0x21d   : > { %1223 = vst [vmem:[%s6857_s17 + $0xf8] sm:$0xff] %v1189_v61  ;;  %2626 = vrot.lane.b32.xlu1 %v7143_v11, %s5355_s30  ;;  %2500 = vrot.lane.b32.xlu0 %v7157_v33, %s5354_s21  ;;  %v4505_v61 = vld [vmem:[%s5400_s19 + $0x20] sm:$0xff] }
 0x21e   : > { %1222 = vst [vmem:[%s6857_s17 + $0xf0] sm:$0xff] %v1184_v6 }
 0x21f   : > { %v7175_v12 = vpop.permute.xlu1 %2380 }
 0x220   : > { %v7177_v27 = vpop.permute.xlu0 %2378 }
 0x221   : > { %3593 = vrot.lane.b32.xlu1 %v4804_v1, %s5355_s30  ;;  %3467 = vrot.lane.b32.xlu0 %v7173_v5, %s5354_s21 }
 0x223   : > { %v7183_v13 = vpop.permute.xlu1 %2384 }
 0x224   : > { %v7185_v50 = vpop.permute.xlu0 %2382 }
 0x225   : > { %3595 = vrot.lane.b32.xlu1 %v4805_v40, %s5355_s30  ;;  %2628 = vrot.lane.b32.xlu0 %v7173_v5, %s5355_s30 }
 0x227   : > { %v7190_v24 = vpop.permute.xlu1 %2388 }
 0x228   : > { %v7195_v42 = vpop.permute.xlu0 %2386 }
 0x229   : > { %2502 = vrot.lane.b32.xlu1 %v7193_v25, %s5354_s21  ;;  %3341 = vrot.lane.b32.xlu0 %v4804_v1, %s5353_s20 }
 0x22b   : > { %v7203_v57 = vpop.permute.xlu1 %2392 }
 0x22c   : > { %v7205_v59 = vpop.permute.xlu0 %2390 }
 0x22d   : > { %3469 = vrot.lane.b32.xlu1 %v7201_v37, %s5354_s21  ;;  %3343 = vrot.lane.b32.xlu0 %v4805_v40, %s5353_s20 }
 0x22f   : > { %v7210_v43 = vpop.permute.xlu1 %2396 }
 0x230   : > { %v7215_v29 = vpop.permute.xlu0 %2394 }
 0x231   : > { %2630 = vrot.lane.b32.xlu1 %v7201_v37, %s5355_s30  ;;  %2504 = vrot.lane.b32.xlu0 %v7213_v52, %s5354_s21 }
 0x233   : > { %v7225_v62 = vpop.permute.xlu1 %2400 }
 0x234   : > { %v7227_v0 = vpop.permute.xlu0 %2398 }
 0x235   : > { %3597 = vrot.lane.b32.xlu1 %v4806_v63, %s5355_s30  ;;  %3471 = vrot.lane.b32.xlu0 %v7223_v2, %s5354_s21 }
 0x237   : > { %v2483_v60 = vpop.permute.xlu1 %2482 }
 0x238   : > { %v3322_v32 = vpop.permute.xlu0 %3321  ;;  %v2738_v45 = vsel %vm794_vm1, %v2706_v14, %v2483_v60  ;;  %v2707_v60 = vsel %vm761_vm0, %v4505_v61, %v7090_v58  ;;  %v4809_v58 = vld [vmem:[%s5400_s19 + $0xca] sm:$0xff] }
 0x239   : > { %3599 = vrot.lane.b32.xlu1 %v4807_v35, %s5355_s30  ;;  %2632 = vrot.lane.b32.xlu0 %v7223_v2, %s5355_s30  ;;  %v3673_v10 = vsel %vm761_vm0, %v4700_v31, %v3322_v32  ;;  %v4702_v61 = vld [vmem:[%s5400_s19 + $0x31] sm:$0xff] }
 0x23b   : > { %v3450_v46 = vpop.permute.xlu1 %3449 }
 0x23c   : > { %v3324_v18 = vpop.permute.xlu0 %3323  ;;  %v3705_v49 = vsel %vm794_vm1, %v3673_v10, %v3450_v46 }
 0x23d   : > { %2506 = vrot.lane.b32.xlu1 %v7238_v53, %s5354_s21  ;;  %3345 = vrot.lane.b32.xlu0 %v4806_v63, %s5353_s20  ;;  %v3674_v40 = vsel %vm761_vm0, %v4701_v9, %v3324_v18  ;;  %v4808_v63 = vld [vmem:[%s5400_s19 + $0xc2] sm:$0xff]  ;;  %v7298_v9 = vld [vmem:[%s5400_s19 + $0xd9] sm:$0xff] }
 0x23f   : > { %v2611_v8 = vpop.permute.xlu1 %2610 }
 0x240   : > { %v2770_v4 = vsel %vm827_vm2, %v2738_v45, %v2611_v8  ;;  %v2485_v38 = vpop.permute.xlu0 %2484 }
 0x241   : > { %3473 = vrot.lane.b32.xlu1 %v7246_v36, %s5354_s21  ;;  %3347 = vrot.lane.b32.xlu0 %v4807_v35, %s5353_s20  ;;  %v7271_v35 = vld [vmem:[%s5400_s19 + $0xc9] sm:$0xff]  ;;  %v2739_v46 = vsel %vm794_vm1, %v2707_v60, %v2485_v38  ;;  %v7289_v38 = vld [vmem:[%s5400_s19 + $0xd8] sm:$0xff] }
 0x242   : > { %5163 = vmatprep.mubr.msk.f32.mxu0 %vm870_vm3, %v2770_v4 }
 0x243   : > { %v3578_v16 = vpop.permute.xlu1 %3577 }
 0x244   : > { %v3737_v6 = vsel %vm827_vm2, %v3705_v49, %v3578_v16  ;;  %v3452_v1 = vpop.permute.xlu0 %3451  ;;  %v2708_v49 = vsel %vm761_vm0, %v6713_v30, %v7106_v22  ;;  %v4703_v22 = vld [vmem:[%s5400_s19 + $0x39] sm:$0xff] }
 0x245   : > { %2634 = vrot.lane.b32.xlu1 %v7246_v36, %s5355_s30  ;;  %2508 = vrot.lane.b32.xlu0 %v7260_v26, %s5354_s21  ;;  %v3706_v32 = vsel %vm794_vm1, %v3674_v40, %v3452_v1 }
 0x246   : > { %5219 = vmatprep.mubr.msk.f32.mxu1 %vm870_vm3, %v3737_v6 }
 0x247   : > { %v3580_v20 = vpop.permute.xlu1 %3579 }
 0x248   : > { %v3738_v14 = vsel %vm827_vm2, %v3706_v32, %v3580_v20  ;;  %v2613_v45 = vpop.permute.xlu0 %2612  ;;  %v7311_v32 = vld [vmem:[%s5400_s19 + $0xe0] sm:$0xff] }
 0x249   : > { %v2771_v31 = vsel %vm827_vm2, %v2739_v46, %v2613_v45  ;;  %3601 = vrot.lane.b32.xlu1 %v4808_v63, %s5355_s30  ;;  %3475 = vrot.lane.b32.xlu0 %v7271_v35, %s5354_s21  ;;  %v4810_v45 = vld [vmem:[%s5400_s19 + $0xda] sm:$0xff] }
 0x24a   : > { %5164 = vmatmul.mubr.msk.f32.vlgmr.msra.gmra.mrb[32].mxu0 %vm870_vm3, %v2771_v31  ;;  %5220 = vmatmul.mubr.msk.f32.vlgmr.msra.gmra.mrb[32].mxu1 %vm870_vm3, %v3738_v14  ;;  %v7322_v31 = vld [vmem:[%s5400_s19 + $0xe1] sm:$0xff] }
 0x24b   : > { %v2487_v18 = vpop.permute.xlu1 %2486 }
 0x24c   : > { %v3326_v8 = vpop.permute.xlu0 %3325  ;;  %v2740_v16 = vsel %vm794_vm1, %v2708_v49, %v2487_v18 }
 0x24d   : > { %3603 = vrot.lane.b32.xlu1 %v4809_v58, %s5355_s30  ;;  %2636 = vrot.lane.b32.xlu0 %v7271_v35, %s5355_s30 }
 0x24f   : > { %v3454_v4 = vpop.permute.xlu1 %3453 }
 0x250   : > { %v3328_v10 = vpop.permute.xlu0 %3327 }
 0x251   : > { %2510 = vrot.lane.b32.xlu1 %v7289_v38, %s5354_s21  ;;  %3349 = vrot.lane.b32.xlu0 %v4808_v63, %s5353_s20  ;;  %v3675_v63 = vsel %vm761_vm0, %v4702_v61, %v3326_v8  ;;  %v3676_v14 = vsel %vm761_vm0, %v4703_v22, %v3328_v10 }
 0x252   : > { %v3707_v30 = vsel %vm794_vm1, %v3675_v63, %v3454_v4  ;;  %v2710_v63 = vsel %vm761_vm0, %v6816_v56, %v7121_v47  ;;  %v4705_v47 = vld [vmem:[%s5400_s19 + $0x51] sm:$0xff] }
 0x253   : > { %v2615_v6 = vpop.permute.xlu1 %2614 }
 0x254   : > { %v2772_v1 = vsel %vm827_vm2, %v2740_v16, %v2615_v6  ;;  %v2489_v40 = vpop.permute.xlu0 %2488 }
 0x255   : > { %3477 = vrot.lane.b32.xlu1 %v7298_v9, %s5354_s21  ;;  %3351 = vrot.lane.b32.xlu0 %v4809_v58, %s5353_s20  ;;  %v2709_v58 = vsel %vm761_vm0, %v6759_v7, %v7103_v54  ;;  %v4811_v7 = vld [vmem:[%s5400_s19 + $0xe2] sm:$0xff] }
 0x256   : > { %5166 = vmatprep.mubr.msk.f32.mxu0 %vm870_vm3, %v2772_v1  ;;  %v2741_v4 = vsel %vm794_vm1, %v2709_v58, %v2489_v40  ;;  %v7341_v1 = vld [vmem:[%s5400_s19 + $0xf0] sm:$0xff] }
 0x257   : > { %v3582_v60 = vpop.permute.xlu1 %3581 }
 0x258   : > { %v3739_v20 = vsel %vm827_vm2, %v3707_v30, %v3582_v60  ;;  %v3456_v46 = vpop.permute.xlu0 %3455  ;;  %v7350_v30 = vld [vmem:[%s5400_s19 + $0xf1] sm:$0xff]  ;;  %v4704_v60 = vld [vmem:[%s5400_s19 + $0x49] sm:$0xff] }
 0x259   : > { %2638 = vrot.lane.b32.xlu1 %v7298_v9, %s5355_s30  ;;  %2512 = vrot.lane.b32.xlu0 %v7311_v32, %s5354_s21  ;;  %v3708_v18 = vsel %vm794_vm1, %v3676_v14, %v3456_v46 }
 0x25a   : > { %5222 = vmatprep.mubr.msk.f32.mxu1 %vm870_vm3, %v3739_v20 }
 0x25b   : > { %v3584_v8 = vpop.permute.xlu1 %3583 }
 0x25c   : > { %v3740_v49 = vsel %vm827_vm2, %v3708_v18, %v3584_v8  ;;  %v2617_v16 = vpop.permute.xlu0 %2616  ;;  %v7363_v18 = vld [vmem:[%s5400_s19 + $0xf8] sm:$0xff] }
 0x25d   : > { %v2773_v10 = vsel %vm827_vm2, %v2741_v4, %v2617_v16  ;;  %3605 = vrot.lane.b32.xlu1 %v4810_v45, %s5355_s30  ;;  %3479 = vrot.lane.b32.xlu0 %v7322_v31, %s5354_s21  ;;  %v4812_v16 = vld [vmem:[%s5400_s19 + $0xf2] sm:$0xff] }
 0x25e   : > { %5167 = vmatmul.mubr.msk.f32.gmra.mrb[34].mxu0 %vm870_vm3, %v2773_v10  ;;  %5223 = vmatmul.mubr.msk.f32.gmra.mrb[34].mxu1 %vm870_vm3, %v3740_v49  ;;  %v7374_v10 = vld [vmem:[%s5400_s19 + $0xf9] sm:$0xff] }
 0x25f   : > { %v2491_v54 = vpop.permute.xlu1 %2490 }
 0x260   : > { %v3330_v61 = vpop.permute.xlu0 %3329  ;;  %v2742_v22 = vsel %vm794_vm1, %v2710_v63, %v2491_v54 }
 0x261   : > { %3607 = vrot.lane.b32.xlu1 %v4811_v7, %s5355_s30  ;;  %2640 = vrot.lane.b32.xlu0 %v7322_v31, %s5355_s30 }
 0x263   : > { %v3458_v6 = vpop.permute.xlu1 %3457 }
 0x264   : > { %v3332_v40 = vpop.permute.xlu0 %3331 }
 0x265   : > { %2514 = vrot.lane.b32.xlu1 %v7341_v1, %s5354_s21  ;;  %3353 = vrot.lane.b32.xlu0 %v4810_v45, %s5353_s20  ;;  %v3677_v45 = vsel %vm761_vm0, %v4704_v60, %v3330_v61  ;;  %v3678_v49 = vsel %vm761_vm0, %v4705_v47, %v3332_v40 }
 0x266   : > { %v3709_v56 = vsel %vm794_vm1, %v3677_v45, %v3458_v6  ;;  %v2712_v45 = vsel %vm761_vm0, %v6930_v41, %v7135_v34  ;;  %v4707_v34 = vld [vmem:[%s5400_s19 + $0x69] sm:$0xff] }
 0x267   : > { %v2619_v20 = vpop.permute.xlu1 %2618 }
 0x268   : > { %v2774_v46 = vsel %vm827_vm2, %v2742_v22, %v2619_v20  ;;  %v2493_v14 = vpop.permute.xlu0 %2492 }
 0x269   : > { %3481 = vrot.lane.b32.xlu1 %v7350_v30, %s5354_s21  ;;  %3355 = vrot.lane.b32.xlu0 %v4811_v7, %s5353_s20  ;;  %v2711_v7 = vsel %vm761_vm0, %v6861_v17, %v7118_v28  ;;  %v4813_v17 = vld [vmem:[%s5400_s19 + $0xfa] sm:$0xff] }
 0x26a   : > { %5169 = vmatprep.mubr.msk.f32.mxu0 %vm870_vm3, %v2774_v46  ;;  %v2743_v6 = vsel %vm794_vm1, %v2711_v7, %v2493_v14  ;;  %v7393_v46 = vld [vmem:[%s5400_s19 + $0x108] sm:$0xff] }
 0x26b   : > { %v3586_v58 = vpop.permute.xlu1 %3585 }
 0x26c   : > { %v3741_v8 = vsel %vm827_vm2, %v3709_v56, %v3586_v58  ;;  %v3460_v4 = vpop.permute.xlu0 %3459  ;;  %v7402_v56 = vld [vmem:[%s5400_s19 + $0x109] sm:$0xff]  ;;  %v4706_v58 = vld [vmem:[%s5400_s19 + $0x61] sm:$0xff] }
 0x26d   : > { %2642 = vrot.lane.b32.xlu1 %v7350_v30, %s5355_s30  ;;  %2516 = vrot.lane.b32.xlu0 %v7363_v18, %s5354_s21  ;;  %v3710_v54 = vsel %vm794_vm1, %v3678_v49, %v3460_v4 }
 0x26e   : > { %5225 = vmatprep.mubr.msk.f32.mxu1 %vm870_vm3, %v3741_v8 }
 0x26f   : > { %v3588_v61 = vpop.permute.xlu1 %3587 }
 0x270   : > { %v3742_v63 = vsel %vm827_vm2, %v3710_v54, %v3588_v61  ;;  %v2621_v22 = vpop.permute.xlu0 %2620  ;;  %v7415_v54 = vld [vmem:[%s5400_s19 + $0x110] sm:$0xff] }
 0x271   : > { %v2775_v40 = vsel %vm827_vm2, %v2743_v6, %v2621_v22  ;;  %3609 = vrot.lane.b32.xlu1 %v4812_v16, %s5355_s30  ;;  %3483 = vrot.lane.b32.xlu0 %v7374_v10, %s5354_s21  ;;  %v4814_v22 = vld [vmem:[%s5400_s19 + $0x10a] sm:$0xff] }
 0x272   : > { %5170 = vmatmul.mubr.msk.f32.gmra.mrb[36].mxu0 %vm870_vm3, %v2775_v40  ;;  %5226 = vmatmul.mubr.msk.f32.gmra.mrb[36].mxu1 %vm870_vm3, %v3742_v63  ;;  %v7426_v40 = vld [vmem:[%s5400_s19 + $0x111] sm:$0xff] }
 0x273   : > { %v2495_v28 = vpop.permute.xlu1 %2494 }
 0x274   : > { %v3334_v60 = vpop.permute.xlu0 %3333  ;;  %v2744_v47 = vsel %vm794_vm1, %v2712_v45, %v2495_v28 }
 0x275   : > { %3611 = vrot.lane.b32.xlu1 %v4813_v17, %s5355_s30  ;;  %2644 = vrot.lane.b32.xlu0 %v7374_v10, %s5355_s30 }
 0x277   : > { %v3462_v20 = vpop.permute.xlu1 %3461 }
 0x278   : > { %v3336_v14 = vpop.permute.xlu0 %3335 }
 0x279   : > { %2518 = vrot.lane.b32.xlu1 %v7393_v46, %s5354_s21  ;;  %3357 = vrot.lane.b32.xlu0 %v4812_v16, %s5353_s20  ;;  %v3679_v16 = vsel %vm761_vm0, %v4706_v58, %v3334_v60  ;;  %v3680_v63 = vsel %vm761_vm0, %v4707_v34, %v3336_v14 }
 0x27a   : > { %v3711_v41 = vsel %vm794_vm1, %v3679_v16, %v3462_v20  ;;  %v2714_v16 = vsel %vm761_vm0, %v7044_v39, %v7149_v51 }
 0x27b   : > { %v2623_v8 = vpop.permute.xlu1 %2622 }
 0x27c   : > { %v2776_v4 = vsel %vm827_vm2, %v2744_v47, %v2623_v8  ;;  %v2497_v49 = vpop.permute.xlu0 %2496 }
 0x27d   : > { %3485 = vrot.lane.b32.xlu1 %v7402_v56, %s5354_s21  ;;  %3359 = vrot.lane.b32.xlu0 %v4813_v17, %s5353_s20  ;;  %v2713_v17 = vsel %vm761_vm0, %v6975_v15, %v7132_v48  ;;  %v4815_v15 = vld [vmem:[%s5400_s19 + $0x112] sm:$0xff] }
 0x27e   : > { %5172 = vmatprep.mubr.msk.f32.mxu0 %vm870_vm3, %v2776_v4  ;;  %v2745_v20 = vsel %vm794_vm1, %v2713_v17, %v2497_v49  ;;  %v7445_v4 = vld [vmem:[%s5400_s19 + $0x120] sm:$0xff]  ;;  %v7466_v17 = vld [vmem:[%s5400_s19 + $0x128] sm:$0xff] }
 0x27f   : > { %v3590_v7 = vpop.permute.xlu1 %3589 }
 0x280   : > { %v3743_v61 = vsel %vm827_vm2, %v3711_v41, %v3590_v7  ;;  %v3464_v6 = vpop.permute.xlu0 %3463  ;;  %v7454_v41 = vld [vmem:[%s5400_s19 + $0x121] sm:$0xff]  ;;  %v4708_v7 = vld [vmem:[%s5400_s19 + $0x79] sm:$0xff] }
 0x281   : > { %2646 = vrot.lane.b32.xlu1 %v7402_v56, %s5355_s30  ;;  %2520 = vrot.lane.b32.xlu0 %v7415_v54, %s5354_s21  ;;  %v3712_v28 = vsel %vm794_vm1, %v3680_v63, %v3464_v6 }
 0x282   : > { %5228 = vmatprep.mubr.msk.f32.mxu1 %vm870_vm3, %v3743_v61 }
 0x283   : > { %v3592_v60 = vpop.permute.xlu1 %3591 }
 0x284   : > { %v3744_v45 = vsel %vm827_vm2, %v3712_v28, %v3592_v60  ;;  %v2625_v47 = vpop.permute.xlu0 %2624 }
 0x285   : > { %v2777_v14 = vsel %vm827_vm2, %v2745_v20, %v2625_v47  ;;  %3613 = vrot.lane.b32.xlu1 %v4814_v22, %s5355_s30  ;;  %3487 = vrot.lane.b32.xlu0 %v7426_v40, %s5354_s21  ;;  %v7478_v47 = vld [vmem:[%s5400_s19 + $0x129] sm:$0xff] }
 0x286   : > { %5173 = vmatmul.mubr.msk.f32.gmra.mrb[38].mxu0 %vm870_vm3, %v2777_v14  ;;  %5229 = vmatmul.mubr.msk.f32.gmra.mrb[38].mxu1 %vm870_vm3, %v3744_v45  ;;  %v4816_v45 = vld [vmem:[%s5400_s19 + $0x122] sm:$0xff]  ;;  %v2715_v14 = vsel %vm761_vm0, %v7086_v44, %v7146_v19  ;;  %v4817_v44 = vld [vmem:[%s5400_s19 + $0x12a] sm:$0xff] }
 0x287   : > { %v2499_v48 = vpop.permute.xlu1 %2498 }
 0x288   : > { %v3338_v58 = vpop.permute.xlu0 %3337  ;;  %v2746_v34 = vsel %vm794_vm1, %v2714_v16, %v2499_v48 }
 0x289   : > { %3615 = vrot.lane.b32.xlu1 %v4815_v15, %s5355_s30  ;;  %2648 = vrot.lane.b32.xlu0 %v7426_v40, %s5355_s30 }
 0x28b   : > { %v3466_v8 = vpop.permute.xlu1 %3465 }
 0x28c   : > { %v3340_v49 = vpop.permute.xlu0 %3339 }
 0x28d   : > { %2522 = vrot.lane.b32.xlu1 %v7445_v4, %s5354_s21  ;;  %3361 = vrot.lane.b32.xlu0 %v4814_v22, %s5353_s20  ;;  %v3681_v22 = vsel %vm761_vm0, %v4708_v7, %v3338_v58  ;;  %v3682_v20 = vsel %vm761_vm0, %v7115_v3, %v3340_v49  ;;  %v7497_v7 = vld [vmem:[%s5400_s19 + $0x138] sm:$0xff] }
 0x28e   : > { %v3713_v39 = vsel %vm794_vm1, %v3681_v22, %v3466_v8 }
 0x28f   : > { %v2627_v61 = vpop.permute.xlu1 %2626 }
 0x290   : > { %v2778_v6 = vsel %vm827_vm2, %v2746_v34, %v2627_v61  ;;  %v2501_v63 = vpop.permute.xlu0 %2500  ;;  %v7502_v61 = vld [vmem:[%s8095_s2] ss:$0 sm:$0xff] }
 0x291   : > { %3489 = vrot.lane.b32.xlu1 %v7454_v41, %s5354_s21  ;;  %3363 = vrot.lane.b32.xlu0 %v4815_v15, %s5353_s20  ;;  %v2747_v58 = vsel %vm794_vm1, %v2715_v14, %v2501_v63 }
 0x292   : > { %5175 = vmatprep.mubr.msk.f32.mxu0 %vm870_vm3, %v2778_v6 }
 0x293   : > { %v3594_v51 = vpop.permute.xlu1 %3593 }
 0x294   : > { %v3745_v28 = vsel %vm827_vm2, %v3713_v39, %v3594_v51  ;;  %v3468_v60 = vpop.permute.xlu0 %3467 }
 0x295   : > { %2650 = vrot.lane.b32.xlu1 %v7454_v41, %s5355_s30  ;;  %2524 = vrot.lane.b32.xlu0 %v7466_v17, %s5354_s21  ;;  %v3714_v15 = vsel %vm794_vm1, %v3682_v20, %v3468_v60  ;;  %v7515_v20 = vld [vmem:[%s5400_s19 + $0x139] sm:$0xff] }
 0x296   : > { %5231 = vmatprep.mubr.msk.f32.mxu1 %vm870_vm3, %v3745_v28  ;;  %v2716_v28 = vsel %vm761_vm0, %v7129_v55, %v7163_v21 }
 0x297   : > { %v3596_v48 = vpop.permute.xlu1 %3595 }
 0x298   : > { %v3746_v8 = vsel %vm827_vm2, %v3714_v15, %v3596_v48  ;;  %v2629_v16 = vpop.permute.xlu0 %2628 }
 0x299   : > { %v2779_v3 = vsel %vm827_vm2, %v2747_v58, %v2629_v16  ;;  %3617 = vrot.lane.b32.xlu1 %v4816_v45, %s5355_s30  ;;  %3491 = vrot.lane.b32.xlu0 %v7478_v47, %s5354_s21 }
 0x29a   : > { %5176 = vmatmul.mubr.msk.f32.gmra.mrb[40].mxu0 %vm870_vm3, %v2779_v3  ;;  %5232 = vmatmul.mubr.msk.f32.gmra.mrb[40].mxu1 %vm870_vm3, %v3746_v8  ;;  %v7530_v3 = vld [vmem:[%s5400_s19 + $0x140] sm:$0xff] }
 0x29b   : > { %v2503_v19 = vpop.permute.xlu1 %2502 }
 0x29c   : > { %v3342_v49 = vpop.permute.xlu0 %3341  ;;  %v2748_v14 = vsel %vm794_vm1, %v2716_v28, %v2503_v19  ;;  %v4818_v28 = vld [vmem:[%s5400_s19 + $0x13a] sm:$0xff] }
 0x29d   : > { %3619 = vrot.lane.b32.xlu1 %v4817_v44, %s5355_s30  ;;  %2652 = vrot.lane.b32.xlu0 %v7478_v47, %s5355_s30  ;;  %v3683_v55 = vsel %vm761_vm0, %v7143_v11, %v3342_v49 }
 0x29e   : > { %v5109_v34 = vpop.f32.mrb[0].mxu1 }
 0x29f   : > { %v2005_v6 = vadd.f32 %v7502_v61, %v5109_v34  ;;  %v1999_v63 = vpop.f32.mrb[1].mxu1  ;;  %v3470_v22 = vpop.permute.xlu1 %3469 }
 0x2a0   : > { %v2000_v39 = vadd.f32 %v7502_v61, %v1999_v63  ;;  %v3344_v51 = vpop.permute.xlu0 %3343  ;;  %v3715_v19 = vsel %vm794_vm1, %v3683_v55, %v3470_v22 }
 0x2a1   : > { %4473 = vst [vmem:[%s6857_s17 + $0x108] sm:$0xff] %v2005_v6  ;;  %2526 = vrot.lane.b32.xlu1 %v7497_v7, %s5354_s21  ;;  %3365 = vrot.lane.b32.xlu0 %v4816_v45, %s5353_s20  ;;  %v3684_v49 = vsel %vm761_vm0, %v7173_v5, %v3344_v51 }
 0x2a2   : > { %4472 = vst [vmem:[%s6857_s17 + $0x100] sm:$0xff] %v2000_v39  ;;  %v5112_v60 = vpop.f32.mrb[2].mxu1 }
 0x2a3   : > { %v2015_v15 = vadd.f32 %v7502_v61, %v5112_v60  ;;  %v2009_v48 = vpop.f32.mrb[3].mxu1  ;;  %v2631_v58 = vpop.permute.xlu1 %2630  ;;  %v7547_v60 = vld [vmem:[%s5400_s19 + $0x141] sm:$0xff] }
 0x2a4   : > { %v2010_v8 = vadd.f32 %v7502_v61, %v2009_v48  ;;  %v2780_v45 = vsel %vm827_vm2, %v2748_v14, %v2631_v58  ;;  %v2505_v16 = vpop.permute.xlu0 %2504  ;;  %v2717_v14 = vsel %vm761_vm0, %v7157_v33, %v7160_v23  ;;  %v4819_v23 = vld [vmem:[%s5400_s19 + $0x142] sm:$0xff] }
 0x2a5   : > { %4475 = vst [vmem:[%s6857_s17 + $0x118] sm:$0xff] %v2015_v15  ;;  %3493 = vrot.lane.b32.xlu1 %v7515_v20, %s5354_s21  ;;  %3367 = vrot.lane.b32.xlu0 %v4817_v44, %s5353_s20  ;;  %v2749_v5 = vsel %vm794_vm1, %v2717_v14, %v2505_v16 }
 0x2a6   : > { %4474 = vst [vmem:[%s6857_s17 + $0x110] sm:$0xff] %v2010_v8  ;;  %v5115_v21 = vpop.f32.mrb[4].mxu1  ;;  %5178 = vmatprep.mubr.msk.f32.mxu0 %vm870_vm3, %v2780_v45 }
 0x2a7   : > { %v2025_v34 = vadd.f32 %v7502_v61, %v5115_v21  ;;  %v2019_v6 = vpop.f32.mrb[5].mxu1  ;;  %v3598_v63 = vpop.permute.xlu1 %3597 }
 0x2a8   : > { %v2020_v44 = vadd.f32 %v7502_v61, %v2019_v6  ;;  %v3747_v39 = vsel %vm827_vm2, %v3715_v19, %v3598_v63  ;;  %v3472_v11 = vpop.permute.xlu0 %3471 }
 0x2a9   : > { %4477 = vst [vmem:[%s6857_s17 + $0x128] sm:$0xff] %v2025_v34  ;;  %2654 = vrot.lane.b32.xlu1 %v7515_v20, %s5355_s30  ;;  %2528 = vrot.lane.b32.xlu0 %v7530_v3, %s5354_s21  ;;  %v3716_v15 = vsel %vm794_vm1, %v3684_v49, %v3472_v11 }
 0x2aa   : > { %4476 = vst [vmem:[%s6857_s17 + $0x120] sm:$0xff] %v2020_v44  ;;  %v5118_v22 = vpop.f32.mrb[6].mxu1  ;;  %5234 = vmatprep.mubr.msk.f32.mxu1 %vm870_vm3, %v3747_v39 }
 0x2ab   : > { %v2035_v48 = vadd.f32 %v7502_v61, %v5118_v22  ;;  %v2029_v58 = vpop.f32.mrb[7].mxu1  ;;  %v3600_v8 = vpop.permute.xlu1 %3599 }
 0x2ac   : > { %v2030_v51 = vadd.f32 %v7502_v61, %v2029_v58  ;;  %v3748_v45 = vsel %vm827_vm2, %v3716_v15, %v3600_v8  ;;  %v2633_v55 = vpop.permute.xlu0 %2632  ;;  %v2718_v15 = vsel %vm761_vm0, %v7193_v25, %v7177_v27  ;;  %v7584_v58 = vld [vmem:[%s5400_s19 + $0x150] sm:$0xff] }
 0x2ad   : > { %4479 = vst [vmem:[%s6857_s17 + $0x138] sm:$0xff] %v2035_v48  ;;  %v2781_v21 = vsel %vm827_vm2, %v2749_v5, %v2633_v55  ;;  %3621 = vrot.lane.b32.xlu1 %v4818_v28, %s5355_s30  ;;  %3495 = vrot.lane.b32.xlu0 %v7547_v60, %s5354_s21 }
 0x2ae   : > { %4478 = vst [vmem:[%s6857_s17 + $0x130] sm:$0xff] %v2030_v51  ;;  %v5121_v33 = vpop.f32.mrb[8].mxu1  ;;  %5179 = vmatmul.mubr.msk.f32.gmra.mrb[42].mxu0 %vm870_vm3, %v2781_v21  ;;  %5235 = vmatmul.mubr.msk.f32.gmra.mrb[42].mxu1 %vm870_vm3, %v3748_v45 }
 0x2af   : > { %v2045_v16 = vadd.f32 %v7502_v61, %v5121_v33  ;;  %v2039_v19 = vpop.f32.mrb[9].mxu1  ;;  %v2507_v34 = vpop.permute.xlu1 %2506  ;;  %v7600_v33 = vld [vmem:[%s5400_s19 + $0x151] sm:$0xff] }
 0x2b0   : > { %v2040_v6 = vadd.f32 %v7502_v61, %v2039_v19  ;;  %v3346_v63 = vpop.permute.xlu0 %3345  ;;  %v2750_v8 = vsel %vm794_vm1, %v2718_v15, %v2507_v34 }
 0x2b1   : > { %4481 = vst [vmem:[%s6857_s17 + $0x148] sm:$0xff] %v2045_v16  ;;  %3623 = vrot.lane.b32.xlu1 %v4819_v23, %s5355_s30  ;;  %2656 = vrot.lane.b32.xlu0 %v7547_v60, %s5355_s30  ;;  %v3685_v27 = vsel %vm761_vm0, %v7201_v37, %v3346_v63 }
 0x2b2   : > { %4480 = vst [vmem:[%s6857_s17 + $0x140] sm:$0xff] %v2040_v6  ;;  %v5124_v44 = vpop.f32.mrb[10].mxu1 }
 0x2b3   : > { %v2055_v39 = vadd.f32 %v7502_v61, %v5124_v44  ;;  %v2049_v11 = vpop.f32.mrb[11].mxu1  ;;  %v3474_v49 = vpop.permute.xlu1 %3473 }
 0x2b4   : > { %v2050_v22 = vadd.f32 %v7502_v61, %v2049_v11  ;;  %v3348_v14 = vpop.permute.xlu0 %3347  ;;  %v3717_v16 = vsel %vm794_vm1, %v3685_v27, %v3474_v49  ;;  %v7615_v49 = vld [vmem:[%s5400_s19 + $0x158] sm:$0xff] }
 0x2b5   : > { %4483 = vst [vmem:[%s6857_s17 + $0x158] sm:$0xff] %v2055_v39  ;;  %3369 = vrot.lane.b32.xlu1 %v4818_v28, %s5353_s20  ;;  %2402 = vrot.lane.b32.xlu0 %v7515_v20, %s5353_s20  ;;  %v3686_v37 = vsel %vm761_vm0, %v7223_v2, %v3348_v14 }
 0x2b6   : > { %4482 = vst [vmem:[%s6857_s17 + $0x150] sm:$0xff] %v2050_v22  ;;  %v5127_v48 = vpop.f32.mrb[12].mxu1  ;;  %v2719_v22 = vsel %vm761_vm0, %v7213_v52, %v7175_v12  ;;  %v4820_v52 = vld [vmem:[%s5400_s19 + $0x152] sm:$0xff] }
 0x2b7   : > { %v2065_v5 = vadd.f32 %v7502_v61, %v5127_v48  ;;  %v2059_v51 = vpop.f32.mrb[13].mxu1  ;;  %v2635_v45 = vpop.permute.xlu1 %2634 }
 0x2b8   : > { %v2060_v28 = vadd.f32 %v7502_v61, %v2059_v51  ;;  %v2782_v55 = vsel %vm827_vm2, %v2750_v8, %v2635_v45  ;;  %v2509_v21 = vpop.permute.xlu0 %2508 }
 0x2b9   : > { %4485 = vst [vmem:[%s6857_s17 + $0x168] sm:$0xff] %v2065_v5  ;;  %2530 = vrot.lane.b32.xlu1 %v7584_v58, %s5354_s21  ;;  %2404 = vrot.lane.b32.xlu0 %v7547_v60, %s5353_s20  ;;  %v2751_v2 = vsel %vm794_vm1, %v2719_v22, %v2509_v21 }
 0x2ba   : > { %4484 = vst [vmem:[%s6857_s17 + $0x160] sm:$0xff] %v2060_v28  ;;  %v5130_v25 = vpop.f32.mrb[14].mxu1  ;;  %5181 = vmatprep.mubr.msk.f32.mxu0 %vm870_vm3, %v2782_v55  ;;  %v7636_v28 = vld [vmem:[%s5400_s19 + $0x159] sm:$0xff] }
 0x2bb   : > { %v2075_v19 = vadd.f32 %v7502_v61, %v5130_v25  ;;  %v2069_v34 = vpop.f32.mrb[15].mxu1  ;;  %v3602_v6 = vpop.permute.xlu1 %3601 }
 0x2bc   : > { %v2070_v44 = vadd.f32 %v7502_v61, %v2069_v34  ;;  %v3749_v39 = vsel %vm827_vm2, %v3717_v16, %v3602_v6  ;;  %v3476_v11 = vpop.permute.xlu0 %3475  ;;  %v4821_v34 = vld [vmem:[%s5400_s19 + $0x15a] sm:$0xff] }
 0x2bd   : > { %4487 = vst [vmem:[%s6857_s17 + $0x178] sm:$0xff] %v2075_v19  ;;  %3497 = vrot.lane.b32.xlu1 %v7600_v33, %s5354_s21  ;;  %3371 = vrot.lane.b32.xlu0 %v4819_v23, %s5353_s20  ;;  %v3718_v15 = vsel %vm794_vm1, %v3686_v37, %v3476_v11 }
 0x2be   : > { %4486 = vst [vmem:[%s6857_s17 + $0x170] sm:$0xff] %v2070_v44  ;;  %v5133_v63 = vpop.f32.mrb[16].mxu1  ;;  %5237 = vmatprep.mubr.msk.f32.mxu1 %vm870_vm3, %v3749_v39 }
 0x2bf   : > { %v2085_v48 = vadd.f32 %v7502_v61, %v5133_v63  ;;  %v2079_v23 = vpop.f32.mrb[17].mxu1  ;;  %v3604_v8 = vpop.permute.xlu1 %3603  ;;  %v2720_v63 = vsel %vm761_vm0, %v7238_v53, %v7185_v50 }
 0x2c0   : > { %v2080_v14 = vadd.f32 %v7502_v61, %v2079_v23  ;;  %v3750_v5 = vsel %vm827_vm2, %v3718_v15, %v3604_v8  ;;  %v2637_v51 = vpop.permute.xlu0 %2636 }
 0x2c1   : > { %4489 = vst [vmem:[%s6857_s17 + $0x188] sm:$0xff] %v2085_v48  ;;  %v2783_v45 = vsel %vm827_vm2, %v2751_v2, %v2637_v51  ;;  %2658 = vrot.lane.b32.xlu1 %v7600_v33, %s5355_s30  ;;  %2532 = vrot.lane.b32.xlu0 %v7615_v49, %s5354_s21  ;;  %v7669_v51 = vld [vmem:[%s5400_s19 + $0x168] sm:$0xff] }
 0x2c2   : > { %4488 = vst [vmem:[%s6857_s17 + $0x180] sm:$0xff] %v2080_v14  ;;  %v5136_v12 = vpop.f32.mrb[18].mxu1  ;;  %5182 = vmatmul.mubr.msk.f32.gmra.mrb[44].mxu0 %vm870_vm3, %v2783_v45  ;;  %5238 = vmatmul.mubr.msk.f32.gmra.mrb[44].mxu1 %vm870_vm3, %v3750_v5 }
 0x2c3   : > { %v2095_v55 = vadd.f32 %v7502_v61, %v5136_v12  ;;  %v2089_v21 = vpop.f32.mrb[19].mxu1  ;;  %v2511_v27 = vpop.permute.xlu1 %2510 }
 0x2c4   : > { %v2090_v25 = vadd.f32 %v7502_v61, %v2089_v21  ;;  %v3350_v16 = vpop.permute.xlu0 %3349  ;;  %v2752_v15 = vsel %vm794_vm1, %v2720_v63, %v2511_v27 }
 0x2c5   : > { %4491 = vst [vmem:[%s6857_s17 + $0x198] sm:$0xff] %v2095_v55  ;;  %3625 = vrot.lane.b32.xlu1 %v4820_v52, %s5355_s30  ;;  %3499 = vrot.lane.b32.xlu0 %v7636_v28, %s5354_s21  ;;  %v3687_v50 = vsel %vm761_vm0, %v7246_v36, %v3350_v16 }
 0x2c6   : > { %4490 = vst [vmem:[%s6857_s17 + $0x190] sm:$0xff] %v2090_v25  ;;  %v5139_v19 = vpop.f32.mrb[20].mxu1 }
 0x2c7   : > { %v2105_v6 = vadd.f32 %v7502_v61, %v5139_v19  ;;  %v2099_v44 = vpop.f32.mrb[21].mxu1  ;;  %v3478_v39 = vpop.permute.xlu1 %3477  ;;  %v7685_v19 = vld [vmem:[%s5400_s19 + $0x169] sm:$0xff] }
 0x2c8   : > { %v2100_v11 = vadd.f32 %v7502_v61, %v2099_v44  ;;  %v3352_v37 = vpop.permute.xlu0 %3351  ;;  %v3719_v45 = vsel %vm794_vm1, %v3687_v50, %v3478_v39  ;;  %v4822_v50 = vld [vmem:[%s5400_s19 + $0x16a] sm:$0xff] }
 0x2c9   : > { %4493 = vst [vmem:[%s6857_s17 + $0x1a8] sm:$0xff] %v2105_v6  ;;  %3627 = vrot.lane.b32.xlu1 %v4821_v34, %s5355_s30  ;;  %2660 = vrot.lane.b32.xlu0 %v7636_v28, %s5355_s30  ;;  %v3688_v36 = vsel %vm761_vm0, %v7271_v35, %v3352_v37  ;;  %v2721_v6 = vsel %vm761_vm0, %v7260_v26, %v7183_v13  ;;  %v7704_v26 = vld [vmem:[%s5400_s19 + $0x170] sm:$0xff] }
 0x2ca   : > { %4492 = vst [vmem:[%s6857_s17 + $0x1a0] sm:$0xff] %v2100_v11  ;;  %v5142_v22 = vpop.f32.mrb[22].mxu1 }
 0x2cb   : > { %v2115_v48 = vadd.f32 %v7502_v61, %v5142_v22  ;;  %v2109_v23 = vpop.f32.mrb[23].mxu1  ;;  %v2639_v8 = vpop.permute.xlu1 %2638 }
 0x2cc   : > { %v2110_v2 = vadd.f32 %v7502_v61, %v2109_v23  ;;  %v2784_v14 = vsel %vm827_vm2, %v2752_v15, %v2639_v8  ;;  %v2513_v5 = vpop.permute.xlu0 %2512 }
 0x2cd   : > { %4495 = vst [vmem:[%s6857_s17 + $0x1b8] sm:$0xff] %v2115_v48  ;;  %3373 = vrot.lane.b32.xlu1 %v4820_v52, %s5353_s20  ;;  %2406 = vrot.lane.b32.xlu0 %v7600_v33, %s5353_s20  ;;  %v2753_v35 = vsel %vm794_vm1, %v2721_v6, %v2513_v5 }
 0x2ce   : > { %4494 = vst [vmem:[%s6857_s17 + $0x1b0] sm:$0xff] %v2110_v2  ;;  %v5145_v53 = vpop.f32.mrb[24].mxu1  ;;  %5184 = vmatprep.mubr.msk.f32.mxu0 %vm870_vm3, %v2784_v14 }
 0x2cf   : > { %v2125_v12 = vadd.f32 %v7502_v61, %v5145_v53  ;;  %v2119_v55 = vpop.f32.mrb[25].mxu1  ;;  %v3606_v52 = vpop.permute.xlu1 %3605  ;;  %v7716_v53 = vld [vmem:[%s5400_s19 + $0x171] sm:$0xff] }
 0x2d0   : > { %v2120_v21 = vadd.f32 %v7502_v61, %v2119_v55  ;;  %v3751_v27 = vsel %vm827_vm2, %v3719_v45, %v3606_v52  ;;  %v3480_v25 = vpop.permute.xlu0 %3479 }
 0x2d1   : > { %4497 = vst [vmem:[%s6857_s17 + $0x1c8] sm:$0xff] %v2125_v12  ;;  %2534 = vrot.lane.b32.xlu1 %v7669_v51, %s5354_s21  ;;  %2408 = vrot.lane.b32.xlu0 %v7636_v28, %s5353_s20  ;;  %v3720_v44 = vsel %vm794_vm1, %v3688_v36, %v3480_v25  ;;  %v4823_v25 = vld [vmem:[%s5400_s19 + $0x172] sm:$0xff] }
 0x2d2   : > { %4496 = vst [vmem:[%s6857_s17 + $0x1c0] sm:$0xff] %v2120_v21  ;;  %v5148_v16 = vpop.f32.mrb[26].mxu1  ;;  %5240 = vmatprep.mubr.msk.f32.mxu1 %vm870_vm3, %v3751_v27  ;;  %v2722_v27 = vsel %vm761_vm0, %v7289_v38, %v7195_v42 }
 0x2d3   : > { %v2135_v39 = vadd.f32 %v7502_v61, %v5148_v16  ;;  %v2129_v11 = vpop.f32.mrb[27].mxu1  ;;  %v3608_v63 = vpop.permute.xlu1 %3607 }
 0x2d4   : > { %v2130_v37 = vadd.f32 %v7502_v61, %v2129_v11  ;;  %v3752_v22 = vsel %vm827_vm2, %v3720_v44, %v3608_v63  ;;  %v2641_v15 = vpop.permute.xlu0 %2640 }
 0x2d5   : > { %4499 = vst [vmem:[%s6857_s17 + $0x1d8] sm:$0xff] %v2135_v39  ;;  %v2785_v48 = vsel %vm827_vm2, %v2753_v35, %v2641_v15  ;;  %3501 = vrot.lane.b32.xlu1 %v7685_v19, %s5354_s21  ;;  %3375 = vrot.lane.b32.xlu0 %v4821_v34, %s5353_s20 }
 0x2d6   : > { %4498 = vst [vmem:[%s6857_s17 + $0x1d0] sm:$0xff] %v2130_v37  ;;  %v5151_v13 = vpop.f32.mrb[28].mxu1  ;;  %5185 = vmatmul.mubr.msk.f32.gmra.mrb[46].mxu0 %vm870_vm3, %v2785_v48  ;;  %5241 = vmatmul.mubr.msk.f32.gmra.mrb[46].mxu1 %vm870_vm3, %v3752_v22  ;;  %v2723_v37 = vsel %vm761_vm0, %v7311_v32, %v7190_v24  ;;  %v7762_v24 = vld [vmem:[%s5400_s19 + $0x181] sm:$0xff] }
 0x2d7   : > { %v2145_v23 = vadd.f32 %v7502_v61, %v5151_v13  ;;  %v2139_v8 = vpop.f32.mrb[29].mxu1  ;;  %v2515_v2 = vpop.permute.xlu1 %2514 }
 0x2d8   : > { %v2140_v14 = vadd.f32 %v7502_v61, %v2139_v8  ;;  %v3354_v5 = vpop.permute.xlu0 %3353  ;;  %v2754_v36 = vsel %vm794_vm1, %v2722_v27, %v2515_v2  ;;  %v7768_v2 = vld [vmem:[%s5400_s19 + $0x188] sm:$0xff] }
 0x2d9   : > { %4501 = vst [vmem:[%s6857_s17 + $0x1e8] sm:$0xff] %v2145_v23  ;;  %2662 = vrot.lane.b32.xlu1 %v7685_v19, %s5355_s30  ;;  %2536 = vrot.lane.b32.xlu0 %v7704_v26, %s5354_s21  ;;  %v3689_v39 = vsel %vm761_vm0, %v7298_v9, %v3354_v5  ;;  %v7746_v9 = vld [vmem:[%s5400_s19 + $0x180] sm:$0xff] }
 0x2da   : > { %4500 = vst [vmem:[%s6857_s17 + $0x1e0] sm:$0xff] %v2140_v14  ;;  %v5154_v34 = vpop.f32.mrb[30].mxu1 }
 0x2db   : > { %v2155_v45 = vadd.f32 %v7502_v61, %v5154_v34  ;;  %v2149_v12 = vpop.f32.mrb[31].mxu1  ;;  %v3482_v55 = vpop.permute.xlu1 %3481  ;;  %v2724_v34 = vsel %vm761_vm0, %v7341_v1, %v7205_v59  ;;  %v4825_v59 = vld [vmem:[%s5400_s19 + $0x18a] sm:$0xff] }
 0x2dc   : > { %v2150_v52 = vadd.f32 %v7502_v61, %v2149_v12  ;;  %v3356_v21 = vpop.permute.xlu0 %3355  ;;  %v3721_v42 = vsel %vm794_vm1, %v3689_v39, %v3482_v55 }
 0x2dd   : > { %4503 = vst [vmem:[%s6857_s17 + $0x1f8] sm:$0xff] %v2155_v45  ;;  %3629 = vrot.lane.b32.xlu1 %v4822_v50, %s5355_s30  ;;  %3503 = vrot.lane.b32.xlu0 %v7716_v53, %s5354_s21  ;;  %v3690_v35 = vsel %vm761_vm0, %v7322_v31, %v3356_v21  ;;  %v7779_v45 = vld [vmem:[%s5400_s19 + $0x189] sm:$0xff] }
 0x2de   : > { %4502 = vst [vmem:[%s6857_s17 + $0x1f0] sm:$0xff] %v2150_v52 }
 0x2df   : > { %v2643_v16 = vpop.permute.xlu1 %2642 }
 0x2e0   : > { %v2786_v6 = vsel %vm827_vm2, %v2754_v36, %v2643_v16  ;;  %v2517_v44 = vpop.permute.xlu0 %2516 }
 0x2e1   : > { %3631 = vrot.lane.b32.xlu1 %v4823_v25, %s5355_s30  ;;  %2664 = vrot.lane.b32.xlu0 %v7716_v53, %s5355_s30  ;;  %v2755_v48 = vsel %vm794_vm1, %v2723_v37, %v2517_v44 }
 0x2e2   : > { %5187 = vmatprep.mubr.msk.f32.mxu0 %vm870_vm3, %v2786_v6 }
 0x2e3   : > { %v3610_v38 = vpop.permute.xlu1 %3609 }
 0x2e4   : > { %v3753_v11 = vsel %vm827_vm2, %v3721_v42, %v3610_v38  ;;  %v3484_v63 = vpop.permute.xlu0 %3483 }
 0x2e5   : > { %3377 = vrot.lane.b32.xlu1 %v4822_v50, %s5353_s20  ;;  %2410 = vrot.lane.b32.xlu0 %v7685_v19, %s5353_s20  ;;  %v3722_v22 = vsel %vm794_vm1, %v3690_v35, %v3484_v63  ;;  %v4824_v50 = vld [vmem:[%s5400_s19 + $0x182] sm:$0xff]  ;;  %v4794_v35 = vld [vmem:[%s5400_s19 + $0x199] sm:$0xff] }
 0x2e6   : > { %5243 = vmatprep.mubr.msk.f32.mxu1 %vm870_vm3, %v3753_v11 }
 0x2e7   : > { %v3612_v15 = vpop.permute.xlu1 %3611 }
 0x2e8   : > { %v3754_v13 = vsel %vm827_vm2, %v3722_v22, %v3612_v15  ;;  %v2645_v23 = vpop.permute.xlu0 %2644  ;;  %v2726_v15 = vsel %vm761_vm0, %v7393_v46, %v7215_v29 }
 0x2e9   : > { %v2787_v8 = vsel %vm827_vm2, %v2755_v48, %v2645_v23  ;;  %2538 = vrot.lane.b32.xlu1 %v7746_v9, %s5354_s21  ;;  %2412 = vrot.lane.b32.xlu0 %v7716_v53, %s5353_s20  ;;  %v4599_v48 = vld [vmem:[%s5400_s19 + $0x1a0] sm:$0xff] }
 0x2ea   : > { %5188 = vmatmul.mubr.msk.f32.gmra.mrb[48].mxu0 %vm870_vm3, %v2787_v8  ;;  %5244 = vmatmul.mubr.msk.f32.gmra.mrb[48].mxu1 %vm870_vm3, %v3754_v13 }
 0x2eb   : > { %v2519_v32 = vpop.permute.xlu1 %2518 }
 0x2ec   : > { %v3358_v31 = vpop.permute.xlu0 %3357  ;;  %v2756_v12 = vsel %vm794_vm1, %v2724_v34, %v2519_v32 }
 0x2ed   : > { %3505 = vrot.lane.b32.xlu1 %v7762_v24, %s5354_s21  ;;  %3379 = vrot.lane.b32.xlu0 %v4823_v25, %s5353_s20  ;;  %v3691_v27 = vsel %vm761_vm0, %v7350_v30, %v3358_v31  ;;  %v2725_v30 = vsel %vm761_vm0, %v7363_v18, %v7203_v57  ;;  %v4598_v57 = vld [vmem:[%s5400_s19 + $0x198] sm:$0xff] }
 0x2ef   : > { %v3486_v14 = vpop.permute.xlu1 %3485 }
 0x2f0   : > { %v3360_v5 = vpop.permute.xlu0 %3359  ;;  %v3723_v1 = vsel %vm794_vm1, %v3691_v27, %v3486_v14  ;;  %v4826_v14 = vld [vmem:[%s5400_s19 + $0x19a] sm:$0xff] }
 0x2f1   : > { %2666 = vrot.lane.b32.xlu1 %v7762_v24, %s5355_s30  ;;  %2540 = vrot.lane.b32.xlu0 %v7768_v2, %s5354_s21  ;;  %v3692_v6 = vsel %vm761_vm0, %v7374_v10, %v3360_v5  ;;  %v4795_v5 = vld [vmem:[%s5400_s19 + $0x1a1] sm:$0xff] }
 0x2f3   : > { %v2647_v55 = vpop.permute.xlu1 %2646 }
 0x2f4   : > { %v2788_v52 = vsel %vm827_vm2, %v2756_v12, %v2647_v55  ;;  %v2521_v21 = vpop.permute.xlu0 %2520  ;;  %v2727_v55 = vsel %vm761_vm0, %v7415_v54, %v7210_v43 }
 0x2f5   : > { %3633 = vrot.lane.b32.xlu1 %v4824_v50, %s5355_s30  ;;  %3507 = vrot.lane.b32.xlu0 %v7779_v45, %s5354_s21  ;;  %v2757_v42 = vsel %vm794_vm1, %v2725_v30, %v2521_v21 }
 0x2f6   : > { %5190 = vmatprep.mubr.msk.f32.mxu0 %vm870_vm3, %v2788_v52 }
 0x2f7   : > { %v3614_v25 = vpop.permute.xlu1 %3613 }
 0x2f8   : > { %v3755_v36 = vsel %vm827_vm2, %v3723_v1, %v3614_v25  ;;  %v3488_v16 = vpop.permute.xlu0 %3487 }
 0x2f9   : > { %3635 = vrot.lane.b32.xlu1 %v4825_v59, %s5355_s30  ;;  %2668 = vrot.lane.b32.xlu0 %v7779_v45, %s5355_s30  ;;  %v3724_v44 = vsel %vm794_vm1, %v3692_v6, %v3488_v16  ;;  %v2728_v16 = vsel %vm761_vm0, %v7445_v4, %v7227_v0 }
 0x2fa   : > { %5246 = vmatprep.mubr.msk.f32.mxu1 %vm870_vm3, %v3755_v36 }
 0x2fb   : > { %v3616_v39 = vpop.permute.xlu1 %3615 }
 0x2fc   : > { %v3756_v38 = vsel %vm827_vm2, %v3724_v44, %v3616_v39  ;;  %v2649_v11 = vpop.permute.xlu0 %2648 }
 0x2fd   : > { %v2789_v63 = vsel %vm827_vm2, %v2757_v42, %v2649_v11  ;;  %3381 = vrot.lane.b32.xlu1 %v4824_v50, %s5353_s20  ;;  %2414 = vrot.lane.b32.xlu0 %v7762_v24, %s5353_s20 }
 0x2fe   : > { %5191 = vmatmul.mubr.msk.f32.gmra.mrb[50].mxu0 %vm870_vm3, %v2789_v63  ;;  %5247 = vmatmul.mubr.msk.f32.gmra.mrb[50].mxu1 %vm870_vm3, %v3756_v38 }
 0x2ff   : > { %v2523_v18 = vpop.permute.xlu1 %2522 }
 0x300   : > { %v3362_v10 = vpop.permute.xlu0 %3361  ;;  %v2758_v13 = vsel %vm794_vm1, %v2726_v15, %v2523_v18 }
 0x301   : > { %2542 = vrot.lane.b32.xlu1 %v4598_v57, %s5354_s21  ;;  %2416 = vrot.lane.b32.xlu0 %v7779_v45, %s5353_s20  ;;  %v3693_v31 = vsel %vm761_vm0, %v7402_v56, %v3362_v10  ;;  %v4827_v56 = vld [vmem:[%s5400_s19 + $0x1a2] sm:$0xff] }
 0x303   : > { %v3490_v37 = vpop.permute.xlu1 %3489 }
 0x304   : > { %v3364_v22 = vpop.permute.xlu0 %3363  ;;  %v3725_v29 = vsel %vm794_vm1, %v3693_v31, %v3490_v37 }
 0x305   : > { %3509 = vrot.lane.b32.xlu1 %v4794_v35, %s5354_s21  ;;  %3383 = vrot.lane.b32.xlu0 %v4825_v59, %s5353_s20  ;;  %v3694_v12 = vsel %vm761_vm0, %v7426_v40, %v3364_v22 }
 0x307   : > { %v2651_v23 = vpop.permute.xlu1 %2650 }
 0x308   : > { %v2790_v8 = vsel %vm827_vm2, %v2758_v13, %v2651_v23  ;;  %v2525_v32 = vpop.permute.xlu0 %2524 }
 0x309   : > { %2670 = vrot.lane.b32.xlu1 %v4794_v35, %s5355_s30  ;;  %2544 = vrot.lane.b32.xlu0 %v4599_v48, %s5354_s21  ;;  %v2759_v27 = vsel %vm794_vm1, %v2727_v55, %v2525_v32  ;;  %v2729_v48 = vsel %vm761_vm0, %v7466_v17, %v7225_v62 }
 0x30a   : > { %5193 = vmatprep.mubr.msk.f32.mxu0 %vm870_vm3, %v2790_v8 }
 0x30b   : > { %v3618_v46 = vpop.permute.xlu1 %3617 }
 0x30c   : > { %v3757_v34 = vsel %vm827_vm2, %v3725_v29, %v3618_v46  ;;  %v3492_v50 = vpop.permute.xlu0 %3491 }
 0x30d   : > { %3637 = vrot.lane.b32.xlu1 %v4826_v14, %s5355_s30  ;;  %3511 = vrot.lane.b32.xlu0 %v4795_v5, %s5354_s21  ;;  %v3726_v52 = vsel %vm794_vm1, %v3694_v12, %v3492_v50 }
 0x30e   : > { %5249 = vmatprep.mubr.msk.f32.mxu1 %vm870_vm3, %v3757_v34 }
 0x30f   : > { %v3620_v21 = vpop.permute.xlu1 %3619 }
 0x310   : > { %v3758_v59 = vsel %vm827_vm2, %v3726_v52, %v3620_v21  ;;  %v2653_v1 = vpop.permute.xlu0 %2652 }
 0x311   : > { %v2791_v25 = vsel %vm827_vm2, %v2759_v27, %v2653_v1  ;;  %3639 = vrot.lane.b32.xlu1 %v4827_v56, %s5355_s30  ;;  %2672 = vrot.lane.b32.xlu0 %v4795_v5, %s5355_s30 }
 0x312   : > { %5194 = vmatmul.mubr.msk.f32.gmra.mrb[52].mxu0 %vm870_vm3, %v2791_v25  ;;  %5250 = vmatmul.mubr.msk.f32.gmra.mrb[52].mxu1 %vm870_vm3, %v3758_v59 }
 0x313   : > { %v2527_v40 = vpop.permute.xlu1 %2526 }
 0x314   : > { %v3366_v43 = vpop.permute.xlu0 %3365  ;;  %v2760_v6 = vsel %vm794_vm1, %v2728_v16, %v2527_v40 }
 0x315   : > { %v3695_v11 = vsel %vm761_vm0, %v7454_v41, %v3366_v43 }
 0x317   : > { %v3494_v54 = vpop.permute.xlu1 %3493 }
 0x318   : > { %v3368_v36 = vpop.permute.xlu0 %3367  ;;  %v3727_v18 = vsel %vm794_vm1, %v3695_v11, %v3494_v54 }
 0x319   : > { %v3696_v41 = vsel %vm761_vm0, %v7478_v47, %v3368_v36 }
 0x31b   : > { %v2655_v30 = vpop.permute.xlu1 %2654 }
 0x31c   : > { %v2792_v44 = vsel %vm827_vm2, %v2760_v6, %v2655_v30  ;;  %v2529_v39 = vpop.permute.xlu0 %2528 }
 0x31d   : > { %v5165_v42 = vpop.f32.mrb[32].mxu0  ;;  %v5221_v38 = vpop.f32.mrb[32].mxu1  ;;  %5196 = vmatprep.mubr.msk.f32.mxu0 %vm870_vm3, %v2792_v44  ;;  %v2761_v8 = vsel %vm794_vm1, %v2729_v48, %v2529_v39 }
 0x31e   : > { %v2975_v63 = vadd.f32 %v7502_v61, %v5165_v42  ;;  %v3942_v0 = vadd.f32 %v7502_v61, %v5221_v38  ;;  %v2969_v4 = vpop.f32.mrb[33].mxu0  ;;  %v3936_v57 = vpop.f32.mrb[33].mxu1 }
 0x31f   : > { %v2970_v10 = vadd.f32 %v7502_v61, %v2969_v4  ;;  %v3937_v35 = vadd.f32 %v7502_v61, %v3936_v57  ;;  %v3622_v37 = vpop.permute.xlu1 %3621 }
 0x320   : > { %4669 = vst [vmem:[%s6857_s17 + $0x208] sm:$0xff] %v2975_v63  ;;  %4865 = vst [vmem:[%s6857_s17 + $0x308] sm:$0xff] %v3942_v0  ;;  %v3759_v22 = vsel %vm827_vm2, %v3727_v18, %v3622_v37  ;;  %v3496_v15 = vpop.permute.xlu0 %3495 }
 0x321   : > { %4668 = vst [vmem:[%s6857_s17 + $0x200] sm:$0xff] %v2970_v10  ;;  %4864 = vst [vmem:[%s6857_s17 + $0x300] sm:$0xff] %v3937_v35  ;;  %5252 = vmatprep.mubr.msk.f32.mxu1 %vm870_vm3, %v3759_v22  ;;  %v3728_v13 = vsel %vm794_vm1, %v3696_v41, %v3496_v15 }
 0x323   : > { %v3624_v23 = vpop.permute.xlu1 %3623 }
 0x324   : > { %v3760_v32 = vsel %vm827_vm2, %v3728_v13, %v3624_v23  ;;  %v2657_v31 = vpop.permute.xlu0 %2656 }
 0x325   : > { %v2793_v14 = vsel %vm827_vm2, %v2761_v8, %v2657_v31  ;;  %5253 = vmatmul.mubr.msk.f32.gmra.mrb[54].mxu1 %vm870_vm3, %v3760_v32 }
 0x326   : > { %5197 = vmatmul.mubr.msk.f32.gmra.mrb[54].mxu0 %vm870_vm3, %v2793_v14 }
 0x327   : > { %v3370_v5 = vpop.permute.xlu1 %3369 }
 0x328   : > { %v2403_v47 = vpop.permute.xlu0 %2402 }
 0x329   : > { %v2730_v12 = vsel %vm761_vm0, %v7497_v7, %v2403_v47  ;;  %v3697_v7 = vsel %vm761_vm0, %v7515_v20, %v3370_v5 }
 0x32b   : > { %v2531_v29 = vpop.permute.xlu1 %2530 }
 0x32c   : > { %v2405_v62 = vpop.permute.xlu0 %2404  ;;  %v2762_v27 = vsel %vm794_vm1, %v2730_v12, %v2531_v29 }
 0x32d   : > { %v2731_v44 = vsel %vm761_vm0, %v7530_v3, %v2405_v62 }
 0x32f   : > { %v3498_v17 = vpop.permute.xlu1 %3497 }
 0x330   : > { %v3372_v46 = vpop.permute.xlu0 %3371  ;;  %v3729_v54 = vsel %vm794_vm1, %v3697_v7, %v3498_v17 }
 0x331   : > { %v5168_v34 = vpop.f32.mrb[34].mxu0  ;;  %v5224_v50 = vpop.f32.mrb[34].mxu1  ;;  %v3698_v30 = vsel %vm761_vm0, %v7547_v60, %v3372_v46 }
 0x332   : > { %v2985_v56 = vadd.f32 %v7502_v61, %v5168_v34  ;;  %v3952_v55 = vadd.f32 %v7502_v61, %v5224_v50  ;;  %v2979_v52 = vpop.f32.mrb[35].mxu0  ;;  %v3946_v21 = vpop.f32.mrb[35].mxu1 }
 0x333   : > { %v2980_v59 = vadd.f32 %v7502_v61, %v2979_v52  ;;  %v3947_v1 = vadd.f32 %v7502_v61, %v3946_v21  ;;  %v2659_v25 = vpop.permute.xlu1 %2658 }
 0x334   : > { %4671 = vst [vmem:[%s6857_s17 + $0x218] sm:$0xff] %v2985_v56  ;;  %4867 = vst [vmem:[%s6857_s17 + $0x318] sm:$0xff] %v3952_v55  ;;  %v2794_v40 = vsel %vm827_vm2, %v2762_v27, %v2659_v25  ;;  %v2533_v43 = vpop.permute.xlu0 %2532 }
 0x335   : > { %4670 = vst [vmem:[%s6857_s17 + $0x210] sm:$0xff] %v2980_v59  ;;  %4866 = vst [vmem:[%s6857_s17 + $0x310] sm:$0xff] %v3947_v1  ;;  %5199 = vmatprep.mubr.msk.f32.mxu0 %vm870_vm3, %v2794_v40  ;;  %v2763_v38 = vsel %vm794_vm1, %v2731_v44, %v2533_v43 }
 0x337   : > { %v3626_v36 = vpop.permute.xlu1 %3625 }
 0x338   : > { %v3761_v16 = vsel %vm827_vm2, %v3729_v54, %v3626_v36  ;;  %v3500_v6 = vpop.permute.xlu0 %3499 }
 0x339   : > { %5255 = vmatprep.mubr.msk.f32.mxu1 %vm870_vm3, %v3761_v16  ;;  %v3730_v39 = vsel %vm794_vm1, %v3698_v30, %v3500_v6 }
 0x33b   : > { %v3628_v42 = vpop.permute.xlu1 %3627 }
 0x33c   : > { %v3762_v20 = vsel %vm827_vm2, %v3730_v39, %v3628_v42  ;;  %v2661_v11 = vpop.permute.xlu0 %2660 }
 0x33d   : > { %v2795_v63 = vsel %vm827_vm2, %v2763_v38, %v2661_v11  ;;  %5256 = vmatmul.mubr.msk.f32.gmra.mrb[56].mxu1 %vm870_vm3, %v3762_v20 }
 0x33e   : > { %5200 = vmatmul.mubr.msk.f32.gmra.mrb[56].mxu0 %vm870_vm3, %v2795_v63 }
 0x33f   : > { %v3374_v60 = vpop.permute.xlu1 %3373 }
 0x340   : > { %v2407_v0 = vpop.permute.xlu0 %2406  ;;  %v3699_v5 = vsel %vm761_vm0, %v7600_v33, %v3374_v60 }
 0x341   : > { %v2732_v23 = vsel %vm761_vm0, %v7584_v58, %v2407_v0 }
 0x343   : > { %v2535_v3 = vpop.permute.xlu1 %2534 }
 0x344   : > { %v2409_v4 = vpop.permute.xlu0 %2408  ;;  %v2764_v8 = vsel %vm794_vm1, %v2732_v23, %v2535_v3 }
 0x345   : > { %v5171_v57 = vpop.f32.mrb[36].mxu0  ;;  %v5227_v18 = vpop.f32.mrb[36].mxu1  ;;  %v2733_v46 = vsel %vm761_vm0, %v7615_v49, %v2409_v4 }
 0x346   : > { %v2995_v10 = vadd.f32 %v7502_v61, %v5171_v57  ;;  %v3962_v35 = vadd.f32 %v7502_v61, %v5227_v18  ;;  %v2989_v37 = vpop.f32.mrb[37].mxu0  ;;  %v3956_v22 = vpop.f32.mrb[37].mxu1 }
 0x347   : > { %v2990_v15 = vadd.f32 %v7502_v61, %v2989_v37  ;;  %v3957_v41 = vadd.f32 %v7502_v61, %v3956_v22  ;;  %v3502_v48 = vpop.permute.xlu1 %3501 }
 0x348   : > { %4673 = vst [vmem:[%s6857_s17 + $0x228] sm:$0xff] %v2995_v10  ;;  %4869 = vst [vmem:[%s6857_s17 + $0x328] sm:$0xff] %v3962_v35  ;;  %v3376_v13 = vpop.permute.xlu0 %3375  ;;  %v3731_v47 = vsel %vm794_vm1, %v3699_v5, %v3502_v48 }
 0x349   : > { %4672 = vst [vmem:[%s6857_s17 + $0x220] sm:$0xff] %v2990_v15  ;;  %4868 = vst [vmem:[%s6857_s17 + $0x320] sm:$0xff] %v3957_v41  ;;  %v3700_v58 = vsel %vm761_vm0, %v7636_v28, %v3376_v13 }
 0x34b   : > { %v2663_v32 = vpop.permute.xlu1 %2662 }
 0x34c   : > { %v2796_v31 = vsel %vm827_vm2, %v2764_v8, %v2663_v32  ;;  %v2537_v14 = vpop.permute.xlu0 %2536 }
 0x34d   : > { %5202 = vmatprep.mubr.msk.f32.mxu0 %vm870_vm3, %v2796_v31  ;;  %v2765_v12 = vsel %vm794_vm1, %v2733_v46, %v2537_v14 }
 0x34f   : > { %v3630_v29 = vpop.permute.xlu1 %3629 }
 0x350   : > { %v3763_v62 = vsel %vm827_vm2, %v3731_v47, %v3630_v29  ;;  %v3504_v17 = vpop.permute.xlu0 %3503 }
 0x351   : > { %5258 = vmatprep.mubr.msk.f32.mxu1 %vm870_vm3, %v3763_v62  ;;  %v3732_v34 = vsel %vm794_vm1, %v3700_v58, %v3504_v17 }
 0x353   : > { %v3632_v50 = vpop.permute.xlu1 %3631 }
 0x354   : > { %v3764_v33 = vsel %vm827_vm2, %v3732_v34, %v3632_v50  ;;  %v2665_v56 = vpop.permute.xlu0 %2664 }
 0x355   : > { %v2797_v55 = vsel %vm827_vm2, %v2765_v12, %v2665_v56  ;;  %5259 = vmatmul.mubr.msk.f32.gmra.mrb[58].mxu1 %vm870_vm3, %v3764_v33 }
 0x356   : > { %5203 = vmatmul.mubr.msk.f32.gmra.mrb[58].mxu0 %vm870_vm3, %v2797_v55 }
 0x357   : > { %v3378_v28 = vpop.permute.xlu1 %3377 }
 0x358   : > { %v2411_v49 = vpop.permute.xlu0 %2410  ;;  %v3701_v38 = vsel %vm761_vm0, %v7685_v19, %v3378_v28 }
 0x359   : > { %v5174_v52 = vpop.f32.mrb[38].mxu0  ;;  %v5230_v21 = vpop.f32.mrb[38].mxu1  ;;  %v2734_v6 = vsel %vm761_vm0, %v7669_v51, %v2411_v49 }
 0x35a   : > { %v3005_v27 = vadd.f32 %v7502_v61, %v5174_v52  ;;  %v3972_v59 = vadd.f32 %v7502_v61, %v5230_v21  ;;  %v2999_v1 = vpop.f32.mrb[39].mxu0  ;;  %v3966_v25 = vpop.f32.mrb[39].mxu1 }
 0x35b   : > { %v3000_v40 = vadd.f32 %v7502_v61, %v2999_v1  ;;  %v3967_v43 = vadd.f32 %v7502_v61, %v3966_v25  ;;  %v2539_v7 = vpop.permute.xlu1 %2538 }
 0x35c   : > { %4675 = vst [vmem:[%s6857_s17 + $0x238] sm:$0xff] %v3005_v27  ;;  %4871 = vst [vmem:[%s6857_s17 + $0x338] sm:$0xff] %v3972_v59  ;;  %v2413_v54 = vpop.permute.xlu0 %2412  ;;  %v2766_v30 = vsel %vm794_vm1, %v2734_v6, %v2539_v7 }
 0x35d   : > { %4674 = vst [vmem:[%s6857_s17 + $0x230] sm:$0xff] %v3000_v40  ;;  %4870 = vst [vmem:[%s6857_s17 + $0x330] sm:$0xff] %v3967_v43  ;;  %v2735_v0 = vsel %vm761_vm0, %v7704_v26, %v2413_v54 }
 0x35f   : > { %v3506_v36 = vpop.permute.xlu1 %3505 }
 0x360   : > { %v3380_v16 = vpop.permute.xlu0 %3379  ;;  %v3733_v20 = vsel %vm794_vm1, %v3701_v38, %v3506_v36 }
 0x361   : > { %v3702_v51 = vsel %vm761_vm0, %v7716_v53, %v3380_v16 }
 0x363   : > { %v2667_v44 = vpop.permute.xlu1 %2666 }
 0x364   : > { %v2798_v39 = vsel %vm827_vm2, %v2766_v30, %v2667_v44  ;;  %v2541_v42 = vpop.permute.xlu0 %2540 }
 0x365   : > { %5205 = vmatprep.mubr.msk.f32.mxu0 %vm870_vm3, %v2798_v39  ;;  %v2767_v19 = vsel %vm794_vm1, %v2735_v0, %v2541_v42 }
 0x367   : > { %v3634_v11 = vpop.permute.xlu1 %3633 }
 0x368   : > { %v3765_v63 = vsel %vm827_vm2, %v3733_v20, %v3634_v11  ;;  %v3508_v60 = vpop.permute.xlu0 %3507 }
 0x369   : > { %5261 = vmatprep.mubr.msk.f32.mxu1 %vm870_vm3, %v3765_v63  ;;  %v3734_v3 = vsel %vm794_vm1, %v3702_v51, %v3508_v60 }
 0x36b   : > { %v3636_v4 = vpop.permute.xlu1 %3635 }
 0x36c   : > { %v3766_v57 = vsel %vm827_vm2, %v3734_v3, %v3636_v4  ;;  %v2669_v18 = vpop.permute.xlu0 %2668 }
 0x36d   : > { %v2799_v10 = vsel %vm827_vm2, %v2767_v19, %v2669_v18  ;;  %v5177_v35 = vpop.f32.mrb[40].mxu0  ;;  %v5233_v37 = vpop.f32.mrb[40].mxu1  ;;  %5262 = vmatmul.mubr.msk.f32.gmra.mrb[60].mxu1 %vm870_vm3, %v3766_v57 }
 0x36e   : > { %v3015_v26 = vadd.f32 %v7502_v61, %v5177_v35  ;;  %v3982_v53 = vadd.f32 %v7502_v61, %v5233_v37  ;;  %v3009_v22 = vpop.f32.mrb[41].mxu0  ;;  %5206 = vmatmul.mubr.msk.f32.gmra.mrb[60].mxu0 %vm870_vm3, %v2799_v10  ;;  %v3976_v15 = vpop.f32.mrb[41].mxu1 }
 0x36f   : > { %v3010_v41 = vadd.f32 %v7502_v61, %v3009_v22  ;;  %v3977_v48 = vadd.f32 %v7502_v61, %v3976_v15  ;;  %v3382_v13 = vpop.permute.xlu1 %3381 }
 0x370   : > { %4677 = vst [vmem:[%s6857_s17 + $0x248] sm:$0xff] %v3015_v26  ;;  %4873 = vst [vmem:[%s6857_s17 + $0x348] sm:$0xff] %v3982_v53  ;;  %v2415_v23 = vpop.permute.xlu0 %2414  ;;  %v3703_v61 = vsel %vm761_vm0, %v7762_v24, %v3382_v13  ;;  %v7986_v24 = vld [vmem:[%s8095_s2] ss:$0 sm:$0xff] }
 0x371   : > { %4676 = vst [vmem:[%s6857_s17 + $0x240] sm:$0xff] %v3010_v41  ;;  %4872 = vst [vmem:[%s6857_s17 + $0x340] sm:$0xff] %v3977_v48  ;;  %v2736_v5 = vsel %vm761_vm0, %v7746_v9, %v2415_v23 }
 0x373   : > { %v2543_v8 = vpop.permute.xlu1 %2542 }
 0x374   : > { %v2417_v32 = vpop.permute.xlu0 %2416  ;;  %v2768_v47 = vsel %vm794_vm1, %v2736_v5, %v2543_v8 }
 0x375   : > { %v2737_v52 = vsel %vm761_vm0, %v7768_v2, %v2417_v32 }
 0x377   : > { %v3510_v31 = vpop.permute.xlu1 %3509 }
 0x378   : > { %v3384_v14 = vpop.permute.xlu0 %3383  ;;  %v3735_v58 = vsel %vm794_vm1, %v3703_v61, %v3510_v31 }
 0x379   : > { %v3704_v33 = vsel %vm761_vm0, %v7779_v45, %v3384_v14 }
 0x37b   : > { %v2671_v29 = vpop.permute.xlu1 %2670 }
 0x37c   : > { %v2800_v62 = vsel %vm827_vm2, %v2768_v47, %v2671_v29  ;;  %v2545_v17 = vpop.permute.xlu0 %2544 }
 0x37d   : > { %5208 = vmatprep.mubr.msk.f32.mxu0 %vm870_vm3, %v2800_v62  ;;  %v2769_v1 = vsel %vm794_vm1, %v2737_v52, %v2545_v17 }
 0x37f   : > { %v3638_v46 = vpop.permute.xlu1 %3637 }
 0x380   : > { %v3767_v34 = vsel %vm827_vm2, %v3735_v58, %v3638_v46  ;;  %v3512_v50 = vpop.permute.xlu0 %3511 }
 0x381   : > { %v5180_v12 = vpop.f32.mrb[42].mxu0  ;;  %v5236_v9 = vpop.f32.mrb[42].mxu1  ;;  %5264 = vmatprep.mubr.msk.f32.mxu1 %vm870_vm3, %v3767_v34  ;;  %v3736_v21 = vsel %vm794_vm1, %v3704_v33, %v3512_v50 }
 0x382   : > { %v3025_v56 = vadd.f32 %v7986_v24, %v5180_v12  ;;  %v3992_v55 = vadd.f32 %v7986_v24, %v5236_v9  ;;  %v3019_v28 = vpop.f32.mrb[43].mxu0  ;;  %v3986_v49 = vpop.f32.mrb[43].mxu1 }
 0x383   : > { %v3020_v45 = vadd.f32 %v7986_v24, %v3019_v28  ;;  %v3987_v27 = vadd.f32 %v7986_v24, %v3986_v49  ;;  %v3640_v59 = vpop.permute.xlu1 %3639 }
 0x384   : > { %4679 = vst [vmem:[%s6857_s17 + $0x258] sm:$0xff] %v3025_v56  ;;  %4875 = vst [vmem:[%s6857_s17 + $0x358] sm:$0xff] %v3992_v55  ;;  %v3768_v25 = vsel %vm827_vm2, %v3736_v21, %v3640_v59  ;;  %v2673_v40 = vpop.permute.xlu0 %2672 }
 0x385   : > { %4678 = vst [vmem:[%s6857_s17 + $0x250] sm:$0xff] %v3020_v45  ;;  %4874 = vst [vmem:[%s6857_s17 + $0x350] sm:$0xff] %v3987_v27  ;;  %v2801_v2 = vsel %vm827_vm2, %v2769_v1, %v2673_v40  ;;  %5265 = vmatmul.mubr.msk.f32.gmra.mrb[62].mxu1 %vm870_vm3, %v3768_v25 }
 0x386   : > { %5209 = vmatmul.mubr.msk.f32.gmra.mrb[62].mxu0 %vm870_vm3, %v2801_v2 }
 0x395   : > { %v5183_v43 = vpop.f32.mrb[44].mxu0  ;;  %v5239_v7 = vpop.f32.mrb[44].mxu1 }
 0x396   : > { %v3035_v54 = vadd.f32 %v7986_v24, %v5183_v43  ;;  %v4002_v36 = vadd.f32 %v7986_v24, %v5239_v7  ;;  %v3029_v16 = vpop.f32.mrb[45].mxu0  ;;  %v3996_v6 = vpop.f32.mrb[45].mxu1 }
 0x397   : > { %v3030_v30 = vadd.f32 %v7986_v24, %v3029_v16  ;;  %v3997_v44 = vadd.f32 %v7986_v24, %v3996_v6 }
 0x398   : > { %4681 = vst [vmem:[%s6857_s17 + $0x268] sm:$0xff] %v3035_v54  ;;  %4877 = vst [vmem:[%s6857_s17 + $0x368] sm:$0xff] %v4002_v36 }
 0x399   : > { %4680 = vst [vmem:[%s6857_s17 + $0x260] sm:$0xff] %v3030_v30  ;;  %4876 = vst [vmem:[%s6857_s17 + $0x360] sm:$0xff] %v3997_v44 }
 0x3a9   : > { %v5186_v39 = vpop.f32.mrb[46].mxu0  ;;  %v5242_v42 = vpop.f32.mrb[46].mxu1 }
 0x3aa   : > { %v3045_v38 = vadd.f32 %v7986_v24, %v5186_v39  ;;  %v4012_v20 = vadd.f32 %v7986_v24, %v5242_v42  ;;  %v3039_v11 = vpop.f32.mrb[47].mxu0  ;;  %v4006_v63 = vpop.f32.mrb[47].mxu1 }
 0x3ab   : > { %v3040_v60 = vadd.f32 %v7986_v24, %v3039_v11  ;;  %v4007_v51 = vadd.f32 %v7986_v24, %v4006_v63 }
 0x3ac   : > { %4683 = vst [vmem:[%s6857_s17 + $0x278] sm:$0xff] %v3045_v38  ;;  %4879 = vst [vmem:[%s6857_s17 + $0x378] sm:$0xff] %v4012_v20 }
 0x3ad   : > { %4682 = vst [vmem:[%s6857_s17 + $0x270] sm:$0xff] %v3040_v60  ;;  %4878 = vst [vmem:[%s6857_s17 + $0x370] sm:$0xff] %v4007_v51 }
 0x3bd   : > { %v5189_v0 = vpop.f32.mrb[48].mxu0  ;;  %v5245_v3 = vpop.f32.mrb[48].mxu1 }
 0x3be   : > { %v3055_v4 = vadd.f32 %v7986_v24, %v5189_v0  ;;  %v4022_v19 = vadd.f32 %v7986_v24, %v5245_v3  ;;  %v3049_v57 = vpop.f32.mrb[49].mxu0  ;;  %v4016_v18 = vpop.f32.mrb[49].mxu1 }
 0x3bf   : > { %v3050_v10 = vadd.f32 %v7986_v24, %v3049_v57  ;;  %v4017_v35 = vadd.f32 %v7986_v24, %v4016_v18 }
 0x3c0   : > { %4685 = vst [vmem:[%s6857_s17 + $0x288] sm:$0xff] %v3055_v4  ;;  %4881 = vst [vmem:[%s6857_s17 + $0x388] sm:$0xff] %v4022_v19 }
 0x3c1   : > { %4684 = vst [vmem:[%s6857_s17 + $0x280] sm:$0xff] %v3050_v10  ;;  %4880 = vst [vmem:[%s6857_s17 + $0x380] sm:$0xff] %v4017_v35 }
 0x3d1   : > { %v5192_v37 = vpop.f32.mrb[50].mxu0  ;;  %v5248_v26 = vpop.f32.mrb[50].mxu1 }
 0x3d2   : > { %v3065_v53 = vadd.f32 %v7986_v24, %v5192_v37  ;;  %v4032_v22 = vadd.f32 %v7986_v24, %v5248_v26  ;;  %v3059_v15 = vpop.f32.mrb[51].mxu0  ;;  %v4026_v41 = vpop.f32.mrb[51].mxu1 }
 0x3d3   : > { %v3060_v48 = vadd.f32 %v7986_v24, %v3059_v15  ;;  %v4027_v13 = vadd.f32 %v7986_v24, %v4026_v41 }
 0x3d4   : > { %4687 = vst [vmem:[%s6857_s17 + $0x298] sm:$0xff] %v3065_v53  ;;  %4883 = vst [vmem:[%s6857_s17 + $0x398] sm:$0xff] %v4032_v22 }
 0x3d5   : > { %4686 = vst [vmem:[%s6857_s17 + $0x290] sm:$0xff] %v3060_v48  ;;  %4882 = vst [vmem:[%s6857_s17 + $0x390] sm:$0xff] %v4027_v13 }
 0x3e5   : > { %v5195_v23 = vpop.f32.mrb[52].mxu0  ;;  %v5251_v8 = vpop.f32.mrb[52].mxu1 }
 0x3e6   : > { %v3075_v32 = vadd.f32 %v7986_v24, %v5195_v23  ;;  %v4042_v31 = vadd.f32 %v7986_v24, %v5251_v8  ;;  %v3069_v14 = vpop.f32.mrb[53].mxu0  ;;  %v4036_v5 = vpop.f32.mrb[53].mxu1 }
 0x3e7   : > { %v3070_v47 = vadd.f32 %v7986_v24, %v3069_v14  ;;  %v4037_v29 = vadd.f32 %v7986_v24, %v4036_v5 }
 0x3e8   : > { %4689 = vst [vmem:[%s6857_s17 + $0x2a8] sm:$0xff] %v3075_v32  ;;  %4885 = vst [vmem:[%s6857_s17 + $0x3a8] sm:$0xff] %v4042_v31 }
 0x3e9   : > { %4688 = vst [vmem:[%s6857_s17 + $0x2a0] sm:$0xff] %v3070_v47  ;;  %4884 = vst [vmem:[%s6857_s17 + $0x3a0] sm:$0xff] %v4037_v29 }
 0x3f8   : > { %v5254_v62 = vpop.f32.mrb[54].mxu1 }
 0x3f9   : > { %v5198_v17 = vpop.f32.mrb[54].mxu0  ;;  %v4052_v61 = vadd.f32 %v7986_v24, %v5254_v62  ;;  %v4046_v58 = vpop.f32.mrb[55].mxu1 }
 0x3fa   : > { %v3085_v46 = vadd.f32 %v7986_v24, %v5198_v17  ;;  %v3079_v34 = vpop.f32.mrb[55].mxu0  ;;  %v4047_v50 = vadd.f32 %v7986_v24, %v4046_v58 }
 0x3fb   : > { %4887 = vst [vmem:[%s6857_s17 + $0x3b8] sm:$0xff] %v4052_v61  ;;  %v3080_v12 = vadd.f32 %v7986_v24, %v3079_v34 }
 0x3fc   : > { %4691 = vst [vmem:[%s6857_s17 + $0x2b8] sm:$0xff] %v3085_v46  ;;  %4886 = vst [vmem:[%s6857_s17 + $0x3b0] sm:$0xff] %v4047_v50 }
 0x3fd   : > { %4690 = vst [vmem:[%s6857_s17 + $0x2b0] sm:$0xff] %v3080_v12 }
 0x410   : > { %v5257_v9 = vpop.f32.mrb[56].mxu1 }
 0x411   : > { %v5201_v33 = vpop.f32.mrb[56].mxu0  ;;  %v4062_v56 = vadd.f32 %v7986_v24, %v5257_v9  ;;  %v4056_v55 = vpop.f32.mrb[57].mxu1 }
 0x412   : > { %v3095_v28 = vadd.f32 %v7986_v24, %v5201_v33  ;;  %v3089_v49 = vpop.f32.mrb[57].mxu0  ;;  %v4057_v52 = vadd.f32 %v7986_v24, %v4056_v55 }
 0x413   : > { %4889 = vst [vmem:[%s6857_s17 + $0x3c8] sm:$0xff] %v4062_v56  ;;  %v3090_v21 = vadd.f32 %v7986_v24, %v3089_v49 }
 0x414   : > { %4693 = vst [vmem:[%s6857_s17 + $0x2c8] sm:$0xff] %v3095_v28  ;;  %4888 = vst [vmem:[%s6857_s17 + $0x3c0] sm:$0xff] %v4057_v52 }
 0x415   : > { %4692 = vst [vmem:[%s6857_s17 + $0x2c0] sm:$0xff] %v3090_v21 }
 0x428   : > { %v5260_v45 = vpop.f32.mrb[58].mxu1 }
 0x429   : > { %v5204_v27 = vpop.f32.mrb[58].mxu0  ;;  %v4072_v59 = vadd.f32 %v7986_v24, %v5260_v45  ;;  %v4066_v1 = vpop.f32.mrb[59].mxu1 }
 0x42a   : > { %v3105_v25 = vadd.f32 %v7986_v24, %v5204_v27  ;;  %v3099_v40 = vpop.f32.mrb[59].mxu0  ;;  %v4067_v2 = vadd.f32 %v7986_v24, %v4066_v1 }
 0x42b   : > { %4891 = vst [vmem:[%s6857_s17 + $0x3d8] sm:$0xff] %v4072_v59  ;;  %v3100_v43 = vadd.f32 %v7986_v24, %v3099_v40 }
 0x42c   : > { %4695 = vst [vmem:[%s6857_s17 + $0x2d8] sm:$0xff] %v3105_v25  ;;  %4890 = vst [vmem:[%s6857_s17 + $0x3d0] sm:$0xff] %v4067_v2 }
 0x42d   : > { %4694 = vst [vmem:[%s6857_s17 + $0x2d0] sm:$0xff] %v3100_v43 }
 0x440   : > { %v5263_v7 = vpop.f32.mrb[60].mxu1 }
 0x441   : > { %v5207_v54 = vpop.f32.mrb[60].mxu0  ;;  %v4082_v36 = vadd.f32 %v7986_v24, %v5263_v7  ;;  %v4076_v16 = vpop.f32.mrb[61].mxu1 }
 0x442   : > { %v3115_v6 = vadd.f32 %v7986_v24, %v5207_v54  ;;  %v3109_v30 = vpop.f32.mrb[61].mxu0  ;;  %v4077_v44 = vadd.f32 %v7986_v24, %v4076_v16 }
 0x443   : > { %4893 = vst [vmem:[%s6857_s17 + $0x3e8] sm:$0xff] %v4082_v36  ;;  %v3110_v39 = vadd.f32 %v7986_v24, %v3109_v30 }
 0x444   : > { %4697 = vst [vmem:[%s6857_s17 + $0x2e8] sm:$0xff] %v3115_v6  ;;  %4892 = vst [vmem:[%s6857_s17 + $0x3e0] sm:$0xff] %v4077_v44 }
 0x445   : > { %4696 = vst [vmem:[%s6857_s17 + $0x2e0] sm:$0xff] %v3110_v39 }
 0x458   : > { %v5266_v42 = vpop.f32.mrb[62].mxu1 }
 0x459   : > { %v5210_v38 = vpop.f32.mrb[62].mxu0  ;;  %v4092_v20 = vadd.f32 %v7986_v24, %v5266_v42  ;;  %v4086_v11 = vpop.f32.mrb[63].mxu1 }
 0x45a   : > { %v3125_v63 = vadd.f32 %v7986_v24, %v5210_v38  ;;  %v3119_v60 = vpop.f32.mrb[63].mxu0  ;;  %v4087_v51 = vadd.f32 %v7986_v24, %v4086_v11 }
 0x45b   : > { %4895 = vst [vmem:[%s6857_s17 + $0x3f8] sm:$0xff] %v4092_v20  ;;  %v3120_v0 = vadd.f32 %v7986_v24, %v3119_v60 }
 0x45c   : > { %4699 = vst [vmem:[%s6857_s17 + $0x2f8] sm:$0xff] %v3125_v63  ;;  %4894 = vst [vmem:[%s6857_s17 + $0x3f0] sm:$0xff] %v4087_v51 }
 0x45d   : > { %4698 = vst [vmem:[%s6857_s17 + $0x2f0] sm:$0xff] %v3120_v0 }
 0x45e PF: > { %s13_s14 = sadd.s32 1, %s5351_s14   ;;  %s8434_s12 = smov %s5347_s13 }
 0x45f   : > { %p10_p5 = scmp.ge.s32.totalorder %s13_s14, 4   ;;  %s8435_s13 = smov %s8437_s15 }
 0x461   :  { %12 = sbr.rel (!%p10_p5) target bundleno = 2 (0x2), region = 77 }

</bundles_post_ra>
